<compile_context>
chip_gen: v6e
topology: v6e:2x2x1
jax: 0.10.0
libtpu: 0.0.40
codegen_flags: <defaults>
</compile_context>

<pallas_src>
import functools

import jax
import jax.numpy as jnp
import numpy as np
from jax.experimental import pallas as pl
from jax.experimental.pallas import tpu as pltpu

_SUBLANE = 8
_LANE = 128


def _round_up(x, m):
    return (x + m - 1) // m * m


def _permute_gates_ifog(w, hidden_size):
    """Permute last-dim gate blocks from PyTorch [i, f, g, o] to [i, f, o, g]."""
    H = hidden_size
    return jnp.concatenate(
        [w[..., :2 * H], w[..., 3 * H:4 * H], w[..., 2 * H:3 * H]], axis=-1)


# -----------------------------------------------------------------------------
# Fused kernel: all LSTM layers + FC epilogue in one invocation.
# Ref layout (positional):
#   refs[0]                      : x        (T*B, F0)   time-major slab
#   refs[1+3l .. 3+3l]           : W_ih[l] (D,Fin,4H), W_hh[l] (D,H,4H), b[l] (D,1,4H)
#   refs[1+3L], refs[2+3L]       : fc_w (D*H, C_pad), fc_b (1, C_pad)
#   refs[3+3L]                   : out (B, C_pad)
# Gate columns are pre-permuted to [i, f, o, g].
# -----------------------------------------------------------------------------
def _lstm_net_kernel(*refs, hidden_size, seq_len, batch, num_layers, num_dirs):
    H, T, B = hidden_size, seq_len, batch
    x_ref = refs[0]
    fcw_ref = refs[1 + 3 * num_layers]
    fcb_ref = refs[2 + 3 * num_layers]
    out_ref = refs[3 + 3 * num_layers]

    x = x_ref[...]  # (T*B, F_in), rows t*B .. t*B+B-1 are timestep t

    finals = None
    for layer in range(num_layers):
        wih_ref = refs[1 + 3 * layer]
        whh_ref = refs[2 + 3 * layer]
        b_ref = refs[3 + 3 * layer]
        last_layer = layer == num_layers - 1

        # Hoisted input projection for every direction (one matmul each, with a
        # real M = T*B dimension), plus recurrent weights loaded once.
        gx, whh = [], []
        for d in range(num_dirs):
            gx.append(jnp.dot(x, wih_ref[d],
                              preferred_element_type=jnp.float32) + b_ref[d])
            whh.append(whh_ref[d])

        h = [jnp.zeros((B, H), jnp.float32) for _ in range(num_dirs)]
        c = [jnp.zeros((B, H), jnp.float32) for _ in range(num_dirs)]
        outs = [[None] * T for _ in range(num_dirs)]

        # Static, fully-unrolled recurrence.  The forward (d=0) and reverse
        # (d=1) chains are independent and interleaved in the same iteration,
        # so one chain's matmul/transcendental latency hides the other's.
        for s in range(T):
            for d in range(num_dirs):
                t = s if d == 0 else T - 1 - s
                gates = gx[d][t * B:(t + 1) * B, :] + jnp.dot(
                    h[d], whh[d], preferred_element_type=jnp.float32)
                # Columns are [i | f | o | g]: one sigmoid push + one tanh push.
                sig = jax.nn.sigmoid(gates[:, :3 * H])
                g_t = jnp.tanh(gates[:, 3 * H:])
                c[d] = sig[:, H:2 * H] * c[d] + sig[:, :H] * g_t
                h[d] = sig[:, 2 * H:3 * H] * jnp.tanh(c[d])
                if not last_layer:
                    outs[d][t] = h[d]

        if last_layer:
            finals = h  # h[0] = final forward hidden, h[1] = final reverse hidden
        else:
            # Build the next layer's input slab (T*B, num_dirs*H) with static
            # concatenation — no HBM trip, no wrapper concat.
            rows = []
            for t in range(T):
                rows.append(jnp.concatenate([outs[d][t] for d in range(num_dirs)],
                                            axis=1)
                            if num_dirs == 2 else outs[0][t])
            x = jnp.concatenate(rows, axis=0)
            # TODO(synk): inter-layer dropout (identity in eval mode).

    # Fused FC epilogue: cat(h_fwd, h_rev) @ W + b == sum_d h_d @ W[d*H:(d+1)*H].
    logits = fcb_ref[...]  # (1, C_pad), broadcasts against (B, C_pad)
    for d in range(num_dirs):
        logits = logits + jnp.dot(finals[d], fcw_ref[d * H:(d + 1) * H, :],
                                  preferred_element_type=jnp.float32)
    out_ref[...] = logits.astype(out_ref.dtype)


# -----------------------------------------------------------------------------
# Wrapper: single pallas_call for the whole network.
# -----------------------------------------------------------------------------
def lstm_net_forward(x_btf, kparams, *, hidden_size, num_layers, num_classes,
                     bidirectional):
    """x_btf: (B, T, num_inputs), batch_first like PyTorch. Returns logits (B, C)."""
    B, T, F0 = x_btf.shape
    num_dirs = 2 if bidirectional else 1
    B_pad = _round_up(max(B, 1), _SUBLANE)
    C_pad = kparams["fc_w"].shape[-1]

    # Pad batch to a full sublane tile and flatten time-major so every in-kernel
    # row slice is an aligned, unmasked 8-sublane block.  (One tiny XLA op on a
    # few-hundred-element array; everything else happens inside the kernel.)
    x_p = jnp.pad(x_btf, ((0, B_pad - B), (0, 0), (0, 0)))
    x2d = jnp.transpose(x_p, (1, 0, 2)).reshape(T * B_pad, F0)

    kernel = functools.partial(
        _lstm_net_kernel, hidden_size=hidden_size, seq_len=T, batch=B_pad,
        num_layers=num_layers, num_dirs=num_dirs)

    inputs = [x2d]
    in_specs = [pl.BlockSpec(x2d.shape, lambda i: (0, 0))]
    for layer in range(num_layers):
        w_ih, w_hh, b = kparams["lstm"][layer]
        inputs += [w_ih, w_hh, b]
        in_specs += [
            pl.BlockSpec(w_ih.shape, lambda i: (0, 0, 0)),
            pl.BlockSpec(w_hh.shape, lambda i: (0, 0, 0)),
            pl.BlockSpec(b.shape, lambda i: (0, 0, 0)),
        ]
    inputs += [kparams["fc_w"], kparams["fc_b"]]
    in_specs += [pl.BlockSpec(kparams["fc_w"].shape, lambda i: (0, 0)),
                 pl.BlockSpec(kparams["fc_b"].shape, lambda i: (0, 0))]

    out_padded = pl.pallas_call(
        kernel,
        out_shape=jax.ShapeDtypeStruct((B_pad, C_pad), jnp.float32),
        grid_spec=pltpu.PrefetchScalarGridSpec(
            num_scalar_prefetch=0,
            grid=(1,),
            in_specs=in_specs,
            out_specs=pl.BlockSpec((B_pad, C_pad), lambda i: (0, 0)),
        ),
        compiler_params=pltpu.CompilerParams(
            dimension_semantics=("arbitrary",),
            vmem_limit_bytes=32 * 1024 * 1024),
    )(*inputs)

    return out_padded[:B, :num_classes]


# -----------------------------------------------------------------------------
# Pure-JAX reference (PyTorch semantics, gate order [i, f, g, o]).
# -----------------------------------------------------------------------------
def lstm_net_reference(x_btf, params, *, hidden_size, num_layers, bidirectional):
    H = hidden_size
    num_dirs = 2 if bidirectional else 1
    x = jnp.transpose(x_btf, (1, 0, 2))  # (T, B, F)
    T, B, _ = x.shape

    def cell(carry, x_t, w_ih, w_hh, b):
        h, c = carry
        gates = x_t @ w_ih + h @ w_hh + b
        i = jax.nn.sigmoid(gates[:, :H])
        f = jax.nn.sigmoid(gates[:, H:2 * H])
        g = jnp.tanh(gates[:, 2 * H:3 * H])
        o = jax.nn.sigmoid(gates[:, 3 * H:])
        c_new = f * c + i * g
        h_new = o * jnp.tanh(c_new)
        return (h_new, c_new), h_new

    finals = None
    for layer in range(num_layers):
        w_ih_s, w_hh_s, b_s = params["lstm"][layer]
        dir_outs, dir_finals = [], []
        for d in range(num_dirs):
            w_ih, w_hh, b = w_ih_s[d], w_hh_s[d], b_s[d]
            seq = x[::-1] if d == 1 else x
            h0 = jnp.zeros((B, H), jnp.float32)
            c0 = jnp.zeros((B, H), jnp.float32)
            (h_fin, _), outs = jax.lax.scan(
                lambda carry, xt: cell(carry, xt, w_ih, w_hh, b), (h0, c0), seq)
            if d == 1:
                outs = outs[::-1]
            dir_outs.append(outs)
            dir_finals.append(h_fin)
        x = jnp.concatenate(dir_outs, axis=-1) if num_dirs == 2 else dir_outs[0]
        finals = dir_finals

    last_hidden = (jnp.concatenate([finals[0], finals[1]], axis=1)
                   if num_dirs == 2 else finals[0])
    return last_hidden @ params["fc_w"] + params["fc_b"]


# -----------------------------------------------------------------------------
# Parameter init (PyTorch layouts) + one-time packing for the kernel.
# -----------------------------------------------------------------------------
def init_params(key, num_inputs, hidden_size, num_layers, num_classes,
                bidirectional):
    H = hidden_size
    D = 2 if bidirectional else 1
    k = 1.0 / np.sqrt(H)
    params = {"lstm": {}}
    for layer in range(num_layers):
        in_dim = num_inputs if layer == 0 else H * D
        key, k1, k2, k3, k4 = jax.random.split(key, 5)
        w_ih = jax.random.uniform(k1, (D, in_dim, 4 * H), jnp.float32, -k, k)
        w_hh = jax.random.uniform(k2, (D, H, 4 * H), jnp.float32, -k, k)
        b_ih = jax.random.uniform(k3, (D, 1, 4 * H), jnp.float32, -k, k)
        b_hh = jax.random.uniform(k4, (D, 1, 4 * H), jnp.float32, -k, k)
        params["lstm"][layer] = (w_ih, w_hh, b_ih + b_hh)  # biases folded
    fc_in = H * D
    kf = 1.0 / np.sqrt(fc_in)
    key, k1, k2 = jax.random.split(key, 3)
    params["fc_w"] = jax.random.uniform(k1, (fc_in, num_classes), jnp.float32,
                                        -kf, kf)
    params["fc_b"] = jax.random.uniform(k2, (1, num_classes), jnp.float32,
                                        -kf, kf)
    return params


def pack_params_for_kernel(params, *, hidden_size, num_layers, num_classes):
    """Permute gate columns to [i,f,o,g] and pad the FC to 128 output lanes."""
    H = hidden_size
    C_pad = _round_up(num_classes, _LANE)
    kp = {"lstm": {}}
    for layer in range(num_layers):
        w_ih, w_hh, b = params["lstm"][layer]
        kp["lstm"][layer] = (_permute_gates_ifog(w_ih, H),
                             _permute_gates_ifog(w_hh, H),
                             _permute_gates_ifog(b, H))
    kp["fc_w"] = jnp.pad(params["fc_w"],
                         ((0, 0), (0, C_pad - params["fc_w"].shape[-1])))
    kp["fc_b"] = jnp.pad(params["fc_b"],
                         ((0, 0), (0, C_pad - params["fc_b"].shape[-1])))
    return kp


if __name__ == "__main__":
    # Small shapes implied by the module's forward: x is (batch, seq, num_inputs).
    B, T = 2, 8
    num_inputs, hidden_size, num_layers, num_classes = 4, 32, 2, 5
    bidirectional = True

    key = jax.random.PRNGKey(0)
    key, kx = jax.random.split(key)
    x = jax.random.normal(kx, (B, T, num_inputs), jnp.float32)

    params = init_params(key, num_inputs, hidden_size, num_layers,
                         num_classes, bidirectional)
    kparams = pack_params_for_kernel(params, hidden_size=hidden_size,
                                     num_layers=num_layers,
                                     num_classes=num_classes)

    fwd = jax.jit(functools.partial(
        lstm_net_forward, hidden_size=hidden_size, num_layers=num_layers,
        num_classes=num_classes, bidirectional=bidirectional))
    logits = jax.block_until_ready(fwd(x, kparams))

    ref = jax.block_until_ready(
        lstm_net_reference(x, params, hidden_size=hidden_size,
                           num_layers=num_layers, bidirectional=bidirectional))

    np.testing.assert_allclose(np.asarray(logits), np.asarray(ref),
                               rtol=1e-5, atol=1e-5)
    assert logits.shape == (B, num_classes)
    print("KERNEL_OK")
</pallas_src>

<mosaic_0001>
module attributes {stable_mosaic.version = 11 : i64} {
  func.func @_lstm_net_kernel(%arg0: i32, %arg1: memref<64x4xf32, #tpu.memory_space<vmem>>, %arg2: memref<2x4x128xf32, #tpu.memory_space<vmem>>, %arg3: memref<2x32x128xf32, #tpu.memory_space<vmem>>, %arg4: memref<2x1x128xf32, #tpu.memory_space<vmem>>, %arg5: memref<2x64x128xf32, #tpu.memory_space<vmem>>, %arg6: memref<2x32x128xf32, #tpu.memory_space<vmem>>, %arg7: memref<2x1x128xf32, #tpu.memory_space<vmem>>, %arg8: memref<64x128xf32, #tpu.memory_space<vmem>>, %arg9: memref<1x128xf32, #tpu.memory_space<vmem>>, %arg10: memref<8x128xf32, #tpu.memory_space<vmem>>) attributes {dimension_semantics = [#tpu.dimension_semantics<arbitrary>], iteration_bounds = array<i64: 1>, scalar_prefetch = 0 : i64, scratch_operands = 0 : i64, tpu.core_type = #tpu.core_type<tc>, window_params = [{pipeline_mode = #tpu.pipeline_mode<synchronous>, transform_indices = @transform_0, window_bounds = array<i64: 64, 4>}, {pipeline_mode = #tpu.pipeline_mode<synchronous>, transform_indices = @transform_1, window_bounds = array<i64: 2, 4, 128>}, {pipeline_mode = #tpu.pipeline_mode<synchronous>, transform_indices = @transform_2, window_bounds = array<i64: 2, 32, 128>}, {pipeline_mode = #tpu.pipeline_mode<synchronous>, transform_indices = @transform_3, window_bounds = array<i64: 2, 1, 128>}, {pipeline_mode = #tpu.pipeline_mode<synchronous>, transform_indices = @transform_4, window_bounds = array<i64: 2, 64, 128>}, {pipeline_mode = #tpu.pipeline_mode<synchronous>, transform_indices = @transform_5, window_bounds = array<i64: 2, 32, 128>}, {pipeline_mode = #tpu.pipeline_mode<synchronous>, transform_indices = @transform_6, window_bounds = array<i64: 2, 1, 128>}, {pipeline_mode = #tpu.pipeline_mode<synchronous>, transform_indices = @transform_7, window_bounds = array<i64: 64, 128>}, {pipeline_mode = #tpu.pipeline_mode<synchronous>, transform_indices = @transform_8, window_bounds = array<i64: 1, 128>}, {pipeline_mode = #tpu.pipeline_mode<synchronous>, transform_indices = @transform_9, window_bounds = array<i64: 8, 128>}]} {
    %c0 = arith.constant 0 : index
    %c0_0 = arith.constant 0 : index
    %0 = vector.load %arg1[%c0, %c0_0] : memref<64x4xf32, #tpu.memory_space<vmem>>, vector<64x4xf32>
    %c0_1 = arith.constant 0 : index
    %c0_2 = arith.constant 0 : index
    %c0_3 = arith.constant 0 : index
    %1 = vector.load %arg2[%c0_1, %c0_2, %c0_3] : memref<2x4x128xf32, #tpu.memory_space<vmem>>, vector<1x4x128xf32>
    %2 = vector.shape_cast %1 : vector<1x4x128xf32> to vector<4x128xf32>
    %cst = arith.constant dense<0.000000e+00> : vector<64x128xf32>
    %3 = tpu.matmul %0, %2, %cst {dimension_numbers = #tpu.dot_dimension_numbers<[1], [0], [0], [1], [0, 0, 1, 1], [], []>} : vector<64x4xf32>, vector<4x128xf32>, vector<64x128xf32> -> vector<64x128xf32>
    %c0_4 = arith.constant 0 : index
    %c0_5 = arith.constant 0 : index
    %c0_6 = arith.constant 0 : index
    %4 = vector.load %arg4[%c0_4, %c0_5, %c0_6] : memref<2x1x128xf32, #tpu.memory_space<vmem>>, vector<1x1x128xf32>
    %5 = vector.shape_cast %4 : vector<1x1x128xf32> to vector<1x128xf32>
    %6 = vector.broadcast %5 : vector<1x128xf32> to vector<64x128xf32>
    %7 = arith.addf %3, %6 : vector<64x128xf32>
    %c0_7 = arith.constant 0 : index
    %c0_8 = arith.constant 0 : index
    %c0_9 = arith.constant 0 : index
    %8 = vector.load %arg3[%c0_7, %c0_8, %c0_9] : memref<2x32x128xf32, #tpu.memory_space<vmem>>, vector<1x32x128xf32>
    %9 = vector.shape_cast %8 : vector<1x32x128xf32> to vector<32x128xf32>
    %c1 = arith.constant 1 : index
    %c0_10 = arith.constant 0 : index
    %c0_11 = arith.constant 0 : index
    %10 = vector.load %arg2[%c1, %c0_10, %c0_11] : memref<2x4x128xf32, #tpu.memory_space<vmem>>, vector<1x4x128xf32>
    %11 = vector.shape_cast %10 : vector<1x4x128xf32> to vector<4x128xf32>
    %cst_12 = arith.constant dense<0.000000e+00> : vector<64x128xf32>
    %12 = tpu.matmul %0, %11, %cst_12 {dimension_numbers = #tpu.dot_dimension_numbers<[1], [0], [0], [1], [0, 0, 1, 1], [], []>} : vector<64x4xf32>, vector<4x128xf32>, vector<64x128xf32> -> vector<64x128xf32>
    %c1_13 = arith.constant 1 : index
    %c0_14 = arith.constant 0 : index
    %c0_15 = arith.constant 0 : index
    %13 = vector.load %arg4[%c1_13, %c0_14, %c0_15] : memref<2x1x128xf32, #tpu.memory_space<vmem>>, vector<1x1x128xf32>
    %14 = vector.shape_cast %13 : vector<1x1x128xf32> to vector<1x128xf32>
    %15 = vector.broadcast %14 : vector<1x128xf32> to vector<64x128xf32>
    %16 = arith.addf %12, %15 : vector<64x128xf32>
    %c1_16 = arith.constant 1 : index
    %c0_17 = arith.constant 0 : index
    %c0_18 = arith.constant 0 : index
    %17 = vector.load %arg3[%c1_16, %c0_17, %c0_18] : memref<2x32x128xf32, #tpu.memory_space<vmem>>, vector<1x32x128xf32>
    %18 = vector.shape_cast %17 : vector<1x32x128xf32> to vector<32x128xf32>
    %cst_19 = arith.constant 0.000000e+00 : f32
    %19 = vector.broadcast %cst_19 : f32 to vector<8x32xf32>
    %cst_20 = arith.constant 0.000000e+00 : f32
    %20 = vector.broadcast %cst_20 : f32 to vector<8x32xf32>
    %cst_21 = arith.constant 0.000000e+00 : f32
    %21 = vector.broadcast %cst_21 : f32 to vector<8x32xf32>
    %cst_22 = arith.constant 0.000000e+00 : f32
    %22 = vector.broadcast %cst_22 : f32 to vector<8x32xf32>
    %23 = vector.extract_strided_slice %7 {offsets = [0, 0], sizes = [8, 128], strides = [1, 1]} : vector<64x128xf32> to vector<8x128xf32>
    %cst_23 = arith.constant dense<0.000000e+00> : vector<8x128xf32>
    %24 = tpu.matmul %19, %9, %cst_23 {dimension_numbers = #tpu.dot_dimension_numbers<[1], [0], [0], [1], [0, 0, 1, 1], [], []>} : vector<8x32xf32>, vector<32x128xf32>, vector<8x128xf32> -> vector<8x128xf32>
    %25 = arith.addf %23, %24 : vector<8x128xf32>
    %26 = vector.extract_strided_slice %25 {offsets = [0, 0], sizes = [8, 96], strides = [1, 1]} : vector<8x128xf32> to vector<8x96xf32>
    %27 = arith.negf %26 : vector<8x96xf32>
    %28 = math.exp %27 : vector<8x96xf32>
    %cst_24 = arith.constant 1.000000e+00 : f32
    %29 = vector.broadcast %cst_24 : f32 to vector<8x96xf32>
    %30 = arith.addf %29, %28 : vector<8x96xf32>
    %31 = arith.divf %29, %30 : vector<8x96xf32>
    %32 = vector.extract_strided_slice %25 {offsets = [0, 96], sizes = [8, 32], strides = [1, 1]} : vector<8x128xf32> to vector<8x32xf32>
    %33 = math.tanh %32 : vector<8x32xf32>
    %34 = vector.extract_strided_slice %31 {offsets = [0, 32], sizes = [8, 32], strides = [1, 1]} : vector<8x96xf32> to vector<8x32xf32>
    %35 = arith.mulf %34, %21 : vector<8x32xf32>
    %36 = vector.extract_strided_slice %31 {offsets = [0, 0], sizes = [8, 32], strides = [1, 1]} : vector<8x96xf32> to vector<8x32xf32>
    %37 = arith.mulf %36, %33 : vector<8x32xf32>
    %38 = arith.addf %35, %37 : vector<8x32xf32>
    %39 = vector.extract_strided_slice %31 {offsets = [0, 64], sizes = [8, 32], strides = [1, 1]} : vector<8x96xf32> to vector<8x32xf32>
    %40 = math.tanh %38 : vector<8x32xf32>
    %41 = arith.mulf %39, %40 : vector<8x32xf32>
    %42 = vector.extract_strided_slice %16 {offsets = [56, 0], sizes = [8, 128], strides = [1, 1]} : vector<64x128xf32> to vector<8x128xf32>
    %cst_25 = arith.constant dense<0.000000e+00> : vector<8x128xf32>
    %43 = tpu.matmul %20, %18, %cst_25 {dimension_numbers = #tpu.dot_dimension_numbers<[1], [0], [0], [1], [0, 0, 1, 1], [], []>} : vector<8x32xf32>, vector<32x128xf32>, vector<8x128xf32> -> vector<8x128xf32>
    %44 = arith.addf %42, %43 : vector<8x128xf32>
    %45 = vector.extract_strided_slice %44 {offsets = [0, 0], sizes = [8, 96], strides = [1, 1]} : vector<8x128xf32> to vector<8x96xf32>
    %46 = arith.negf %45 : vector<8x96xf32>
    %47 = math.exp %46 : vector<8x96xf32>
    %cst_26 = arith.constant 1.000000e+00 : f32
    %48 = vector.broadcast %cst_26 : f32 to vector<8x96xf32>
    %49 = arith.addf %48, %47 : vector<8x96xf32>
    %50 = arith.divf %48, %49 : vector<8x96xf32>
    %51 = vector.extract_strided_slice %44 {offsets = [0, 96], sizes = [8, 32], strides = [1, 1]} : vector<8x128xf32> to vector<8x32xf32>
    %52 = math.tanh %51 : vector<8x32xf32>
    %53 = vector.extract_strided_slice %50 {offsets = [0, 32], sizes = [8, 32], strides = [1, 1]} : vector<8x96xf32> to vector<8x32xf32>
    %54 = arith.mulf %53, %22 : vector<8x32xf32>
    %55 = vector.extract_strided_slice %50 {offsets = [0, 0], sizes = [8, 32], strides = [1, 1]} : vector<8x96xf32> to vector<8x32xf32>
    %56 = arith.mulf %55, %52 : vector<8x32xf32>
    %57 = arith.addf %54, %56 : vector<8x32xf32>
    %58 = vector.extract_strided_slice %50 {offsets = [0, 64], sizes = [8, 32], strides = [1, 1]} : vector<8x96xf32> to vector<8x32xf32>
    %59 = math.tanh %57 : vector<8x32xf32>
    %60 = arith.mulf %58, %59 : vector<8x32xf32>
    %61 = vector.extract_strided_slice %7 {offsets = [8, 0], sizes = [8, 128], strides = [1, 1]} : vector<64x128xf32> to vector<8x128xf32>
    %cst_27 = arith.constant dense<0.000000e+00> : vector<8x128xf32>
    %62 = tpu.matmul %41, %9, %cst_27 {dimension_numbers = #tpu.dot_dimension_numbers<[1], [0], [0], [1], [0, 0, 1, 1], [], []>} : vector<8x32xf32>, vector<32x128xf32>, vector<8x128xf32> -> vector<8x128xf32>
    %63 = arith.addf %61, %62 : vector<8x128xf32>
    %64 = vector.extract_strided_slice %63 {offsets = [0, 0], sizes = [8, 96], strides = [1, 1]} : vector<8x128xf32> to vector<8x96xf32>
    %65 = arith.negf %64 : vector<8x96xf32>
    %66 = math.exp %65 : vector<8x96xf32>
    %cst_28 = arith.constant 1.000000e+00 : f32
    %67 = vector.broadcast %cst_28 : f32 to vector<8x96xf32>
    %68 = arith.addf %67, %66 : vector<8x96xf32>
    %69 = arith.divf %67, %68 : vector<8x96xf32>
    %70 = vector.extract_strided_slice %63 {offsets = [0, 96], sizes = [8, 32], strides = [1, 1]} : vector<8x128xf32> to vector<8x32xf32>
    %71 = math.tanh %70 : vector<8x32xf32>
    %72 = vector.extract_strided_slice %69 {offsets = [0, 32], sizes = [8, 32], strides = [1, 1]} : vector<8x96xf32> to vector<8x32xf32>
    %73 = arith.mulf %72, %38 : vector<8x32xf32>
    %74 = vector.extract_strided_slice %69 {offsets = [0, 0], sizes = [8, 32], strides = [1, 1]} : vector<8x96xf32> to vector<8x32xf32>
    %75 = arith.mulf %74, %71 : vector<8x32xf32>
    %76 = arith.addf %73, %75 : vector<8x32xf32>
    %77 = vector.extract_strided_slice %69 {offsets = [0, 64], sizes = [8, 32], strides = [1, 1]} : vector<8x96xf32> to vector<8x32xf32>
    %78 = math.tanh %76 : vector<8x32xf32>
    %79 = arith.mulf %77, %78 : vector<8x32xf32>
    %80 = vector.extract_strided_slice %16 {offsets = [48, 0], sizes = [8, 128], strides = [1, 1]} : vector<64x128xf32> to vector<8x128xf32>
    %cst_29 = arith.constant dense<0.000000e+00> : vector<8x128xf32>
    %81 = tpu.matmul %60, %18, %cst_29 {dimension_numbers = #tpu.dot_dimension_numbers<[1], [0], [0], [1], [0, 0, 1, 1], [], []>} : vector<8x32xf32>, vector<32x128xf32>, vector<8x128xf32> -> vector<8x128xf32>
    %82 = arith.addf %80, %81 : vector<8x128xf32>
    %83 = vector.extract_strided_slice %82 {offsets = [0, 0], sizes = [8, 96], strides = [1, 1]} : vector<8x128xf32> to vector<8x96xf32>
    %84 = arith.negf %83 : vector<8x96xf32>
    %85 = math.exp %84 : vector<8x96xf32>
    %cst_30 = arith.constant 1.000000e+00 : f32
    %86 = vector.broadcast %cst_30 : f32 to vector<8x96xf32>
    %87 = arith.addf %86, %85 : vector<8x96xf32>
    %88 = arith.divf %86, %87 : vector<8x96xf32>
    %89 = vector.extract_strided_slice %82 {offsets = [0, 96], sizes = [8, 32], strides = [1, 1]} : vector<8x128xf32> to vector<8x32xf32>
    %90 = math.tanh %89 : vector<8x32xf32>
    %91 = vector.extract_strided_slice %88 {offsets = [0, 32], sizes = [8, 32], strides = [1, 1]} : vector<8x96xf32> to vector<8x32xf32>
    %92 = arith.mulf %91, %57 : vector<8x32xf32>
    %93 = vector.extract_strided_slice %88 {offsets = [0, 0], sizes = [8, 32], strides = [1, 1]} : vector<8x96xf32> to vector<8x32xf32>
    %94 = arith.mulf %93, %90 : vector<8x32xf32>
    %95 = arith.addf %92, %94 : vector<8x32xf32>
    %96 = vector.extract_strided_slice %88 {offsets = [0, 64], sizes = [8, 32], strides = [1, 1]} : vector<8x96xf32> to vector<8x32xf32>
    %97 = math.tanh %95 : vector<8x32xf32>
    %98 = arith.mulf %96, %97 : vector<8x32xf32>
    %99 = vector.extract_strided_slice %7 {offsets = [16, 0], sizes = [8, 128], strides = [1, 1]} : vector<64x128xf32> to vector<8x128xf32>
    %cst_31 = arith.constant dense<0.000000e+00> : vector<8x128xf32>
    %100 = tpu.matmul %79, %9, %cst_31 {dimension_numbers = #tpu.dot_dimension_numbers<[1], [0], [0], [1], [0, 0, 1, 1], [], []>} : vector<8x32xf32>, vector<32x128xf32>, vector<8x128xf32> -> vector<8x128xf32>
    %101 = arith.addf %99, %100 : vector<8x128xf32>
    %102 = vector.extract_strided_slice %101 {offsets = [0, 0], sizes = [8, 96], strides = [1, 1]} : vector<8x128xf32> to vector<8x96xf32>
    %103 = arith.negf %102 : vector<8x96xf32>
    %104 = math.exp %103 : vector<8x96xf32>
    %cst_32 = arith.constant 1.000000e+00 : f32
    %105 = vector.broadcast %cst_32 : f32 to vector<8x96xf32>
    %106 = arith.addf %105, %104 : vector<8x96xf32>
    %107 = arith.divf %105, %106 : vector<8x96xf32>
    %108 = vector.extract_strided_slice %101 {offsets = [0, 96], sizes = [8, 32], strides = [1, 1]} : vector<8x128xf32> to vector<8x32xf32>
    %109 = math.tanh %108 : vector<8x32xf32>
    %110 = vector.extract_strided_slice %107 {offsets = [0, 32], sizes = [8, 32], strides = [1, 1]} : vector<8x96xf32> to vector<8x32xf32>
    %111 = arith.mulf %110, %76 : vector<8x32xf32>
    %112 = vector.extract_strided_slice %107 {offsets = [0, 0], sizes = [8, 32], strides = [1, 1]} : vector<8x96xf32> to vector<8x32xf32>
    %113 = arith.mulf %112, %109 : vector<8x32xf32>
    %114 = arith.addf %111, %113 : vector<8x32xf32>
    %115 = vector.extract_strided_slice %107 {offsets = [0, 64], sizes = [8, 32], strides = [1, 1]} : vector<8x96xf32> to vector<8x32xf32>
    %116 = math.tanh %114 : vector<8x32xf32>
    %117 = arith.mulf %115, %116 : vector<8x32xf32>
    %118 = vector.extract_strided_slice %16 {offsets = [40, 0], sizes = [8, 128], strides = [1, 1]} : vector<64x128xf32> to vector<8x128xf32>
    %cst_33 = arith.constant dense<0.000000e+00> : vector<8x128xf32>
    %119 = tpu.matmul %98, %18, %cst_33 {dimension_numbers = #tpu.dot_dimension_numbers<[1], [0], [0], [1], [0, 0, 1, 1], [], []>} : vector<8x32xf32>, vector<32x128xf32>, vector<8x128xf32> -> vector<8x128xf32>
    %120 = arith.addf %118, %119 : vector<8x128xf32>
    %121 = vector.extract_strided_slice %120 {offsets = [0, 0], sizes = [8, 96], strides = [1, 1]} : vector<8x128xf32> to vector<8x96xf32>
    %122 = arith.negf %121 : vector<8x96xf32>
    %123 = math.exp %122 : vector<8x96xf32>
    %cst_34 = arith.constant 1.000000e+00 : f32
    %124 = vector.broadcast %cst_34 : f32 to vector<8x96xf32>
    %125 = arith.addf %124, %123 : vector<8x96xf32>
    %126 = arith.divf %124, %125 : vector<8x96xf32>
    %127 = vector.extract_strided_slice %120 {offsets = [0, 96], sizes = [8, 32], strides = [1, 1]} : vector<8x128xf32> to vector<8x32xf32>
    %128 = math.tanh %127 : vector<8x32xf32>
    %129 = vector.extract_strided_slice %126 {offsets = [0, 32], sizes = [8, 32], strides = [1, 1]} : vector<8x96xf32> to vector<8x32xf32>
    %130 = arith.mulf %129, %95 : vector<8x32xf32>
    %131 = vector.extract_strided_slice %126 {offsets = [0, 0], sizes = [8, 32], strides = [1, 1]} : vector<8x96xf32> to vector<8x32xf32>
    %132 = arith.mulf %131, %128 : vector<8x32xf32>
    %133 = arith.addf %130, %132 : vector<8x32xf32>
    %134 = vector.extract_strided_slice %126 {offsets = [0, 64], sizes = [8, 32], strides = [1, 1]} : vector<8x96xf32> to vector<8x32xf32>
    %135 = math.tanh %133 : vector<8x32xf32>
    %136 = arith.mulf %134, %135 : vector<8x32xf32>
    %137 = vector.extract_strided_slice %7 {offsets = [24, 0], sizes = [8, 128], strides = [1, 1]} : vector<64x128xf32> to vector<8x128xf32>
    %cst_35 = arith.constant dense<0.000000e+00> : vector<8x128xf32>
    %138 = tpu.matmul %117, %9, %cst_35 {dimension_numbers = #tpu.dot_dimension_numbers<[1], [0], [0], [1], [0, 0, 1, 1], [], []>} : vector<8x32xf32>, vector<32x128xf32>, vector<8x128xf32> -> vector<8x128xf32>
    %139 = arith.addf %137, %138 : vector<8x128xf32>
    %140 = vector.extract_strided_slice %139 {offsets = [0, 0], sizes = [8, 96], strides = [1, 1]} : vector<8x128xf32> to vector<8x96xf32>
    %141 = arith.negf %140 : vector<8x96xf32>
    %142 = math.exp %141 : vector<8x96xf32>
    %cst_36 = arith.constant 1.000000e+00 : f32
    %143 = vector.broadcast %cst_36 : f32 to vector<8x96xf32>
    %144 = arith.addf %143, %142 : vector<8x96xf32>
    %145 = arith.divf %143, %144 : vector<8x96xf32>
    %146 = vector.extract_strided_slice %139 {offsets = [0, 96], sizes = [8, 32], strides = [1, 1]} : vector<8x128xf32> to vector<8x32xf32>
    %147 = math.tanh %146 : vector<8x32xf32>
    %148 = vector.extract_strided_slice %145 {offsets = [0, 32], sizes = [8, 32], strides = [1, 1]} : vector<8x96xf32> to vector<8x32xf32>
    %149 = arith.mulf %148, %114 : vector<8x32xf32>
    %150 = vector.extract_strided_slice %145 {offsets = [0, 0], sizes = [8, 32], strides = [1, 1]} : vector<8x96xf32> to vector<8x32xf32>
    %151 = arith.mulf %150, %147 : vector<8x32xf32>
    %152 = arith.addf %149, %151 : vector<8x32xf32>
    %153 = vector.extract_strided_slice %145 {offsets = [0, 64], sizes = [8, 32], strides = [1, 1]} : vector<8x96xf32> to vector<8x32xf32>
    %154 = math.tanh %152 : vector<8x32xf32>
    %155 = arith.mulf %153, %154 : vector<8x32xf32>
    %156 = vector.extract_strided_slice %16 {offsets = [32, 0], sizes = [8, 128], strides = [1, 1]} : vector<64x128xf32> to vector<8x128xf32>
    %cst_37 = arith.constant dense<0.000000e+00> : vector<8x128xf32>
    %157 = tpu.matmul %136, %18, %cst_37 {dimension_numbers = #tpu.dot_dimension_numbers<[1], [0], [0], [1], [0, 0, 1, 1], [], []>} : vector<8x32xf32>, vector<32x128xf32>, vector<8x128xf32> -> vector<8x128xf32>
    %158 = arith.addf %156, %157 : vector<8x128xf32>
    %159 = vector.extract_strided_slice %158 {offsets = [0, 0], sizes = [8, 96], strides = [1, 1]} : vector<8x128xf32> to vector<8x96xf32>
    %160 = arith.negf %159 : vector<8x96xf32>
    %161 = math.exp %160 : vector<8x96xf32>
    %cst_38 = arith.constant 1.000000e+00 : f32
    %162 = vector.broadcast %cst_38 : f32 to vector<8x96xf32>
    %163 = arith.addf %162, %161 : vector<8x96xf32>
    %164 = arith.divf %162, %163 : vector<8x96xf32>
    %165 = vector.extract_strided_slice %158 {offsets = [0, 96], sizes = [8, 32], strides = [1, 1]} : vector<8x128xf32> to vector<8x32xf32>
    %166 = math.tanh %165 : vector<8x32xf32>
    %167 = vector.extract_strided_slice %164 {offsets = [0, 32], sizes = [8, 32], strides = [1, 1]} : vector<8x96xf32> to vector<8x32xf32>
    %168 = arith.mulf %167, %133 : vector<8x32xf32>
    %169 = vector.extract_strided_slice %164 {offsets = [0, 0], sizes = [8, 32], strides = [1, 1]} : vector<8x96xf32> to vector<8x32xf32>
    %170 = arith.mulf %169, %166 : vector<8x32xf32>
    %171 = arith.addf %168, %170 : vector<8x32xf32>
    %172 = vector.extract_strided_slice %164 {offsets = [0, 64], sizes = [8, 32], strides = [1, 1]} : vector<8x96xf32> to vector<8x32xf32>
    %173 = math.tanh %171 : vector<8x32xf32>
    %174 = arith.mulf %172, %173 : vector<8x32xf32>
    %175 = vector.extract_strided_slice %7 {offsets = [32, 0], sizes = [8, 128], strides = [1, 1]} : vector<64x128xf32> to vector<8x128xf32>
    %cst_39 = arith.constant dense<0.000000e+00> : vector<8x128xf32>
    %176 = tpu.matmul %155, %9, %cst_39 {dimension_numbers = #tpu.dot_dimension_numbers<[1], [0], [0], [1], [0, 0, 1, 1], [], []>} : vector<8x32xf32>, vector<32x128xf32>, vector<8x128xf32> -> vector<8x128xf32>
    %177 = arith.addf %175, %176 : vector<8x128xf32>
    %178 = vector.extract_strided_slice %177 {offsets = [0, 0], sizes = [8, 96], strides = [1, 1]} : vector<8x128xf32> to vector<8x96xf32>
    %179 = arith.negf %178 : vector<8x96xf32>
    %180 = math.exp %179 : vector<8x96xf32>
    %cst_40 = arith.constant 1.000000e+00 : f32
    %181 = vector.broadcast %cst_40 : f32 to vector<8x96xf32>
    %182 = arith.addf %181, %180 : vector<8x96xf32>
    %183 = arith.divf %181, %182 : vector<8x96xf32>
    %184 = vector.extract_strided_slice %177 {offsets = [0, 96], sizes = [8, 32], strides = [1, 1]} : vector<8x128xf32> to vector<8x32xf32>
    %185 = math.tanh %184 : vector<8x32xf32>
    %186 = vector.extract_strided_slice %183 {offsets = [0, 32], sizes = [8, 32], strides = [1, 1]} : vector<8x96xf32> to vector<8x32xf32>
    %187 = arith.mulf %186, %152 : vector<8x32xf32>
    %188 = vector.extract_strided_slice %183 {offsets = [0, 0], sizes = [8, 32], strides = [1, 1]} : vector<8x96xf32> to vector<8x32xf32>
    %189 = arith.mulf %188, %185 : vector<8x32xf32>
    %190 = arith.addf %187, %189 : vector<8x32xf32>
    %191 = vector.extract_strided_slice %183 {offsets = [0, 64], sizes = [8, 32], strides = [1, 1]} : vector<8x96xf32> to vector<8x32xf32>
    %192 = math.tanh %190 : vector<8x32xf32>
    %193 = arith.mulf %191, %192 : vector<8x32xf32>
    %194 = vector.extract_strided_slice %16 {offsets = [24, 0], sizes = [8, 128], strides = [1, 1]} : vector<64x128xf32> to vector<8x128xf32>
    %cst_41 = arith.constant dense<0.000000e+00> : vector<8x128xf32>
    %195 = tpu.matmul %174, %18, %cst_41 {dimension_numbers = #tpu.dot_dimension_numbers<[1], [0], [0], [1], [0, 0, 1, 1], [], []>} : vector<8x32xf32>, vector<32x128xf32>, vector<8x128xf32> -> vector<8x128xf32>
    %196 = arith.addf %194, %195 : vector<8x128xf32>
    %197 = vector.extract_strided_slice %196 {offsets = [0, 0], sizes = [8, 96], strides = [1, 1]} : vector<8x128xf32> to vector<8x96xf32>
    %198 = arith.negf %197 : vector<8x96xf32>
    %199 = math.exp %198 : vector<8x96xf32>
    %cst_42 = arith.constant 1.000000e+00 : f32
    %200 = vector.broadcast %cst_42 : f32 to vector<8x96xf32>
    %201 = arith.addf %200, %199 : vector<8x96xf32>
    %202 = arith.divf %200, %201 : vector<8x96xf32>
    %203 = vector.extract_strided_slice %196 {offsets = [0, 96], sizes = [8, 32], strides = [1, 1]} : vector<8x128xf32> to vector<8x32xf32>
    %204 = math.tanh %203 : vector<8x32xf32>
    %205 = vector.extract_strided_slice %202 {offsets = [0, 32], sizes = [8, 32], strides = [1, 1]} : vector<8x96xf32> to vector<8x32xf32>
    %206 = arith.mulf %205, %171 : vector<8x32xf32>
    %207 = vector.extract_strided_slice %202 {offsets = [0, 0], sizes = [8, 32], strides = [1, 1]} : vector<8x96xf32> to vector<8x32xf32>
    %208 = arith.mulf %207, %204 : vector<8x32xf32>
    %209 = arith.addf %206, %208 : vector<8x32xf32>
    %210 = vector.extract_strided_slice %202 {offsets = [0, 64], sizes = [8, 32], strides = [1, 1]} : vector<8x96xf32> to vector<8x32xf32>
    %211 = math.tanh %209 : vector<8x32xf32>
    %212 = arith.mulf %210, %211 : vector<8x32xf32>
    %213 = vector.extract_strided_slice %7 {offsets = [40, 0], sizes = [8, 128], strides = [1, 1]} : vector<64x128xf32> to vector<8x128xf32>
    %cst_43 = arith.constant dense<0.000000e+00> : vector<8x128xf32>
    %214 = tpu.matmul %193, %9, %cst_43 {dimension_numbers = #tpu.dot_dimension_numbers<[1], [0], [0], [1], [0, 0, 1, 1], [], []>} : vector<8x32xf32>, vector<32x128xf32>, vector<8x128xf32> -> vector<8x128xf32>
    %215 = arith.addf %213, %214 : vector<8x128xf32>
    %216 = vector.extract_strided_slice %215 {offsets = [0, 0], sizes = [8, 96], strides = [1, 1]} : vector<8x128xf32> to vector<8x96xf32>
    %217 = arith.negf %216 : vector<8x96xf32>
    %218 = math.exp %217 : vector<8x96xf32>
    %cst_44 = arith.constant 1.000000e+00 : f32
    %219 = vector.broadcast %cst_44 : f32 to vector<8x96xf32>
    %220 = arith.addf %219, %218 : vector<8x96xf32>
    %221 = arith.divf %219, %220 : vector<8x96xf32>
    %222 = vector.extract_strided_slice %215 {offsets = [0, 96], sizes = [8, 32], strides = [1, 1]} : vector<8x128xf32> to vector<8x32xf32>
    %223 = math.tanh %222 : vector<8x32xf32>
    %224 = vector.extract_strided_slice %221 {offsets = [0, 32], sizes = [8, 32], strides = [1, 1]} : vector<8x96xf32> to vector<8x32xf32>
    %225 = arith.mulf %224, %190 : vector<8x32xf32>
    %226 = vector.extract_strided_slice %221 {offsets = [0, 0], sizes = [8, 32], strides = [1, 1]} : vector<8x96xf32> to vector<8x32xf32>
    %227 = arith.mulf %226, %223 : vector<8x32xf32>
    %228 = arith.addf %225, %227 : vector<8x32xf32>
    %229 = vector.extract_strided_slice %221 {offsets = [0, 64], sizes = [8, 32], strides = [1, 1]} : vector<8x96xf32> to vector<8x32xf32>
    %230 = math.tanh %228 : vector<8x32xf32>
    %231 = arith.mulf %229, %230 : vector<8x32xf32>
    %232 = vector.extract_strided_slice %16 {offsets = [16, 0], sizes = [8, 128], strides = [1, 1]} : vector<64x128xf32> to vector<8x128xf32>
    %cst_45 = arith.constant dense<0.000000e+00> : vector<8x128xf32>
    %233 = tpu.matmul %212, %18, %cst_45 {dimension_numbers = #tpu.dot_dimension_numbers<[1], [0], [0], [1], [0, 0, 1, 1], [], []>} : vector<8x32xf32>, vector<32x128xf32>, vector<8x128xf32> -> vector<8x128xf32>
    %234 = arith.addf %232, %233 : vector<8x128xf32>
    %235 = vector.extract_strided_slice %234 {offsets = [0, 0], sizes = [8, 96], strides = [1, 1]} : vector<8x128xf32> to vector<8x96xf32>
    %236 = arith.negf %235 : vector<8x96xf32>
    %237 = math.exp %236 : vector<8x96xf32>
    %cst_46 = arith.constant 1.000000e+00 : f32
    %238 = vector.broadcast %cst_46 : f32 to vector<8x96xf32>
    %239 = arith.addf %238, %237 : vector<8x96xf32>
    %240 = arith.divf %238, %239 : vector<8x96xf32>
    %241 = vector.extract_strided_slice %234 {offsets = [0, 96], sizes = [8, 32], strides = [1, 1]} : vector<8x128xf32> to vector<8x32xf32>
    %242 = math.tanh %241 : vector<8x32xf32>
    %243 = vector.extract_strided_slice %240 {offsets = [0, 32], sizes = [8, 32], strides = [1, 1]} : vector<8x96xf32> to vector<8x32xf32>
    %244 = arith.mulf %243, %209 : vector<8x32xf32>
    %245 = vector.extract_strided_slice %240 {offsets = [0, 0], sizes = [8, 32], strides = [1, 1]} : vector<8x96xf32> to vector<8x32xf32>
    %246 = arith.mulf %245, %242 : vector<8x32xf32>
    %247 = arith.addf %244, %246 : vector<8x32xf32>
    %248 = vector.extract_strided_slice %240 {offsets = [0, 64], sizes = [8, 32], strides = [1, 1]} : vector<8x96xf32> to vector<8x32xf32>
    %249 = math.tanh %247 : vector<8x32xf32>
    %250 = arith.mulf %248, %249 : vector<8x32xf32>
    %251 = vector.extract_strided_slice %7 {offsets = [48, 0], sizes = [8, 128], strides = [1, 1]} : vector<64x128xf32> to vector<8x128xf32>
    %cst_47 = arith.constant dense<0.000000e+00> : vector<8x128xf32>
    %252 = tpu.matmul %231, %9, %cst_47 {dimension_numbers = #tpu.dot_dimension_numbers<[1], [0], [0], [1], [0, 0, 1, 1], [], []>} : vector<8x32xf32>, vector<32x128xf32>, vector<8x128xf32> -> vector<8x128xf32>
    %253 = arith.addf %251, %252 : vector<8x128xf32>
    %254 = vector.extract_strided_slice %253 {offsets = [0, 0], sizes = [8, 96], strides = [1, 1]} : vector<8x128xf32> to vector<8x96xf32>
    %255 = arith.negf %254 : vector<8x96xf32>
    %256 = math.exp %255 : vector<8x96xf32>
    %cst_48 = arith.constant 1.000000e+00 : f32
    %257 = vector.broadcast %cst_48 : f32 to vector<8x96xf32>
    %258 = arith.addf %257, %256 : vector<8x96xf32>
    %259 = arith.divf %257, %258 : vector<8x96xf32>
    %260 = vector.extract_strided_slice %253 {offsets = [0, 96], sizes = [8, 32], strides = [1, 1]} : vector<8x128xf32> to vector<8x32xf32>
    %261 = math.tanh %260 : vector<8x32xf32>
    %262 = vector.extract_strided_slice %259 {offsets = [0, 32], sizes = [8, 32], strides = [1, 1]} : vector<8x96xf32> to vector<8x32xf32>
    %263 = arith.mulf %262, %228 : vector<8x32xf32>
    %264 = vector.extract_strided_slice %259 {offsets = [0, 0], sizes = [8, 32], strides = [1, 1]} : vector<8x96xf32> to vector<8x32xf32>
    %265 = arith.mulf %264, %261 : vector<8x32xf32>
    %266 = arith.addf %263, %265 : vector<8x32xf32>
    %267 = vector.extract_strided_slice %259 {offsets = [0, 64], sizes = [8, 32], strides = [1, 1]} : vector<8x96xf32> to vector<8x32xf32>
    %268 = math.tanh %266 : vector<8x32xf32>
    %269 = arith.mulf %267, %268 : vector<8x32xf32>
    %270 = vector.extract_strided_slice %16 {offsets = [8, 0], sizes = [8, 128], strides = [1, 1]} : vector<64x128xf32> to vector<8x128xf32>
    %cst_49 = arith.constant dense<0.000000e+00> : vector<8x128xf32>
    %271 = tpu.matmul %250, %18, %cst_49 {dimension_numbers = #tpu.dot_dimension_numbers<[1], [0], [0], [1], [0, 0, 1, 1], [], []>} : vector<8x32xf32>, vector<32x128xf32>, vector<8x128xf32> -> vector<8x128xf32>
    %272 = arith.addf %270, %271 : vector<8x128xf32>
    %273 = vector.extract_strided_slice %272 {offsets = [0, 0], sizes = [8, 96], strides = [1, 1]} : vector<8x128xf32> to vector<8x96xf32>
    %274 = arith.negf %273 : vector<8x96xf32>
    %275 = math.exp %274 : vector<8x96xf32>
    %cst_50 = arith.constant 1.000000e+00 : f32
    %276 = vector.broadcast %cst_50 : f32 to vector<8x96xf32>
    %277 = arith.addf %276, %275 : vector<8x96xf32>
    %278 = arith.divf %276, %277 : vector<8x96xf32>
    %279 = vector.extract_strided_slice %272 {offsets = [0, 96], sizes = [8, 32], strides = [1, 1]} : vector<8x128xf32> to vector<8x32xf32>
    %280 = math.tanh %279 : vector<8x32xf32>
    %281 = vector.extract_strided_slice %278 {offsets = [0, 32], sizes = [8, 32], strides = [1, 1]} : vector<8x96xf32> to vector<8x32xf32>
    %282 = arith.mulf %281, %247 : vector<8x32xf32>
    %283 = vector.extract_strided_slice %278 {offsets = [0, 0], sizes = [8, 32], strides = [1, 1]} : vector<8x96xf32> to vector<8x32xf32>
    %284 = arith.mulf %283, %280 : vector<8x32xf32>
    %285 = arith.addf %282, %284 : vector<8x32xf32>
    %286 = vector.extract_strided_slice %278 {offsets = [0, 64], sizes = [8, 32], strides = [1, 1]} : vector<8x96xf32> to vector<8x32xf32>
    %287 = math.tanh %285 : vector<8x32xf32>
    %288 = arith.mulf %286, %287 : vector<8x32xf32>
    %289 = vector.extract_strided_slice %7 {offsets = [56, 0], sizes = [8, 128], strides = [1, 1]} : vector<64x128xf32> to vector<8x128xf32>
    %cst_51 = arith.constant dense<0.000000e+00> : vector<8x128xf32>
    %290 = tpu.matmul %269, %9, %cst_51 {dimension_numbers = #tpu.dot_dimension_numbers<[1], [0], [0], [1], [0, 0, 1, 1], [], []>} : vector<8x32xf32>, vector<32x128xf32>, vector<8x128xf32> -> vector<8x128xf32>
    %291 = arith.addf %289, %290 : vector<8x128xf32>
    %292 = vector.extract_strided_slice %291 {offsets = [0, 0], sizes = [8, 96], strides = [1, 1]} : vector<8x128xf32> to vector<8x96xf32>
    %293 = arith.negf %292 : vector<8x96xf32>
    %294 = math.exp %293 : vector<8x96xf32>
    %cst_52 = arith.constant 1.000000e+00 : f32
    %295 = vector.broadcast %cst_52 : f32 to vector<8x96xf32>
    %296 = arith.addf %295, %294 : vector<8x96xf32>
    %297 = arith.divf %295, %296 : vector<8x96xf32>
    %298 = vector.extract_strided_slice %291 {offsets = [0, 96], sizes = [8, 32], strides = [1, 1]} : vector<8x128xf32> to vector<8x32xf32>
    %299 = math.tanh %298 : vector<8x32xf32>
    %300 = vector.extract_strided_slice %297 {offsets = [0, 32], sizes = [8, 32], strides = [1, 1]} : vector<8x96xf32> to vector<8x32xf32>
    %301 = arith.mulf %300, %266 : vector<8x32xf32>
    %302 = vector.extract_strided_slice %297 {offsets = [0, 0], sizes = [8, 32], strides = [1, 1]} : vector<8x96xf32> to vector<8x32xf32>
    %303 = arith.mulf %302, %299 : vector<8x32xf32>
    %304 = arith.addf %301, %303 : vector<8x32xf32>
    %305 = vector.extract_strided_slice %297 {offsets = [0, 64], sizes = [8, 32], strides = [1, 1]} : vector<8x96xf32> to vector<8x32xf32>
    %306 = math.tanh %304 : vector<8x32xf32>
    %307 = arith.mulf %305, %306 : vector<8x32xf32>
    %308 = vector.extract_strided_slice %16 {offsets = [0, 0], sizes = [8, 128], strides = [1, 1]} : vector<64x128xf32> to vector<8x128xf32>
    %cst_53 = arith.constant dense<0.000000e+00> : vector<8x128xf32>
    %309 = tpu.matmul %288, %18, %cst_53 {dimension_numbers = #tpu.dot_dimension_numbers<[1], [0], [0], [1], [0, 0, 1, 1], [], []>} : vector<8x32xf32>, vector<32x128xf32>, vector<8x128xf32> -> vector<8x128xf32>
    %310 = arith.addf %308, %309 : vector<8x128xf32>
    %311 = vector.extract_strided_slice %310 {offsets = [0, 0], sizes = [8, 96], strides = [1, 1]} : vector<8x128xf32> to vector<8x96xf32>
    %312 = arith.negf %311 : vector<8x96xf32>
    %313 = math.exp %312 : vector<8x96xf32>
    %cst_54 = arith.constant 1.000000e+00 : f32
    %314 = vector.broadcast %cst_54 : f32 to vector<8x96xf32>
    %315 = arith.addf %314, %313 : vector<8x96xf32>
    %316 = arith.divf %314, %315 : vector<8x96xf32>
    %317 = vector.extract_strided_slice %310 {offsets = [0, 96], sizes = [8, 32], strides = [1, 1]} : vector<8x128xf32> to vector<8x32xf32>
    %318 = math.tanh %317 : vector<8x32xf32>
    %319 = vector.extract_strided_slice %316 {offsets = [0, 32], sizes = [8, 32], strides = [1, 1]} : vector<8x96xf32> to vector<8x32xf32>
    %320 = arith.mulf %319, %285 : vector<8x32xf32>
    %321 = vector.extract_strided_slice %316 {offsets = [0, 0], sizes = [8, 32], strides = [1, 1]} : vector<8x96xf32> to vector<8x32xf32>
    %322 = arith.mulf %321, %318 : vector<8x32xf32>
    %323 = arith.addf %320, %322 : vector<8x32xf32>
    %324 = vector.extract_strided_slice %316 {offsets = [0, 64], sizes = [8, 32], strides = [1, 1]} : vector<8x96xf32> to vector<8x32xf32>
    %325 = math.tanh %323 : vector<8x32xf32>
    %326 = arith.mulf %324, %325 : vector<8x32xf32>
    %327 = tpu.concatenate %41, %326 in 1 : vector<8x32xf32>, vector<8x32xf32> -> vector<8x64xf32>
    %328 = tpu.concatenate %79, %288 in 1 : vector<8x32xf32>, vector<8x32xf32> -> vector<8x64xf32>
    %329 = tpu.concatenate %117, %250 in 1 : vector<8x32xf32>, vector<8x32xf32> -> vector<8x64xf32>
    %330 = tpu.concatenate %155, %212 in 1 : vector<8x32xf32>, vector<8x32xf32> -> vector<8x64xf32>
    %331 = tpu.concatenate %193, %174 in 1 : vector<8x32xf32>, vector<8x32xf32> -> vector<8x64xf32>
    %332 = tpu.concatenate %231, %136 in 1 : vector<8x32xf32>, vector<8x32xf32> -> vector<8x64xf32>
    %333 = tpu.concatenate %269, %98 in 1 : vector<8x32xf32>, vector<8x32xf32> -> vector<8x64xf32>
    %334 = tpu.concatenate %307, %60 in 1 : vector<8x32xf32>, vector<8x32xf32> -> vector<8x64xf32>
    %335 = tpu.concatenate %327, %328, %329, %330, %331, %332, %333, %334 in 0 : vector<8x64xf32>, vector<8x64xf32>, vector<8x64xf32>, vector<8x64xf32>, vector<8x64xf32>, vector<8x64xf32>, vector<8x64xf32>, vector<8x64xf32> -> vector<64x64xf32>
    %c0_55 = arith.constant 0 : index
    %c0_56 = arith.constant 0 : index
    %c0_57 = arith.constant 0 : index
    %336 = vector.load %arg5[%c0_55, %c0_56, %c0_57] : memref<2x64x128xf32, #tpu.memory_space<vmem>>, vector<1x64x128xf32>
    %337 = vector.shape_cast %336 : vector<1x64x128xf32> to vector<64x128xf32>
    %cst_58 = arith.constant dense<0.000000e+00> : vector<64x128xf32>
    %338 = tpu.matmul %335, %337, %cst_58 {dimension_numbers = #tpu.dot_dimension_numbers<[1], [0], [0], [1], [0, 0, 1, 1], [], []>} : vector<64x64xf32>, vector<64x128xf32>, vector<64x128xf32> -> vector<64x128xf32>
    %c0_59 = arith.constant 0 : index
    %c0_60 = arith.constant 0 : index
    %c0_61 = arith.constant 0 : index
    %339 = vector.load %arg7[%c0_59, %c0_60, %c0_61] : memref<2x1x128xf32, #tpu.memory_space<vmem>>, vector<1x1x128xf32>
    %340 = vector.shape_cast %339 : vector<1x1x128xf32> to vector<1x128xf32>
    %341 = vector.broadcast %340 : vector<1x128xf32> to vector<64x128xf32>
    %342 = arith.addf %338, %341 : vector<64x128xf32>
    %c0_62 = arith.constant 0 : index
    %c0_63 = arith.constant 0 : index
    %c0_64 = arith.constant 0 : index
    %343 = vector.load %arg6[%c0_62, %c0_63, %c0_64] : memref<2x32x128xf32, #tpu.memory_space<vmem>>, vector<1x32x128xf32>
    %344 = vector.shape_cast %343 : vector<1x32x128xf32> to vector<32x128xf32>
    %c1_65 = arith.constant 1 : index
    %c0_66 = arith.constant 0 : index
    %c0_67 = arith.constant 0 : index
    %345 = vector.load %arg5[%c1_65, %c0_66, %c0_67] : memref<2x64x128xf32, #tpu.memory_space<vmem>>, vector<1x64x128xf32>
    %346 = vector.shape_cast %345 : vector<1x64x128xf32> to vector<64x128xf32>
    %cst_68 = arith.constant dense<0.000000e+00> : vector<64x128xf32>
    %347 = tpu.matmul %335, %346, %cst_68 {dimension_numbers = #tpu.dot_dimension_numbers<[1], [0], [0], [1], [0, 0, 1, 1], [], []>} : vector<64x64xf32>, vector<64x128xf32>, vector<64x128xf32> -> vector<64x128xf32>
    %c1_69 = arith.constant 1 : index
    %c0_70 = arith.constant 0 : index
    %c0_71 = arith.constant 0 : index
    %348 = vector.load %arg7[%c1_69, %c0_70, %c0_71] : memref<2x1x128xf32, #tpu.memory_space<vmem>>, vector<1x1x128xf32>
    %349 = vector.shape_cast %348 : vector<1x1x128xf32> to vector<1x128xf32>
    %350 = vector.broadcast %349 : vector<1x128xf32> to vector<64x128xf32>
    %351 = arith.addf %347, %350 : vector<64x128xf32>
    %c1_72 = arith.constant 1 : index
    %c0_73 = arith.constant 0 : index
    %c0_74 = arith.constant 0 : index
    %352 = vector.load %arg6[%c1_72, %c0_73, %c0_74] : memref<2x32x128xf32, #tpu.memory_space<vmem>>, vector<1x32x128xf32>
    %353 = vector.shape_cast %352 : vector<1x32x128xf32> to vector<32x128xf32>
    %cst_75 = arith.constant 0.000000e+00 : f32
    %354 = vector.broadcast %cst_75 : f32 to vector<8x32xf32>
    %cst_76 = arith.constant 0.000000e+00 : f32
    %355 = vector.broadcast %cst_76 : f32 to vector<8x32xf32>
    %cst_77 = arith.constant 0.000000e+00 : f32
    %356 = vector.broadcast %cst_77 : f32 to vector<8x32xf32>
    %cst_78 = arith.constant 0.000000e+00 : f32
    %357 = vector.broadcast %cst_78 : f32 to vector<8x32xf32>
    %358 = vector.extract_strided_slice %342 {offsets = [0, 0], sizes = [8, 128], strides = [1, 1]} : vector<64x128xf32> to vector<8x128xf32>
    %cst_79 = arith.constant dense<0.000000e+00> : vector<8x128xf32>
    %359 = tpu.matmul %354, %344, %cst_79 {dimension_numbers = #tpu.dot_dimension_numbers<[1], [0], [0], [1], [0, 0, 1, 1], [], []>} : vector<8x32xf32>, vector<32x128xf32>, vector<8x128xf32> -> vector<8x128xf32>
    %360 = arith.addf %358, %359 : vector<8x128xf32>
    %361 = vector.extract_strided_slice %360 {offsets = [0, 0], sizes = [8, 96], strides = [1, 1]} : vector<8x128xf32> to vector<8x96xf32>
    %362 = arith.negf %361 : vector<8x96xf32>
    %363 = math.exp %362 : vector<8x96xf32>
    %cst_80 = arith.constant 1.000000e+00 : f32
    %364 = vector.broadcast %cst_80 : f32 to vector<8x96xf32>
    %365 = arith.addf %364, %363 : vector<8x96xf32>
    %366 = arith.divf %364, %365 : vector<8x96xf32>
    %367 = vector.extract_strided_slice %360 {offsets = [0, 96], sizes = [8, 32], strides = [1, 1]} : vector<8x128xf32> to vector<8x32xf32>
    %368 = math.tanh %367 : vector<8x32xf32>
    %369 = vector.extract_strided_slice %366 {offsets = [0, 32], sizes = [8, 32], strides = [1, 1]} : vector<8x96xf32> to vector<8x32xf32>
    %370 = arith.mulf %369, %356 : vector<8x32xf32>
    %371 = vector.extract_strided_slice %366 {offsets = [0, 0], sizes = [8, 32], strides = [1, 1]} : vector<8x96xf32> to vector<8x32xf32>
    %372 = arith.mulf %371, %368 : vector<8x32xf32>
    %373 = arith.addf %370, %372 : vector<8x32xf32>
    %374 = vector.extract_strided_slice %366 {offsets = [0, 64], sizes = [8, 32], strides = [1, 1]} : vector<8x96xf32> to vector<8x32xf32>
    %375 = math.tanh %373 : vector<8x32xf32>
    %376 = arith.mulf %374, %375 : vector<8x32xf32>
    %377 = vector.extract_strided_slice %351 {offsets = [56, 0], sizes = [8, 128], strides = [1, 1]} : vector<64x128xf32> to vector<8x128xf32>
    %cst_81 = arith.constant dense<0.000000e+00> : vector<8x128xf32>
    %378 = tpu.matmul %355, %353, %cst_81 {dimension_numbers = #tpu.dot_dimension_numbers<[1], [0], [0], [1], [0, 0, 1, 1], [], []>} : vector<8x32xf32>, vector<32x128xf32>, vector<8x128xf32> -> vector<8x128xf32>
    %379 = arith.addf %377, %378 : vector<8x128xf32>
    %380 = vector.extract_strided_slice %379 {offsets = [0, 0], sizes = [8, 96], strides = [1, 1]} : vector<8x128xf32> to vector<8x96xf32>
    %381 = arith.negf %380 : vector<8x96xf32>
    %382 = math.exp %381 : vector<8x96xf32>
    %cst_82 = arith.constant 1.000000e+00 : f32
    %383 = vector.broadcast %cst_82 : f32 to vector<8x96xf32>
    %384 = arith.addf %383, %382 : vector<8x96xf32>
    %385 = arith.divf %383, %384 : vector<8x96xf32>
    %386 = vector.extract_strided_slice %379 {offsets = [0, 96], sizes = [8, 32], strides = [1, 1]} : vector<8x128xf32> to vector<8x32xf32>
    %387 = math.tanh %386 : vector<8x32xf32>
    %388 = vector.extract_strided_slice %385 {offsets = [0, 32], sizes = [8, 32], strides = [1, 1]} : vector<8x96xf32> to vector<8x32xf32>
    %389 = arith.mulf %388, %357 : vector<8x32xf32>
    %390 = vector.extract_strided_slice %385 {offsets = [0, 0], sizes = [8, 32], strides = [1, 1]} : vector<8x96xf32> to vector<8x32xf32>
    %391 = arith.mulf %390, %387 : vector<8x32xf32>
    %392 = arith.addf %389, %391 : vector<8x32xf32>
    %393 = vector.extract_strided_slice %385 {offsets = [0, 64], sizes = [8, 32], strides = [1, 1]} : vector<8x96xf32> to vector<8x32xf32>
    %394 = math.tanh %392 : vector<8x32xf32>
    %395 = arith.mulf %393, %394 : vector<8x32xf32>
    %396 = vector.extract_strided_slice %342 {offsets = [8, 0], sizes = [8, 128], strides = [1, 1]} : vector<64x128xf32> to vector<8x128xf32>
    %cst_83 = arith.constant dense<0.000000e+00> : vector<8x128xf32>
    %397 = tpu.matmul %376, %344, %cst_83 {dimension_numbers = #tpu.dot_dimension_numbers<[1], [0], [0], [1], [0, 0, 1, 1], [], []>} : vector<8x32xf32>, vector<32x128xf32>, vector<8x128xf32> -> vector<8x128xf32>
    %398 = arith.addf %396, %397 : vector<8x128xf32>
    %399 = vector.extract_strided_slice %398 {offsets = [0, 0], sizes = [8, 96], strides = [1, 1]} : vector<8x128xf32> to vector<8x96xf32>
    %400 = arith.negf %399 : vector<8x96xf32>
    %401 = math.exp %400 : vector<8x96xf32>
    %cst_84 = arith.constant 1.000000e+00 : f32
    %402 = vector.broadcast %cst_84 : f32 to vector<8x96xf32>
    %403 = arith.addf %402, %401 : vector<8x96xf32>
    %404 = arith.divf %402, %403 : vector<8x96xf32>
    %405 = vector.extract_strided_slice %398 {offsets = [0, 96], sizes = [8, 32], strides = [1, 1]} : vector<8x128xf32> to vector<8x32xf32>
    %406 = math.tanh %405 : vector<8x32xf32>
    %407 = vector.extract_strided_slice %404 {offsets = [0, 32], sizes = [8, 32], strides = [1, 1]} : vector<8x96xf32> to vector<8x32xf32>
    %408 = arith.mulf %407, %373 : vector<8x32xf32>
    %409 = vector.extract_strided_slice %404 {offsets = [0, 0], sizes = [8, 32], strides = [1, 1]} : vector<8x96xf32> to vector<8x32xf32>
    %410 = arith.mulf %409, %406 : vector<8x32xf32>
    %411 = arith.addf %408, %410 : vector<8x32xf32>
    %412 = vector.extract_strided_slice %404 {offsets = [0, 64], sizes = [8, 32], strides = [1, 1]} : vector<8x96xf32> to vector<8x32xf32>
    %413 = math.tanh %411 : vector<8x32xf32>
    %414 = arith.mulf %412, %413 : vector<8x32xf32>
    %415 = vector.extract_strided_slice %351 {offsets = [48, 0], sizes = [8, 128], strides = [1, 1]} : vector<64x128xf32> to vector<8x128xf32>
    %cst_85 = arith.constant dense<0.000000e+00> : vector<8x128xf32>
    %416 = tpu.matmul %395, %353, %cst_85 {dimension_numbers = #tpu.dot_dimension_numbers<[1], [0], [0], [1], [0, 0, 1, 1], [], []>} : vector<8x32xf32>, vector<32x128xf32>, vector<8x128xf32> -> vector<8x128xf32>
    %417 = arith.addf %415, %416 : vector<8x128xf32>
    %418 = vector.extract_strided_slice %417 {offsets = [0, 0], sizes = [8, 96], strides = [1, 1]} : vector<8x128xf32> to vector<8x96xf32>
    %419 = arith.negf %418 : vector<8x96xf32>
    %420 = math.exp %419 : vector<8x96xf32>
    %cst_86 = arith.constant 1.000000e+00 : f32
    %421 = vector.broadcast %cst_86 : f32 to vector<8x96xf32>
    %422 = arith.addf %421, %420 : vector<8x96xf32>
    %423 = arith.divf %421, %422 : vector<8x96xf32>
    %424 = vector.extract_strided_slice %417 {offsets = [0, 96], sizes = [8, 32], strides = [1, 1]} : vector<8x128xf32> to vector<8x32xf32>
    %425 = math.tanh %424 : vector<8x32xf32>
    %426 = vector.extract_strided_slice %423 {offsets = [0, 32], sizes = [8, 32], strides = [1, 1]} : vector<8x96xf32> to vector<8x32xf32>
    %427 = arith.mulf %426, %392 : vector<8x32xf32>
    %428 = vector.extract_strided_slice %423 {offsets = [0, 0], sizes = [8, 32], strides = [1, 1]} : vector<8x96xf32> to vector<8x32xf32>
    %429 = arith.mulf %428, %425 : vector<8x32xf32>
    %430 = arith.addf %427, %429 : vector<8x32xf32>
    %431 = vector.extract_strided_slice %423 {offsets = [0, 64], sizes = [8, 32], strides = [1, 1]} : vector<8x96xf32> to vector<8x32xf32>
    %432 = math.tanh %430 : vector<8x32xf32>
    %433 = arith.mulf %431, %432 : vector<8x32xf32>
    %434 = vector.extract_strided_slice %342 {offsets = [16, 0], sizes = [8, 128], strides = [1, 1]} : vector<64x128xf32> to vector<8x128xf32>
    %cst_87 = arith.constant dense<0.000000e+00> : vector<8x128xf32>
    %435 = tpu.matmul %414, %344, %cst_87 {dimension_numbers = #tpu.dot_dimension_numbers<[1], [0], [0], [1], [0, 0, 1, 1], [], []>} : vector<8x32xf32>, vector<32x128xf32>, vector<8x128xf32> -> vector<8x128xf32>
    %436 = arith.addf %434, %435 : vector<8x128xf32>
    %437 = vector.extract_strided_slice %436 {offsets = [0, 0], sizes = [8, 96], strides = [1, 1]} : vector<8x128xf32> to vector<8x96xf32>
    %438 = arith.negf %437 : vector<8x96xf32>
    %439 = math.exp %438 : vector<8x96xf32>
    %cst_88 = arith.constant 1.000000e+00 : f32
    %440 = vector.broadcast %cst_88 : f32 to vector<8x96xf32>
    %441 = arith.addf %440, %439 : vector<8x96xf32>
    %442 = arith.divf %440, %441 : vector<8x96xf32>
    %443 = vector.extract_strided_slice %436 {offsets = [0, 96], sizes = [8, 32], strides = [1, 1]} : vector<8x128xf32> to vector<8x32xf32>
    %444 = math.tanh %443 : vector<8x32xf32>
    %445 = vector.extract_strided_slice %442 {offsets = [0, 32], sizes = [8, 32], strides = [1, 1]} : vector<8x96xf32> to vector<8x32xf32>
    %446 = arith.mulf %445, %411 : vector<8x32xf32>
    %447 = vector.extract_strided_slice %442 {offsets = [0, 0], sizes = [8, 32], strides = [1, 1]} : vector<8x96xf32> to vector<8x32xf32>
    %448 = arith.mulf %447, %444 : vector<8x32xf32>
    %449 = arith.addf %446, %448 : vector<8x32xf32>
    %450 = vector.extract_strided_slice %442 {offsets = [0, 64], sizes = [8, 32], strides = [1, 1]} : vector<8x96xf32> to vector<8x32xf32>
    %451 = math.tanh %449 : vector<8x32xf32>
    %452 = arith.mulf %450, %451 : vector<8x32xf32>
    %453 = vector.extract_strided_slice %351 {offsets = [40, 0], sizes = [8, 128], strides = [1, 1]} : vector<64x128xf32> to vector<8x128xf32>
    %cst_89 = arith.constant dense<0.000000e+00> : vector<8x128xf32>
    %454 = tpu.matmul %433, %353, %cst_89 {dimension_numbers = #tpu.dot_dimension_numbers<[1], [0], [0], [1], [0, 0, 1, 1], [], []>} : vector<8x32xf32>, vector<32x128xf32>, vector<8x128xf32> -> vector<8x128xf32>
    %455 = arith.addf %453, %454 : vector<8x128xf32>
    %456 = vector.extract_strided_slice %455 {offsets = [0, 0], sizes = [8, 96], strides = [1, 1]} : vector<8x128xf32> to vector<8x96xf32>
    %457 = arith.negf %456 : vector<8x96xf32>
    %458 = math.exp %457 : vector<8x96xf32>
    %cst_90 = arith.constant 1.000000e+00 : f32
    %459 = vector.broadcast %cst_90 : f32 to vector<8x96xf32>
    %460 = arith.addf %459, %458 : vector<8x96xf32>
    %461 = arith.divf %459, %460 : vector<8x96xf32>
    %462 = vector.extract_strided_slice %455 {offsets = [0, 96], sizes = [8, 32], strides = [1, 1]} : vector<8x128xf32> to vector<8x32xf32>
    %463 = math.tanh %462 : vector<8x32xf32>
    %464 = vector.extract_strided_slice %461 {offsets = [0, 32], sizes = [8, 32], strides = [1, 1]} : vector<8x96xf32> to vector<8x32xf32>
    %465 = arith.mulf %464, %430 : vector<8x32xf32>
    %466 = vector.extract_strided_slice %461 {offsets = [0, 0], sizes = [8, 32], strides = [1, 1]} : vector<8x96xf32> to vector<8x32xf32>
    %467 = arith.mulf %466, %463 : vector<8x32xf32>
    %468 = arith.addf %465, %467 : vector<8x32xf32>
    %469 = vector.extract_strided_slice %461 {offsets = [0, 64], sizes = [8, 32], strides = [1, 1]} : vector<8x96xf32> to vector<8x32xf32>
    %470 = math.tanh %468 : vector<8x32xf32>
    %471 = arith.mulf %469, %470 : vector<8x32xf32>
    %472 = vector.extract_strided_slice %342 {offsets = [24, 0], sizes = [8, 128], strides = [1, 1]} : vector<64x128xf32> to vector<8x128xf32>
    %cst_91 = arith.constant dense<0.000000e+00> : vector<8x128xf32>
    %473 = tpu.matmul %452, %344, %cst_91 {dimension_numbers = #tpu.dot_dimension_numbers<[1], [0], [0], [1], [0, 0, 1, 1], [], []>} : vector<8x32xf32>, vector<32x128xf32>, vector<8x128xf32> -> vector<8x128xf32>
    %474 = arith.addf %472, %473 : vector<8x128xf32>
    %475 = vector.extract_strided_slice %474 {offsets = [0, 0], sizes = [8, 96], strides = [1, 1]} : vector<8x128xf32> to vector<8x96xf32>
    %476 = arith.negf %475 : vector<8x96xf32>
    %477 = math.exp %476 : vector<8x96xf32>
    %cst_92 = arith.constant 1.000000e+00 : f32
    %478 = vector.broadcast %cst_92 : f32 to vector<8x96xf32>
    %479 = arith.addf %478, %477 : vector<8x96xf32>
    %480 = arith.divf %478, %479 : vector<8x96xf32>
    %481 = vector.extract_strided_slice %474 {offsets = [0, 96], sizes = [8, 32], strides = [1, 1]} : vector<8x128xf32> to vector<8x32xf32>
    %482 = math.tanh %481 : vector<8x32xf32>
    %483 = vector.extract_strided_slice %480 {offsets = [0, 32], sizes = [8, 32], strides = [1, 1]} : vector<8x96xf32> to vector<8x32xf32>
    %484 = arith.mulf %483, %449 : vector<8x32xf32>
    %485 = vector.extract_strided_slice %480 {offsets = [0, 0], sizes = [8, 32], strides = [1, 1]} : vector<8x96xf32> to vector<8x32xf32>
    %486 = arith.mulf %485, %482 : vector<8x32xf32>
    %487 = arith.addf %484, %486 : vector<8x32xf32>
    %488 = vector.extract_strided_slice %480 {offsets = [0, 64], sizes = [8, 32], strides = [1, 1]} : vector<8x96xf32> to vector<8x32xf32>
    %489 = math.tanh %487 : vector<8x32xf32>
    %490 = arith.mulf %488, %489 : vector<8x32xf32>
    %491 = vector.extract_strided_slice %351 {offsets = [32, 0], sizes = [8, 128], strides = [1, 1]} : vector<64x128xf32> to vector<8x128xf32>
    %cst_93 = arith.constant dense<0.000000e+00> : vector<8x128xf32>
    %492 = tpu.matmul %471, %353, %cst_93 {dimension_numbers = #tpu.dot_dimension_numbers<[1], [0], [0], [1], [0, 0, 1, 1], [], []>} : vector<8x32xf32>, vector<32x128xf32>, vector<8x128xf32> -> vector<8x128xf32>
    %493 = arith.addf %491, %492 : vector<8x128xf32>
    %494 = vector.extract_strided_slice %493 {offsets = [0, 0], sizes = [8, 96], strides = [1, 1]} : vector<8x128xf32> to vector<8x96xf32>
    %495 = arith.negf %494 : vector<8x96xf32>
    %496 = math.exp %495 : vector<8x96xf32>
    %cst_94 = arith.constant 1.000000e+00 : f32
    %497 = vector.broadcast %cst_94 : f32 to vector<8x96xf32>
    %498 = arith.addf %497, %496 : vector<8x96xf32>
    %499 = arith.divf %497, %498 : vector<8x96xf32>
    %500 = vector.extract_strided_slice %493 {offsets = [0, 96], sizes = [8, 32], strides = [1, 1]} : vector<8x128xf32> to vector<8x32xf32>
    %501 = math.tanh %500 : vector<8x32xf32>
    %502 = vector.extract_strided_slice %499 {offsets = [0, 32], sizes = [8, 32], strides = [1, 1]} : vector<8x96xf32> to vector<8x32xf32>
    %503 = arith.mulf %502, %468 : vector<8x32xf32>
    %504 = vector.extract_strided_slice %499 {offsets = [0, 0], sizes = [8, 32], strides = [1, 1]} : vector<8x96xf32> to vector<8x32xf32>
    %505 = arith.mulf %504, %501 : vector<8x32xf32>
    %506 = arith.addf %503, %505 : vector<8x32xf32>
    %507 = vector.extract_strided_slice %499 {offsets = [0, 64], sizes = [8, 32], strides = [1, 1]} : vector<8x96xf32> to vector<8x32xf32>
    %508 = math.tanh %506 : vector<8x32xf32>
    %509 = arith.mulf %507, %508 : vector<8x32xf32>
    %510 = vector.extract_strided_slice %342 {offsets = [32, 0], sizes = [8, 128], strides = [1, 1]} : vector<64x128xf32> to vector<8x128xf32>
    %cst_95 = arith.constant dense<0.000000e+00> : vector<8x128xf32>
    %511 = tpu.matmul %490, %344, %cst_95 {dimension_numbers = #tpu.dot_dimension_numbers<[1], [0], [0], [1], [0, 0, 1, 1], [], []>} : vector<8x32xf32>, vector<32x128xf32>, vector<8x128xf32> -> vector<8x128xf32>
    %512 = arith.addf %510, %511 : vector<8x128xf32>
    %513 = vector.extract_strided_slice %512 {offsets = [0, 0], sizes = [8, 96], strides = [1, 1]} : vector<8x128xf32> to vector<8x96xf32>
    %514 = arith.negf %513 : vector<8x96xf32>
    %515 = math.exp %514 : vector<8x96xf32>
    %cst_96 = arith.constant 1.000000e+00 : f32
    %516 = vector.broadcast %cst_96 : f32 to vector<8x96xf32>
    %517 = arith.addf %516, %515 : vector<8x96xf32>
    %518 = arith.divf %516, %517 : vector<8x96xf32>
    %519 = vector.extract_strided_slice %512 {offsets = [0, 96], sizes = [8, 32], strides = [1, 1]} : vector<8x128xf32> to vector<8x32xf32>
    %520 = math.tanh %519 : vector<8x32xf32>
    %521 = vector.extract_strided_slice %518 {offsets = [0, 32], sizes = [8, 32], strides = [1, 1]} : vector<8x96xf32> to vector<8x32xf32>
    %522 = arith.mulf %521, %487 : vector<8x32xf32>
    %523 = vector.extract_strided_slice %518 {offsets = [0, 0], sizes = [8, 32], strides = [1, 1]} : vector<8x96xf32> to vector<8x32xf32>
    %524 = arith.mulf %523, %520 : vector<8x32xf32>
    %525 = arith.addf %522, %524 : vector<8x32xf32>
    %526 = vector.extract_strided_slice %518 {offsets = [0, 64], sizes = [8, 32], strides = [1, 1]} : vector<8x96xf32> to vector<8x32xf32>
    %527 = math.tanh %525 : vector<8x32xf32>
    %528 = arith.mulf %526, %527 : vector<8x32xf32>
    %529 = vector.extract_strided_slice %351 {offsets = [24, 0], sizes = [8, 128], strides = [1, 1]} : vector<64x128xf32> to vector<8x128xf32>
    %cst_97 = arith.constant dense<0.000000e+00> : vector<8x128xf32>
    %530 = tpu.matmul %509, %353, %cst_97 {dimension_numbers = #tpu.dot_dimension_numbers<[1], [0], [0], [1], [0, 0, 1, 1], [], []>} : vector<8x32xf32>, vector<32x128xf32>, vector<8x128xf32> -> vector<8x128xf32>
    %531 = arith.addf %529, %530 : vector<8x128xf32>
    %532 = vector.extract_strided_slice %531 {offsets = [0, 0], sizes = [8, 96], strides = [1, 1]} : vector<8x128xf32> to vector<8x96xf32>
    %533 = arith.negf %532 : vector<8x96xf32>
    %534 = math.exp %533 : vector<8x96xf32>
    %cst_98 = arith.constant 1.000000e+00 : f32
    %535 = vector.broadcast %cst_98 : f32 to vector<8x96xf32>
    %536 = arith.addf %535, %534 : vector<8x96xf32>
    %537 = arith.divf %535, %536 : vector<8x96xf32>
    %538 = vector.extract_strided_slice %531 {offsets = [0, 96], sizes = [8, 32], strides = [1, 1]} : vector<8x128xf32> to vector<8x32xf32>
    %539 = math.tanh %538 : vector<8x32xf32>
    %540 = vector.extract_strided_slice %537 {offsets = [0, 32], sizes = [8, 32], strides = [1, 1]} : vector<8x96xf32> to vector<8x32xf32>
    %541 = arith.mulf %540, %506 : vector<8x32xf32>
    %542 = vector.extract_strided_slice %537 {offsets = [0, 0], sizes = [8, 32], strides = [1, 1]} : vector<8x96xf32> to vector<8x32xf32>
    %543 = arith.mulf %542, %539 : vector<8x32xf32>
    %544 = arith.addf %541, %543 : vector<8x32xf32>
    %545 = vector.extract_strided_slice %537 {offsets = [0, 64], sizes = [8, 32], strides = [1, 1]} : vector<8x96xf32> to vector<8x32xf32>
    %546 = math.tanh %544 : vector<8x32xf32>
    %547 = arith.mulf %545, %546 : vector<8x32xf32>
    %548 = vector.extract_strided_slice %342 {offsets = [40, 0], sizes = [8, 128], strides = [1, 1]} : vector<64x128xf32> to vector<8x128xf32>
    %cst_99 = arith.constant dense<0.000000e+00> : vector<8x128xf32>
    %549 = tpu.matmul %528, %344, %cst_99 {dimension_numbers = #tpu.dot_dimension_numbers<[1], [0], [0], [1], [0, 0, 1, 1], [], []>} : vector<8x32xf32>, vector<32x128xf32>, vector<8x128xf32> -> vector<8x128xf32>
    %550 = arith.addf %548, %549 : vector<8x128xf32>
    %551 = vector.extract_strided_slice %550 {offsets = [0, 0], sizes = [8, 96], strides = [1, 1]} : vector<8x128xf32> to vector<8x96xf32>
    %552 = arith.negf %551 : vector<8x96xf32>
    %553 = math.exp %552 : vector<8x96xf32>
    %cst_100 = arith.constant 1.000000e+00 : f32
    %554 = vector.broadcast %cst_100 : f32 to vector<8x96xf32>
    %555 = arith.addf %554, %553 : vector<8x96xf32>
    %556 = arith.divf %554, %555 : vector<8x96xf32>
    %557 = vector.extract_strided_slice %550 {offsets = [0, 96], sizes = [8, 32], strides = [1, 1]} : vector<8x128xf32> to vector<8x32xf32>
    %558 = math.tanh %557 : vector<8x32xf32>
    %559 = vector.extract_strided_slice %556 {offsets = [0, 32], sizes = [8, 32], strides = [1, 1]} : vector<8x96xf32> to vector<8x32xf32>
    %560 = arith.mulf %559, %525 : vector<8x32xf32>
    %561 = vector.extract_strided_slice %556 {offsets = [0, 0], sizes = [8, 32], strides = [1, 1]} : vector<8x96xf32> to vector<8x32xf32>
    %562 = arith.mulf %561, %558 : vector<8x32xf32>
    %563 = arith.addf %560, %562 : vector<8x32xf32>
    %564 = vector.extract_strided_slice %556 {offsets = [0, 64], sizes = [8, 32], strides = [1, 1]} : vector<8x96xf32> to vector<8x32xf32>
    %565 = math.tanh %563 : vector<8x32xf32>
    %566 = arith.mulf %564, %565 : vector<8x32xf32>
    %567 = vector.extract_strided_slice %351 {offsets = [16, 0], sizes = [8, 128], strides = [1, 1]} : vector<64x128xf32> to vector<8x128xf32>
    %cst_101 = arith.constant dense<0.000000e+00> : vector<8x128xf32>
    %568 = tpu.matmul %547, %353, %cst_101 {dimension_numbers = #tpu.dot_dimension_numbers<[1], [0], [0], [1], [0, 0, 1, 1], [], []>} : vector<8x32xf32>, vector<32x128xf32>, vector<8x128xf32> -> vector<8x128xf32>
    %569 = arith.addf %567, %568 : vector<8x128xf32>
    %570 = vector.extract_strided_slice %569 {offsets = [0, 0], sizes = [8, 96], strides = [1, 1]} : vector<8x128xf32> to vector<8x96xf32>
    %571 = arith.negf %570 : vector<8x96xf32>
    %572 = math.exp %571 : vector<8x96xf32>
    %cst_102 = arith.constant 1.000000e+00 : f32
    %573 = vector.broadcast %cst_102 : f32 to vector<8x96xf32>
    %574 = arith.addf %573, %572 : vector<8x96xf32>
    %575 = arith.divf %573, %574 : vector<8x96xf32>
    %576 = vector.extract_strided_slice %569 {offsets = [0, 96], sizes = [8, 32], strides = [1, 1]} : vector<8x128xf32> to vector<8x32xf32>
    %577 = math.tanh %576 : vector<8x32xf32>
    %578 = vector.extract_strided_slice %575 {offsets = [0, 32], sizes = [8, 32], strides = [1, 1]} : vector<8x96xf32> to vector<8x32xf32>
    %579 = arith.mulf %578, %544 : vector<8x32xf32>
    %580 = vector.extract_strided_slice %575 {offsets = [0, 0], sizes = [8, 32], strides = [1, 1]} : vector<8x96xf32> to vector<8x32xf32>
    %581 = arith.mulf %580, %577 : vector<8x32xf32>
    %582 = arith.addf %579, %581 : vector<8x32xf32>
    %583 = vector.extract_strided_slice %575 {offsets = [0, 64], sizes = [8, 32], strides = [1, 1]} : vector<8x96xf32> to vector<8x32xf32>
    %584 = math.tanh %582 : vector<8x32xf32>
    %585 = arith.mulf %583, %584 : vector<8x32xf32>
    %586 = vector.extract_strided_slice %342 {offsets = [48, 0], sizes = [8, 128], strides = [1, 1]} : vector<64x128xf32> to vector<8x128xf32>
    %cst_103 = arith.constant dense<0.000000e+00> : vector<8x128xf32>
    %587 = tpu.matmul %566, %344, %cst_103 {dimension_numbers = #tpu.dot_dimension_numbers<[1], [0], [0], [1], [0, 0, 1, 1], [], []>} : vector<8x32xf32>, vector<32x128xf32>, vector<8x128xf32> -> vector<8x128xf32>
    %588 = arith.addf %586, %587 : vector<8x128xf32>
    %589 = vector.extract_strided_slice %588 {offsets = [0, 0], sizes = [8, 96], strides = [1, 1]} : vector<8x128xf32> to vector<8x96xf32>
    %590 = arith.negf %589 : vector<8x96xf32>
    %591 = math.exp %590 : vector<8x96xf32>
    %cst_104 = arith.constant 1.000000e+00 : f32
    %592 = vector.broadcast %cst_104 : f32 to vector<8x96xf32>
    %593 = arith.addf %592, %591 : vector<8x96xf32>
    %594 = arith.divf %592, %593 : vector<8x96xf32>
    %595 = vector.extract_strided_slice %588 {offsets = [0, 96], sizes = [8, 32], strides = [1, 1]} : vector<8x128xf32> to vector<8x32xf32>
    %596 = math.tanh %595 : vector<8x32xf32>
    %597 = vector.extract_strided_slice %594 {offsets = [0, 32], sizes = [8, 32], strides = [1, 1]} : vector<8x96xf32> to vector<8x32xf32>
    %598 = arith.mulf %597, %563 : vector<8x32xf32>
    %599 = vector.extract_strided_slice %594 {offsets = [0, 0], sizes = [8, 32], strides = [1, 1]} : vector<8x96xf32> to vector<8x32xf32>
    %600 = arith.mulf %599, %596 : vector<8x32xf32>
    %601 = arith.addf %598, %600 : vector<8x32xf32>
    %602 = vector.extract_strided_slice %594 {offsets = [0, 64], sizes = [8, 32], strides = [1, 1]} : vector<8x96xf32> to vector<8x32xf32>
    %603 = math.tanh %601 : vector<8x32xf32>
    %604 = arith.mulf %602, %603 : vector<8x32xf32>
    %605 = vector.extract_strided_slice %351 {offsets = [8, 0], sizes = [8, 128], strides = [1, 1]} : vector<64x128xf32> to vector<8x128xf32>
    %cst_105 = arith.constant dense<0.000000e+00> : vector<8x128xf32>
    %606 = tpu.matmul %585, %353, %cst_105 {dimension_numbers = #tpu.dot_dimension_numbers<[1], [0], [0], [1], [0, 0, 1, 1], [], []>} : vector<8x32xf32>, vector<32x128xf32>, vector<8x128xf32> -> vector<8x128xf32>
    %607 = arith.addf %605, %606 : vector<8x128xf32>
    %608 = vector.extract_strided_slice %607 {offsets = [0, 0], sizes = [8, 96], strides = [1, 1]} : vector<8x128xf32> to vector<8x96xf32>
    %609 = arith.negf %608 : vector<8x96xf32>
    %610 = math.exp %609 : vector<8x96xf32>
    %cst_106 = arith.constant 1.000000e+00 : f32
    %611 = vector.broadcast %cst_106 : f32 to vector<8x96xf32>
    %612 = arith.addf %611, %610 : vector<8x96xf32>
    %613 = arith.divf %611, %612 : vector<8x96xf32>
    %614 = vector.extract_strided_slice %607 {offsets = [0, 96], sizes = [8, 32], strides = [1, 1]} : vector<8x128xf32> to vector<8x32xf32>
    %615 = math.tanh %614 : vector<8x32xf32>
    %616 = vector.extract_strided_slice %613 {offsets = [0, 32], sizes = [8, 32], strides = [1, 1]} : vector<8x96xf32> to vector<8x32xf32>
    %617 = arith.mulf %616, %582 : vector<8x32xf32>
    %618 = vector.extract_strided_slice %613 {offsets = [0, 0], sizes = [8, 32], strides = [1, 1]} : vector<8x96xf32> to vector<8x32xf32>
    %619 = arith.mulf %618, %615 : vector<8x32xf32>
    %620 = arith.addf %617, %619 : vector<8x32xf32>
    %621 = vector.extract_strided_slice %613 {offsets = [0, 64], sizes = [8, 32], strides = [1, 1]} : vector<8x96xf32> to vector<8x32xf32>
    %622 = math.tanh %620 : vector<8x32xf32>
    %623 = arith.mulf %621, %622 : vector<8x32xf32>
    %624 = vector.extract_strided_slice %342 {offsets = [56, 0], sizes = [8, 128], strides = [1, 1]} : vector<64x128xf32> to vector<8x128xf32>
    %cst_107 = arith.constant dense<0.000000e+00> : vector<8x128xf32>
    %625 = tpu.matmul %604, %344, %cst_107 {dimension_numbers = #tpu.dot_dimension_numbers<[1], [0], [0], [1], [0, 0, 1, 1], [], []>} : vector<8x32xf32>, vector<32x128xf32>, vector<8x128xf32> -> vector<8x128xf32>
    %626 = arith.addf %624, %625 : vector<8x128xf32>
    %627 = vector.extract_strided_slice %626 {offsets = [0, 0], sizes = [8, 96], strides = [1, 1]} : vector<8x128xf32> to vector<8x96xf32>
    %628 = arith.negf %627 : vector<8x96xf32>
    %629 = math.exp %628 : vector<8x96xf32>
    %cst_108 = arith.constant 1.000000e+00 : f32
    %630 = vector.broadcast %cst_108 : f32 to vector<8x96xf32>
    %631 = arith.addf %630, %629 : vector<8x96xf32>
    %632 = arith.divf %630, %631 : vector<8x96xf32>
    %633 = vector.extract_strided_slice %626 {offsets = [0, 96], sizes = [8, 32], strides = [1, 1]} : vector<8x128xf32> to vector<8x32xf32>
    %634 = math.tanh %633 : vector<8x32xf32>
    %635 = vector.extract_strided_slice %632 {offsets = [0, 32], sizes = [8, 32], strides = [1, 1]} : vector<8x96xf32> to vector<8x32xf32>
    %636 = arith.mulf %635, %601 : vector<8x32xf32>
    %637 = vector.extract_strided_slice %632 {offsets = [0, 0], sizes = [8, 32], strides = [1, 1]} : vector<8x96xf32> to vector<8x32xf32>
    %638 = arith.mulf %637, %634 : vector<8x32xf32>
    %639 = arith.addf %636, %638 : vector<8x32xf32>
    %640 = vector.extract_strided_slice %632 {offsets = [0, 64], sizes = [8, 32], strides = [1, 1]} : vector<8x96xf32> to vector<8x32xf32>
    %641 = math.tanh %639 : vector<8x32xf32>
    %642 = arith.mulf %640, %641 : vector<8x32xf32>
    %643 = vector.extract_strided_slice %351 {offsets = [0, 0], sizes = [8, 128], strides = [1, 1]} : vector<64x128xf32> to vector<8x128xf32>
    %cst_109 = arith.constant dense<0.000000e+00> : vector<8x128xf32>
    %644 = tpu.matmul %623, %353, %cst_109 {dimension_numbers = #tpu.dot_dimension_numbers<[1], [0], [0], [1], [0, 0, 1, 1], [], []>} : vector<8x32xf32>, vector<32x128xf32>, vector<8x128xf32> -> vector<8x128xf32>
    %645 = arith.addf %643, %644 : vector<8x128xf32>
    %646 = vector.extract_strided_slice %645 {offsets = [0, 0], sizes = [8, 96], strides = [1, 1]} : vector<8x128xf32> to vector<8x96xf32>
    %647 = arith.negf %646 : vector<8x96xf32>
    %648 = math.exp %647 : vector<8x96xf32>
    %cst_110 = arith.constant 1.000000e+00 : f32
    %649 = vector.broadcast %cst_110 : f32 to vector<8x96xf32>
    %650 = arith.addf %649, %648 : vector<8x96xf32>
    %651 = arith.divf %649, %650 : vector<8x96xf32>
    %652 = vector.extract_strided_slice %645 {offsets = [0, 96], sizes = [8, 32], strides = [1, 1]} : vector<8x128xf32> to vector<8x32xf32>
    %653 = math.tanh %652 : vector<8x32xf32>
    %654 = vector.extract_strided_slice %651 {offsets = [0, 32], sizes = [8, 32], strides = [1, 1]} : vector<8x96xf32> to vector<8x32xf32>
    %655 = arith.mulf %654, %620 : vector<8x32xf32>
    %656 = vector.extract_strided_slice %651 {offsets = [0, 0], sizes = [8, 32], strides = [1, 1]} : vector<8x96xf32> to vector<8x32xf32>
    %657 = arith.mulf %656, %653 : vector<8x32xf32>
    %658 = arith.addf %655, %657 : vector<8x32xf32>
    %659 = vector.extract_strided_slice %651 {offsets = [0, 64], sizes = [8, 32], strides = [1, 1]} : vector<8x96xf32> to vector<8x32xf32>
    %660 = math.tanh %658 : vector<8x32xf32>
    %661 = arith.mulf %659, %660 : vector<8x32xf32>
    %c0_111 = arith.constant 0 : index
    %c0_112 = arith.constant 0 : index
    %662 = vector.load %arg9[%c0_111, %c0_112] : memref<1x128xf32, #tpu.memory_space<vmem>>, vector<1x128xf32>
    %c0_113 = arith.constant 0 : index
    %c0_114 = arith.constant 0 : index
    %663 = vector.load %arg8[%c0_113, %c0_114] : memref<64x128xf32, #tpu.memory_space<vmem>>, vector<32x128xf32>
    %cst_115 = arith.constant dense<0.000000e+00> : vector<8x128xf32>
    %664 = tpu.matmul %642, %663, %cst_115 {dimension_numbers = #tpu.dot_dimension_numbers<[1], [0], [0], [1], [0, 0, 1, 1], [], []>} : vector<8x32xf32>, vector<32x128xf32>, vector<8x128xf32> -> vector<8x128xf32>
    %665 = vector.broadcast %662 : vector<1x128xf32> to vector<8x128xf32>
    %666 = arith.addf %665, %664 : vector<8x128xf32>
    %c32 = arith.constant 32 : index
    %c0_116 = arith.constant 0 : index
    %667 = vector.load %arg8[%c32, %c0_116] : memref<64x128xf32, #tpu.memory_space<vmem>>, vector<32x128xf32>
    %cst_117 = arith.constant dense<0.000000e+00> : vector<8x128xf32>
    %668 = tpu.matmul %661, %667, %cst_117 {dimension_numbers = #tpu.dot_dimension_numbers<[1], [0], [0], [1], [0, 0, 1, 1], [], []>} : vector<8x32xf32>, vector<32x128xf32>, vector<8x128xf32> -> vector<8x128xf32>
    %669 = arith.addf %666, %668 : vector<8x128xf32>
    %c0_118 = arith.constant 0 : index
    %c0_119 = arith.constant 0 : index
    %670 = vector.load %arg10[%c0_118, %c0_119] : memref<8x128xf32, #tpu.memory_space<vmem>>, vector<8x128xf32>
    tpu.vector_store %arg10[%c0_118, %c0_119], %669 {strides = array<i32>} : memref<8x128xf32, #tpu.memory_space<vmem>>, vector<8x128xf32>,
    return
  }
  func.func @transform_0(%arg0: i32) -> (i32, i32) {
    %c0_i32 = arith.constant 0 : i32
    %c0_i32_0 = arith.constant 0 : i32
    %c0_i32_1 = arith.constant 0 : i32
    return %c0_i32, %c0_i32_0 : i32, i32
  }
  func.func @transform_1(%arg0: i32) -> (i32, i32, i32) {
    %c0_i32 = arith.constant 0 : i32
    %c0_i32_0 = arith.constant 0 : i32
    %c0_i32_1 = arith.constant 0 : i32
    %c0_i32_2 = arith.constant 0 : i32
    return %c0_i32, %c0_i32_0, %c0_i32_1 : i32, i32, i32
  }
  func.func @transform_2(%arg0: i32) -> (i32, i32, i32) {
    %c0_i32 = arith.constant 0 : i32
    %c0_i32_0 = arith.constant 0 : i32
    %c0_i32_1 = arith.constant 0 : i32
    %c0_i32_2 = arith.constant 0 : i32
    return %c0_i32, %c0_i32_0, %c0_i32_1 : i32, i32, i32
  }
  func.func @transform_3(%arg0: i32) -> (i32, i32, i32) {
    %c0_i32 = arith.constant 0 : i32
    %c0_i32_0 = arith.constant 0 : i32
    %c0_i32_1 = arith.constant 0 : i32
    %c0_i32_2 = arith.constant 0 : i32
    return %c0_i32, %c0_i32_0, %c0_i32_1 : i32, i32, i32
  }
  func.func @transform_4(%arg0: i32) -> (i32, i32, i32) {
    %c0_i32 = arith.constant 0 : i32
    %c0_i32_0 = arith.constant 0 : i32
    %c0_i32_1 = arith.constant 0 : i32
    %c0_i32_2 = arith.constant 0 : i32
    return %c0_i32, %c0_i32_0, %c0_i32_1 : i32, i32, i32
  }
  func.func @transform_5(%arg0: i32) -> (i32, i32, i32) {
    %c0_i32 = arith.constant 0 : i32
    %c0_i32_0 = arith.constant 0 : i32
    %c0_i32_1 = arith.constant 0 : i32
    %c0_i32_2 = arith.constant 0 : i32
    return %c0_i32, %c0_i32_0, %c0_i32_1 : i32, i32, i32
  }
  func.func @transform_6(%arg0: i32) -> (i32, i32, i32) {
    %c0_i32 = arith.constant 0 : i32
    %c0_i32_0 = arith.constant 0 : i32
    %c0_i32_1 = arith.constant 0 : i32
    %c0_i32_2 = arith.constant 0 : i32
    return %c0_i32, %c0_i32_0, %c0_i32_1 : i32, i32, i32
  }
  func.func @transform_7(%arg0: i32) -> (i32, i32) {
    %c0_i32 = arith.constant 0 : i32
    %c0_i32_0 = arith.constant 0 : i32
    %c0_i32_1 = arith.constant 0 : i32
    return %c0_i32, %c0_i32_0 : i32, i32
  }
  func.func @transform_8(%arg0: i32) -> (i32, i32) {
    %c0_i32 = arith.constant 0 : i32
    %c0_i32_0 = arith.constant 0 : i32
    %c0_i32_1 = arith.constant 0 : i32
    return %c0_i32, %c0_i32_0 : i32, i32
  }
  func.func @transform_9(%arg0: i32) -> (i32, i32) {
    %c0_i32 = arith.constant 0 : i32
    %c0_i32_0 = arith.constant 0 : i32
    %c0_i32_1 = arith.constant 0 : i32
    return %c0_i32, %c0_i32_0 : i32, i32
  }
}

</mosaic_0001>

<bundles_post_ra>
// kernel: lstm_net_forward.1
= control target key start
LH: loop header
LB: loop body
LE: loop exit
PB: predicated region body
PF: predicated region fallthrough
CT: control target
= control target key end

     0   :  { %14 = vsyncpa [#allocation3], 0  ;;  %s6132_s0 = inlined_call_operand.vmem [shape: f32[64,4], index: 0, kind: input, shape index: {}]   ;;  %s6133_s1 = inlined_call_operand.vmem [shape: f32[2,4,128], index: 1, kind: input, shape index: {}]   ;;  %s6134_s2 = inlined_call_operand.hbm [shape: f32[2,32,128], index: 2, kind: input, shape index: {}]   ;;  %s6135_s3 = inlined_call_operand.vmem [shape: f32[2,1,128], index: 3, kind: input, shape index: {}]   ;;  %s6136_s4 = inlined_call_operand.vmem [shape: f32[2,64,128], index: 4, kind: input, shape index: {}]   ;;  %s6137_s5 = inlined_call_operand.hbm [shape: f32[2,32,128], index: 5, kind: input, shape index: {}]   ;;  %s6138_s6 = inlined_call_operand.vmem [shape: f32[2,1,128], index: 6, kind: input, shape index: {}]   ;;  %s6139_s7 = inlined_call_operand.hbm [shape: f32[64,128], index: 7, kind: input, shape index: {}]   ;;  %s6140_s8 = inlined_call_operand.vmem [shape: f32[1,128], index: 8, kind: input, shape index: {}]   ;;  %s6141_s9 = inlined_call_operand.vmem [shape: f32[8,128], index: 9, kind: output, shape index: {}]  }
   0x1   :  { %15 = vsyncpa [#allocation5], 0  ;;  %s5148_s30 = smov [#allocation4]   ;;  %s5149_s11 = smov [#allocation2]  }
   0x2   :  { %s41_s10 = sshll.u32 %s5148_s30, 4  ;;  %s25_s12 = sshll.u32 %s5149_s11, 4  ;;  %s42_s10 = int_to_ptr.vmem [resolvable:$true] %s41_s10  ;;  %s26_s12 = int_to_ptr.vmem [resolvable:$true] %s25_s12 }
   0x3   :  { %s5092_s13 = scalar_lea.vmem %s42_s10, 1024  ;;  %p5097_p1 = scmp.lt.s32.totalorder %s42_s10, %s42_s10 }
   0x4   :  { %p5093_p0 = scmp.ne.s32.totalorder %s42_s10, %s5092_s13  ;;  %p5098_p2 = scmp.lt.s32.totalorder %s5092_s13, %s5092_s13 }
   0x6   :  { %p5099_p3 = por %p5098_p2, %p5097_p1 }
   0x8   :  { %p5100_p4 = pnand %p5099_p3, %p5093_p0 }
   0xa   :  { %5103 = shalt.err (!%p5100_p4)
}
   0xb   :  { %s5150_s14 = smov 128   ;;  %s5151_s15 = smov 8  }
   0xc   :  { %47 = dma.hbm_to_vmem [thread:$0]  %s6137_s5, 1024, %s42_s10, [#allocation5], %s5150_s14, %s5150_s14, %s5151_s15  }
   0xd   :  { %s5112_s18 = scalar_lea.vmem %s26_s12, 1024  ;;  %p5117_p6 = scmp.lt.s32.totalorder %s26_s12, %s26_s12 }
   0xe   :  { %p5113_p5 = scmp.ne.s32.totalorder %s26_s12, %s5112_s18  ;;  %p5118_p7 = scmp.lt.s32.totalorder %s5112_s18, %s5112_s18 }
  0x10   :  { %p5119_p8 = por %p5118_p7, %p5117_p6 }
  0x12   :  { %p5120_p9 = pnand %p5119_p8, %p5113_p5 }
  0x14   :  { %5123 = shalt.err (!%p5120_p9)
}
  0x15   :  { %31 = dma.hbm_to_vmem [thread:$0]  %s6134_s2, 1024, %s26_s12, [#allocation3], %s5150_s14, %s5150_s14, %s5151_s15  }
  0x16   :  { %s5152_s21 = smov [#allocation6]  }
  0x17   :  { %s55_s22 = sshll.u32 %s5152_s21, 4  ;;  %s56_s22 = int_to_ptr.vmem [resolvable:$true] %s55_s22 }
  0x18   :  { %s5132_s23 = scalar_lea.vmem %s56_s22, 1024  ;;  %p5137_p11 = scmp.lt.s32.totalorder %s56_s22, %s56_s22 }
  0x19   :  { %p5133_p10 = scmp.ne.s32.totalorder %s56_s22, %s5132_s23  ;;  %p5138_p12 = scmp.lt.s32.totalorder %s5132_s23, %s5132_s23 }
  0x1b   :  { %p5139_p13 = por %p5138_p12, %p5137_p11 }
  0x1d   :  { %p5140_p0 = pnand %p5139_p13, %p5133_p10 }
  0x1f   :  { %5143 = shalt.err (!%p5140_p0)
}
  0x20   :  { %61 = dma.hbm_to_vmem [thread:$0]  %s6139_s7, 1024, %s56_s22, [#allocation5], %s5150_s14, %s5150_s14, %s5151_s15  }
  0x21   :  { %5144 = dma.done.wait [#allocation3], 1024  }
  0x22   :  { %5145 = vsyncadd [#allocation3], 4294966272 }
  0x23   :  { %5146 = dma.done.wait [#allocation5], 2048  }
  0x24   :  { %5147 = vsyncadd [#allocation5], 4294965248  ;;  %vm114_vm0 = vcmask 1043456   ;;  %vm89_vm1 = vcmask 31744   ;;  %v4038_v0 = vld [vmem:[%s6133_s1 + $0x4] sm:$0xf] }
  0x25   :  { %v73_v1 = vld [vmem:[%s6132_s0] sm:$0xff]  ;;  %v74_v2 = vld [vmem:[%s6132_s0 + $0x8] sm:$0xff]  ;;  %4374 = vmatprep.subr.msk.mxu1 %vm114_vm0, %v4038_v0  ;;  %v5231_v4 = vld [vmem:[#allocation2 + $0x38] sm:$0xff]  ;;  %v5153_v6 = vmov 0.0   ;;  %vm5154_vm2 = vmmov 0   ;;  %s5156_s5 = smov 64  }
  0x26   :  { %4376 = vmatprep.mubr.msk.f32.mxu1 %vm89_vm1, %v73_v1  ;;  %v81_v3 = vld [vmem:[%s6133_s1] sm:$0xf]  ;;  %4375 = vmatpush3.msk.msra.mxu1 %vm114_vm0, %v4038_v0  ;;  %v75_v5 = vld [vmem:[%s6132_s0 + $0x10] sm:$0xff]  ;;  %v76_v7 = vld [vmem:[%s6132_s0 + $0x18] sm:$0xff]  ;;  %vm350_vm3 = vcmask 261120   ;;  %s5157_s11 = smov 96  }
  0x27   :  { %4360 = vmatprep.subr.msk.mxu0 %vm114_vm0, %v81_v3  ;;  %4377 = vmatmul.mubr.msk.f32.vlgmr.msra.gmra.mxu1 %vm89_vm1, %v74_v2  ;;  %v5247_v8 = vld [vmem:[#allocation2 + $0x30] sm:$0xff]  ;;  %v77_v9 = vld [vmem:[%s6132_s0 + $0x20] sm:$0xff]  ;;  %v5256_v10 = vld [vmem:[#allocation2 + $0x28] sm:$0xff]  ;;  %vm2003_vm4 = vcmask 523264  }
  0x28   :  { %4399 = vmatprep.subr.mxu1 %v5153_v6  ;;  %4361 = vmatpush3.msk.msra.mxu0 %vm114_vm0, %v81_v3  ;;  %v78_v11 = vld [vmem:[%s6132_s0 + $0x28] sm:$0xff]  ;;  %v79_v12 = vld [vmem:[%s6132_s0 + $0x30] sm:$0xff]  ;;  %v5268_v13 = vld [vmem:[#allocation2 + $0x18] sm:$0xff] }
  0x29   :  { %4400 = vmatpush3.msra.mxu1 %v5231_v4  ;;  %4362 = vmatprep.mubr.msk.f32.mxu0 %vm89_vm1, %v73_v1  ;;  %v5274_v14 = vld [vmem:[#allocation2 + $0x20] sm:$0xff]  ;;  %v80_v15 = vld [vmem:[%s6132_s0 + $0x38] sm:$0xff]  ;;  %v5283_v16 = vld [vmem:[#allocation2 + $0x10] sm:$0xff] }
  0x2a   :  { %4379 = vmatprep.mubr.msk.f32.mxu1 %vm89_vm1, %v75_v5  ;;  %4363 = vmatmul.mubr.msk.f32.vlgmr.msra.gmra.mxu0 %vm89_vm1, %v74_v2  ;;  %v5292_v17 = vld [vmem:[#allocation2 + $0x8] sm:$0xff]  ;;  %v5297_v18 = vld [vmem:[#allocation2] sm:$0xff] }
  0x2b   :  { %4401 = vmatprep.subr.mxu1 %v5153_v6  ;;  %4380 = vmatmul.mubr.msk.f32.gmra.mxu1 %vm89_vm1, %v76_v7  ;;  %v4040_v19 = vld [vmem:[%s6135_s3 + $0x1] ss:$0 sm:$0xff]  ;;  %v4028_v22 = vld [vmem:[%s6135_s3] ss:$0 sm:$0xff]  ;;  %s5155_s3 = smov 32  }
  0x2c   :  { %4365 = vmatprep.mubr.msk.f32.mxu0 %vm89_vm1, %v75_v5  ;;  %4402 = vmatpush3.msra.mxu1 %v5247_v8 }
  0x2d   :  { %4382 = vmatprep.mubr.msk.f32.mxu1 %vm89_vm1, %v77_v9  ;;  %4403 = vmatprep.subr.mxu1 %v5153_v6 }
  0x2e   :  { %4388 = vmatprep.subr.mxu0 %v5153_v6  ;;  %4366 = vmatmul.mubr.msk.f32.gmra.mxu0 %vm89_vm1, %v76_v7 }
  0x2f   :  { %4404 = vmatpush3.msra.mxu1 %v5256_v10  ;;  %4368 = vmatprep.mubr.msk.f32.mxu0 %vm89_vm1, %v77_v9 }
  0x30   :  { %4383 = vmatmul.mubr.msk.f32.gmra.mxu1 %vm89_vm1, %v78_v11  ;;  %4389 = vmatpush3.msra.mxu0 %v5268_v13 }
  0x31   :  { %4385 = vmatprep.mubr.msk.f32.mxu1 %vm89_vm1, %v79_v12  ;;  %4405 = vmatprep.subr.mxu1 %v5153_v6 }
  0x32   :  { %4390 = vmatprep.subr.mxu0 %v5153_v6  ;;  %4369 = vmatmul.mubr.msk.f32.gmra.mxu0 %vm89_vm1, %v78_v11 }
  0x33   :  { %4406 = vmatpush3.msra.mxu1 %v5274_v14  ;;  %4371 = vmatprep.mubr.msk.f32.mxu0 %vm89_vm1, %v79_v12 }
  0x34   :  { %4386 = vmatmul.mubr.msk.f32.gmra.mxu1 %vm89_vm1, %v80_v15  ;;  %4391 = vmatpush3.msra.mxu0 %v5283_v16 }
  0x35   :  { %4407 = vmatprep.mubr.msk.f32.mxu1 %vm5154_vm2, %v5153_v6  ;;  %4392 = vmatprep.subr.mxu0 %v5153_v6 }
  0x36   :  { %4421 = vmatprep.subr.mxu1 %v5153_v6  ;;  %4372 = vmatmul.mubr.msk.f32.gmra.mxu0 %vm89_vm1, %v80_v15 }
  0x37   :  { %4393 = vmatpush3.msra.mxu0 %v5292_v17  ;;  %4396 = vmatprep.mubr.msk.f32.mxu0 %vm5154_vm2, %v5153_v6 }
  0x38   :  { %4408 = vmatmul.mubr.f32.vlgmr.msra.gmra.mxu1 %v5153_v6  ;;  %4394 = vmatprep.subr.mxu0 %v5153_v6 }
  0x39   :  { %4395 = vmatpush3.msra.mxu0 %v5297_v18  ;;  %4422 = vmatpush3.msra.mxu1 %v5231_v4 }
  0x3a   :  { %4397 = vmatmul.mubr.f32.vlgmr.msra.gmra.mxu0 %v5153_v6  ;;  %4423 = vmatprep.subr.mxu1 %v5153_v6 }
  0x3b   :  { %4424 = vmatpush3.msra.mxu1 %v5247_v8  ;;  %4410 = vmatprep.subr.mxu0 %v5153_v6 }
  0x3c   :  { %4425 = vmatprep.subr.mxu1 %v5153_v6  ;;  %4411 = vmatpush3.msra.mxu0 %v5268_v13 }
  0x3d   :  { %4426 = vmatpush3.msra.mxu1 %v5256_v10  ;;  %4412 = vmatprep.subr.mxu0 %v5153_v6 }
  0x3e   :  { %4427 = vmatprep.subr.mxu1 %v5153_v6  ;;  %4413 = vmatpush3.msra.mxu0 %v5283_v16 }
  0x3f   :  { %4428 = vmatpush3.msra.mxu1 %v5274_v14  ;;  %4429 = vmatprep.mubr.msk.f32.mxu1 %vm5154_vm2, %v5153_v6 }
  0x40   :  { %4414 = vmatprep.subr.mxu0 %v5153_v6  ;;  %4418 = vmatprep.mubr.msk.f32.mxu0 %vm5154_vm2, %v5153_v6 }
  0x41   :  { %4415 = vmatpush3.msra.mxu0 %v5292_v17  ;;  %4443 = vmatprep.subr.mxu1 %v5153_v6 }
  0x42   :  { %4416 = vmatprep.subr.mxu0 %v5153_v6 }
  0x43   :  { %4417 = vmatpush3.msra.mxu0 %v5297_v18 }
  0x44   :  { %4432 = vmatprep.subr.mxu0 %v5153_v6 }
  0xe7   :  { %v4378_v20 = vpop.f32.mrf.mxu1 }
  0xe8   :  { %v5330_v21 = vadd.f32 %v4378_v20, %v4040_v19 }
  0xe9   :  { %v306_v23 = vpop.f32.mrf.mxu1 }
  0xea   :  { %v5335_v24 = vadd.f32 %v4040_v19, %v306_v23  ;;  %v4364_v25 = vpop.f32.mrf.mxu0 }
  0xeb   :  { %v5337_v26 = vadd.f32 %v4364_v25, %v4028_v22  ;;  %v4381_v27 = vpop.f32.mrf.mxu1 }
  0xec   :  { %v5339_v28 = vadd.f32 %v4381_v27, %v4040_v19  ;;  %v184_v29 = vpop.f32.mrf.mxu0 }
  0xed   :  { %v316_v30 = vpop.f32.mrf.mxu1  ;;  %v185_v49 = vadd.f32 %v4028_v22, %v184_v29 }
  0xee   :  { %v5341_v31 = vadd.f32 %v4040_v19, %v316_v30  ;;  %v4367_v32 = vpop.f32.mrf.mxu0 }
  0xef   :  { %v5343_v33 = vadd.f32 %v4367_v32, %v4028_v22 }
  0xf0   :  { %v4384_v34 = vpop.f32.mrf.mxu1  ;;  %v194_v36 = vpop.f32.mrf.mxu0 }
  0xf1   :  { %v5345_v35 = vadd.f32 %v4384_v34, %v4040_v19  ;;  %v5347_v37 = vadd.f32 %v4028_v22, %v194_v36 }
  0xf2   :  { %v326_v38 = vpop.f32.mrf.mxu1  ;;  %v4370_v40 = vpop.f32.mrf.mxu0 }
  0xf3   :  { %v5349_v39 = vadd.f32 %v4040_v19, %v326_v38  ;;  %v5351_v41 = vadd.f32 %v4370_v40, %v4028_v22 }
  0xf4   :  { %v4387_v42 = vpop.f32.mrf.mxu1  ;;  %v204_v43 = vpop.f32.mrf.mxu0 }
  0xf5   :  { %v5353_v44 = vadd.f32 %v4028_v22, %v204_v43  ;;  %v342_v46 = vadd.f32 %v4387_v42, %v4040_v19 }
  0xf6   :  { %v336_v45 = vpop.f32.mrf.mxu1  ;;  %v4373_v48 = vpop.f32.mrf.mxu0 }
  0xf7   :  { %v5355_v47 = vadd.f32 %v4040_v19, %v336_v45  ;;  %v5357_v50 = vadd.f32 %v4373_v48, %v4028_v22 }
  0xf8   :  { %v515_v51 = vpop.f32.mrf.mxu1  ;;  %v214_v53 = vpop.f32.mrf.mxu0 }
  0xf9   :  { %v519_v52 = vadd.f32 %v515_v51, %v342_v46  ;;  %v5359_v54 = vadd.f32 %v4028_v22, %v214_v53 }
  0xfa   :  { %v4409_v55 = vpop.f32.mrf.mxu1  ;;  %v420_v56 = vpop.f32.mrf.mxu0 }
  0xfb   :  { %4828 = vtanh.f32 %v519_v52  ;;  %v424_v57 = vadd.f32 %v420_v56, %v185_v49  ;;  %v4051_v61 = vmul.f32 -1.442695, %v519_v52 }
  0xfc   :  { %v4398_v58 = vpop.f32.mrf.mxu0 }
  0xfd   :  { %4830 = vtanh.f32 %v424_v57  ;;  %v4050_v62 = vmul.f32 -1.442695, %v424_v57 }
  0xfe   :  { %4832 = vpow2.f32 %v4051_v61 }
  0xff   :  { %4834 = vpow2.f32 %v4050_v62 }
 0x108   :  { %v4829_v59 = vpop.eup %4828 }
 0x109   :  { %529 = vrot.lane.b32.xlu0 %v4829_v59, %s5155_s3 }
 0x10a   :  { %v4831_v60 = vpop.eup %4830 }
 0x10b   :  { %v4833_v63 = vpop.eup %4832 }
 0x10c   :  { %v523_v0 = vadd.f32 1.0, %v4833_v63  ;;  %v4835_v1 = vpop.eup %4834 }
 0x10d   :  { %434 = vrot.lane.b32.xlu0 %v4831_v60, %s5155_s3  ;;  %v428_v2 = vadd.f32 1.0, %v4835_v1 }
 0x10e   :  { %4836 = vrcp.f32 %v523_v0 }
 0x10f   :  { %4838 = vrcp.f32 %v428_v2 }
 0x11b   :  { %v4837_v3 = vpop.eup %4836 }
 0x11c   :  { %v4839_v9 = vpop.eup %4838  ;;  %v527_v15 = vmul.f32 0.0, %v4837_v3 }
 0x11d   :  { %v432_v22 = vmul.f32 0.0, %v4839_v9 }
 0x17b   :  { %v530_v5 = vpop.permute.xlu0 %529 }
 0x17c   :  { %v532_v7 = vmul.f32 %v4837_v3, %v530_v5 }
 0x17e   :  { %534 = vrot.lane.b32.xlu1 %v532_v7, %s5155_s3 }
 0x17f   :  { %v435_v11 = vpop.permute.xlu0 %434 }
 0x180   :  { %v437_v12 = vmul.f32 %v4839_v9, %v435_v11 }
 0x182   :  { %439 = vrot.lane.b32.xlu1 %v437_v12, %s5155_s3 }
 0x1f0   :  { %v535_v19 = vpop.permute.xlu1 %534 }
 0x1f1   :  { %v5365_v20 = vadd.f32 %v535_v19, %v527_v15 }
 0x1f3   :  { %4840 = vtanh.f32 %v5365_v20 }
 0x1f4   :  { %v440_v23 = vpop.permute.xlu1 %439 }
 0x1f5   :  { %v5368_v25 = vadd.f32 %v440_v23, %v432_v22 }
 0x1f7   :  { %4842 = vtanh.f32 %v5368_v25 }
 0x200   :  { %v4841_v27 = vpop.eup %4840 }
 0x201   :  { %540 = vrot.lane.b32.xlu0 %v4841_v27, %s5155_s3 }
 0x204   :  { %v4843_v29 = vpop.eup %4842 }
 0x205   :  { %445 = vrot.lane.b32.xlu1 %v4843_v29, %s5155_s3 }
 0x273   :  { %v541_v30 = vpop.permute.xlu0 %540 }
 0x274   :  { %v5373_v32 = vmul.f32 %v4837_v3, %v541_v30 }
 0x276   :  { %645 = vrot.lane.b32.xlu0 %v5373_v32, %s5156_s5 }
 0x277   :  { %v446_v34 = vpop.permute.xlu1 %445 }
 0x278   :  { %v448_v36 = vmul.f32 %v4839_v9, %v446_v34 }
 0x27a   :  { %545 = vrot.lane.b32.xlu1 %v448_v36, %s5156_s5 }
 0x2e8   :  { %v646_v38 = vpop.permute.xlu0 %645 }
 0x2e9   :  { %4430 = vmatmul.mubr.msk.f32.vlgmr.msra.gmra.mxu1 %vm350_vm3, %v646_v38 }
 0x2ea   :  { %4444 = vmatpush3.msra.mxu1 %v5231_v4  ;;  %4451 = vmatprep.mubr.msk.f32.mxu1 %vm5154_vm2, %v5153_v6 }
 0x2eb   :  { %4445 = vmatprep.subr.mxu1 %v5153_v6 }
 0x2ec   :  { %v5383_v40 = vpop.permute.xlu1 %545  ;;  %4446 = vmatpush3.msra.mxu1 %v5247_v8 }
 0x2ed   :  { %4419 = vmatmul.mubr.msk.f32.vlgmr.msra.gmra.mxu0 %vm350_vm3, %v5383_v40  ;;  %4447 = vmatprep.subr.mxu1 %v5153_v6 }
 0x2ee   :  { %4433 = vmatpush3.msra.mxu0 %v5268_v13  ;;  %4448 = vmatpush3.msra.mxu1 %v5256_v10 }
 0x2ef   :  { %4434 = vmatprep.subr.mxu0 %v5153_v6  ;;  %4449 = vmatprep.subr.mxu1 %v5153_v6 }
 0x2f0   :  { %4450 = vmatpush3.msra.mxu1 %v5274_v14  ;;  %4435 = vmatpush3.msra.mxu0 %v5283_v16 }
 0x2f1   :  { %4436 = vmatprep.subr.mxu0 %v5153_v6  ;;  %4440 = vmatprep.mubr.msk.f32.mxu0 %vm5154_vm2, %v5153_v6 }
 0x2f2   :  { %4437 = vmatpush3.msra.mxu0 %v5292_v17  ;;  %4465 = vmatprep.subr.mxu1 %v5153_v6 }
 0x2f3   :  { %4438 = vmatprep.subr.mxu0 %v5153_v6 }
 0x2f4   :  { %4439 = vmatpush3.msra.mxu0 %v5297_v18 }
 0x2f5   :  { %4454 = vmatprep.subr.mxu0 %v5153_v6 }
 0x3a9   :  { %v715_v42 = vpop.f32.mrf.mxu1 }
 0x3aa   :  { %v719_v43 = vadd.f32 %v715_v42, %v5355_v47 }
 0x3ab   :  { %v4431_v45 = vpop.f32.mrf.mxu1 }
 0x3ac   :  { %4844 = vtanh.f32 %v719_v43  ;;  %v4055_v53 = vmul.f32 -1.442695, %v719_v43 }
 0x3ad   :  { %v615_v46 = vpop.f32.mrf.mxu0 }
 0x3ae   :  { %v619_v48 = vadd.f32 %v615_v46, %v5337_v26 }
 0x3af   :  { %v4420_v49 = vpop.f32.mrf.mxu0 }
 0x3b0   :  { %4846 = vtanh.f32 %v619_v48  ;;  %v4053_v55 = vmul.f32 -1.442695, %v619_v48 }
 0x3b1   :  { %4848 = vpow2.f32 %v4055_v53 }
 0x3b2   :  { %4850 = vpow2.f32 %v4053_v55 }
 0x3b9   :  { %v4845_v51 = vpop.eup %4844 }
 0x3ba   :  { %729 = vrot.lane.b32.xlu0 %v4845_v51, %s5155_s3 }
 0x3bd   :  { %v4847_v52 = vpop.eup %4846 }
 0x3be   :  { %629 = vrot.lane.b32.xlu1 %v4847_v52, %s5155_s3  ;;  %v4849_v56 = vpop.eup %4848 }
 0x3bf   :  { %v723_v57 = vadd.f32 1.0, %v4849_v56  ;;  %v4851_v47 = vpop.eup %4850 }
 0x3c0   :  { %v623_v58 = vadd.f32 1.0, %v4851_v47 }
 0x3c1   :  { %4852 = vrcp.f32 %v723_v57 }
 0x3c2   :  { %4854 = vrcp.f32 %v623_v58 }
 0x3ce   :  { %v4853_v59 = vpop.eup %4852 }
 0x3cf   :  { %v4855_v61 = vpop.eup %4854  ;;  %v727_v0 = vmul.f32 %v4853_v59, %v5365_v20 }
 0x3d0   :  { %v627_v3 = vmul.f32 %v4855_v61, %v5368_v25 }
 0x42c   :  { %v730_v26 = vpop.permute.xlu0 %729 }
 0x42d   :  { %v732_v60 = vmul.f32 %v4853_v59, %v730_v26 }
 0x42f   :  { %734 = vrot.lane.b32.xlu0 %v732_v60, %s5155_s3 }
 0x430   :  { %v630_v62 = vpop.permute.xlu1 %629 }
 0x431   :  { %v632_v63 = vmul.f32 %v4855_v61, %v630_v62 }
 0x433   :  { %634 = vrot.lane.b32.xlu1 %v632_v63, %s5155_s3 }
 0x4a1   :  { %v735_v1 = vpop.permute.xlu0 %734 }
 0x4a2   :  { %v5410_v2 = vadd.f32 %v735_v1, %v727_v0 }
 0x4a4   :  { %4856 = vtanh.f32 %v5410_v2 }
 0x4a5   :  { %v635_v5 = vpop.permute.xlu1 %634 }
 0x4a6   :  { %v5414_v7 = vadd.f32 %v635_v5, %v627_v3 }
 0x4a8   :  { %4858 = vtanh.f32 %v5414_v7 }
 0x4b1   :  { %v4857_v9 = vpop.eup %4856 }
 0x4b2   :  { %740 = vrot.lane.b32.xlu0 %v4857_v9, %s5155_s3 }
 0x4b5   :  { %v4859_v11 = vpop.eup %4858 }
 0x4b6   :  { %640 = vrot.lane.b32.xlu1 %v4859_v11, %s5155_s3 }
 0x524   :  { %v741_v12 = vpop.permute.xlu0 %740 }
 0x525   :  { %v5419_v15 = vmul.f32 %v4853_v59, %v741_v12 }
 0x527   :  { %845 = vrot.lane.b32.xlu0 %v5419_v15, %s5156_s5 }
 0x528   :  { %v641_v19 = vpop.permute.xlu1 %640 }
 0x529   :  { %v643_v20 = vmul.f32 %v4855_v61, %v641_v19 }
 0x52b   :  { %745 = vrot.lane.b32.xlu1 %v643_v20, %s5156_s5 }
 0x599   :  { %v846_v22 = vpop.permute.xlu0 %845 }
 0x59a   :  { %4452 = vmatmul.mubr.msk.f32.vlgmr.msra.gmra.mxu1 %vm350_vm3, %v846_v22 }
 0x59b   :  { %4466 = vmatpush3.msra.mxu1 %v5231_v4  ;;  %4473 = vmatprep.mubr.msk.f32.mxu1 %vm5154_vm2, %v5153_v6 }
 0x59c   :  { %4467 = vmatprep.subr.mxu1 %v5153_v6 }
 0x59d   :  { %v5429_v23 = vpop.permute.xlu1 %745  ;;  %4468 = vmatpush3.msra.mxu1 %v5247_v8 }
 0x59e   :  { %4441 = vmatmul.mubr.msk.f32.vlgmr.msra.gmra.mxu0 %vm350_vm3, %v5429_v23  ;;  %4469 = vmatprep.subr.mxu1 %v5153_v6 }
 0x59f   :  { %4455 = vmatpush3.msra.mxu0 %v5268_v13  ;;  %4470 = vmatpush3.msra.mxu1 %v5256_v10 }
 0x5a0   :  { %4456 = vmatprep.subr.mxu0 %v5153_v6  ;;  %4471 = vmatprep.subr.mxu1 %v5153_v6 }
 0x5a1   :  { %4472 = vmatpush3.msra.mxu1 %v5274_v14  ;;  %4457 = vmatpush3.msra.mxu0 %v5283_v16 }
 0x5a2   :  { %4458 = vmatprep.subr.mxu0 %v5153_v6  ;;  %4462 = vmatprep.mubr.msk.f32.mxu0 %vm5154_vm2, %v5153_v6 }
 0x5a3   :  { %4459 = vmatpush3.msra.mxu0 %v5292_v17  ;;  %4487 = vmatprep.subr.mxu1 %v5153_v6 }
 0x5a4   :  { %4460 = vmatprep.subr.mxu0 %v5153_v6 }
 0x5a5   :  { %4461 = vmatpush3.msra.mxu0 %v5297_v18 }
 0x5a6   :  { %4476 = vmatprep.subr.mxu0 %v5153_v6 }
 0x65a   :  { %v915_v25 = vpop.f32.mrf.mxu1 }
 0x65b   :  { %v919_v27 = vadd.f32 %v915_v25, %v5345_v35 }
 0x65c   :  { %v4453_v29 = vpop.f32.mrf.mxu1 }
 0x65d   :  { %4860 = vtanh.f32 %v919_v27  ;;  %v4059_v43 = vmul.f32 -1.442695, %v919_v27 }
 0x65e   :  { %v815_v30 = vpop.f32.mrf.mxu0 }
 0x65f   :  { %v819_v34 = vadd.f32 %v815_v30, %v5347_v37 }
 0x660   :  { %v4442_v36 = vpop.f32.mrf.mxu0 }
 0x661   :  { %4862 = vtanh.f32 %v819_v34  ;;  %v4057_v45 = vmul.f32 -1.442695, %v819_v34 }
 0x662   :  { %4864 = vpow2.f32 %v4059_v43 }
 0x663   :  { %4866 = vpow2.f32 %v4057_v45 }
 0x66a   :  { %v4861_v38 = vpop.eup %4860 }
 0x66b   :  { %929 = vrot.lane.b32.xlu0 %v4861_v38, %s5155_s3 }
 0x66e   :  { %v4863_v42 = vpop.eup %4862 }
 0x66f   :  { %829 = vrot.lane.b32.xlu1 %v4863_v42, %s5155_s3  ;;  %v4865_v46 = vpop.eup %4864 }
 0x670   :  { %v923_v48 = vadd.f32 1.0, %v4865_v46  ;;  %v4867_v35 = vpop.eup %4866 }
 0x671   :  { %v823_v49 = vadd.f32 1.0, %v4867_v35 }
 0x672   :  { %4868 = vrcp.f32 %v923_v48 }
 0x673   :  { %4870 = vrcp.f32 %v823_v49 }
 0x67f   :  { %v4869_v51 = vpop.eup %4868 }
 0x680   :  { %v4871_v53 = vpop.eup %4870  ;;  %v927_v57 = vmul.f32 %v4869_v51, %v5410_v2 }
 0x681   :  { %v827_v59 = vmul.f32 %v4871_v53, %v5414_v7 }
 0x6dd   :  { %v930_v37 = vpop.permute.xlu0 %929 }
 0x6de   :  { %v932_v52 = vmul.f32 %v4869_v51, %v930_v37 }
 0x6e0   :  { %934 = vrot.lane.b32.xlu0 %v932_v52, %s5155_s3 }
 0x6e1   :  { %v830_v55 = vpop.permute.xlu1 %829 }
 0x6e2   :  { %v832_v56 = vmul.f32 %v4871_v53, %v830_v55 }
 0x6e4   :  { %834 = vrot.lane.b32.xlu1 %v832_v56, %s5155_s3 }
 0x752   :  { %v935_v47 = vpop.permute.xlu0 %934 }
 0x753   :  { %v5456_v58 = vadd.f32 %v935_v47, %v927_v57 }
 0x755   :  { %4872 = vtanh.f32 %v5456_v58 }
 0x756   :  { %v835_v26 = vpop.permute.xlu1 %834 }
 0x757   :  { %v5460_v60 = vadd.f32 %v835_v26, %v827_v59 }
 0x759   :  { %4874 = vtanh.f32 %v5460_v60 }
 0x762   :  { %v4873_v61 = vpop.eup %4872 }
 0x763   :  { %940 = vrot.lane.b32.xlu0 %v4873_v61, %s5155_s3 }
 0x766   :  { %v4875_v62 = vpop.eup %4874 }
 0x767   :  { %840 = vrot.lane.b32.xlu1 %v4875_v62, %s5155_s3 }
 0x7d5   :  { %v941_v63 = vpop.permute.xlu0 %940 }
 0x7d6   :  { %v5465_v0 = vmul.f32 %v4869_v51, %v941_v63 }
 0x7d8   :  { %1045 = vrot.lane.b32.xlu0 %v5465_v0, %s5156_s5 }
 0x7d9   :  { %v841_v1 = vpop.permute.xlu1 %840 }
 0x7da   :  { %v843_v2 = vmul.f32 %v4871_v53, %v841_v1 }
 0x7dc   :  { %945 = vrot.lane.b32.xlu1 %v843_v2, %s5156_s5 }
 0x84a   :  { %v1046_v3 = vpop.permute.xlu0 %1045 }
 0x84b   :  { %4474 = vmatmul.mubr.msk.f32.vlgmr.msra.gmra.mxu1 %vm350_vm3, %v1046_v3 }
 0x84c   :  { %4488 = vmatpush3.msra.mxu1 %v5231_v4  ;;  %4495 = vmatprep.mubr.msk.f32.mxu1 %vm5154_vm2, %v5153_v6 }
 0x84d   :  { %4489 = vmatprep.subr.mxu1 %v5153_v6 }
 0x84e   :  { %v5475_v5 = vpop.permute.xlu1 %945  ;;  %4490 = vmatpush3.msra.mxu1 %v5247_v8 }
 0x84f   :  { %4463 = vmatmul.mubr.msk.f32.vlgmr.msra.gmra.mxu0 %vm350_vm3, %v5475_v5  ;;  %4491 = vmatprep.subr.mxu1 %v5153_v6 }
 0x850   :  { %4477 = vmatpush3.msra.mxu0 %v5268_v13  ;;  %4492 = vmatpush3.msra.mxu1 %v5256_v10 }
 0x851   :  { %4478 = vmatprep.subr.mxu0 %v5153_v6  ;;  %4493 = vmatprep.subr.mxu1 %v5153_v6 }
 0x852   :  { %4494 = vmatpush3.msra.mxu1 %v5274_v14  ;;  %4479 = vmatpush3.msra.mxu0 %v5283_v16 }
 0x853   :  { %4480 = vmatprep.subr.mxu0 %v5153_v6  ;;  %4484 = vmatprep.mubr.msk.f32.mxu0 %vm5154_vm2, %v5153_v6 }
 0x854   :  { %4481 = vmatpush3.msra.mxu0 %v5292_v17  ;;  %4509 = vmatprep.subr.mxu1 %v5153_v6 }
 0x855   :  { %4482 = vmatprep.subr.mxu0 %v5153_v6 }
 0x856   :  { %4483 = vmatpush3.msra.mxu0 %v5297_v18 }
 0x857   :  { %4498 = vmatprep.subr.mxu0 %v5153_v6 }
 0x90b   :  { %v1115_v7 = vpop.f32.mrf.mxu1 }
 0x90c   :  { %v1119_v9 = vadd.f32 %v1115_v7, %v5349_v39 }
 0x90d   :  { %v4475_v11 = vpop.f32.mrf.mxu1 }
 0x90e   :  { %4876 = vtanh.f32 %v1119_v9  ;;  %v4063_v27 = vmul.f32 -1.442695, %v1119_v9 }
 0x90f   :  { %v1015_v12 = vpop.f32.mrf.mxu0 }
 0x910   :  { %v1019_v19 = vadd.f32 %v1015_v12, %v5343_v33 }
 0x911   :  { %v4464_v20 = vpop.f32.mrf.mxu0 }
 0x912   :  { %4878 = vtanh.f32 %v1019_v19  ;;  %v4061_v29 = vmul.f32 -1.442695, %v1019_v19 }
 0x913   :  { %4880 = vpow2.f32 %v4063_v27 }
 0x914   :  { %4882 = vpow2.f32 %v4061_v29 }
 0x91b   :  { %v4877_v22 = vpop.eup %4876 }
 0x91c   :  { %1129 = vrot.lane.b32.xlu0 %v4877_v22, %s5155_s3 }
 0x91f   :  { %v4879_v25 = vpop.eup %4878 }
 0x920   :  { %1029 = vrot.lane.b32.xlu1 %v4879_v25, %s5155_s3  ;;  %v4881_v30 = vpop.eup %4880 }
 0x921   :  { %v1123_v34 = vadd.f32 1.0, %v4881_v30  ;;  %v4883_v39 = vpop.eup %4882 }
 0x922   :  { %v1023_v36 = vadd.f32 1.0, %v4883_v39 }
 0x923   :  { %4884 = vrcp.f32 %v1123_v34 }
 0x924   :  { %4886 = vrcp.f32 %v1023_v36 }
 0x930   :  { %v4885_v38 = vpop.eup %4884 }
 0x931   :  { %v4887_v43 = vpop.eup %4886  ;;  %v1127_v48 = vmul.f32 %v4885_v38, %v5456_v58 }
 0x932   :  { %v1027_v51 = vmul.f32 %v4887_v43, %v5460_v60 }
 0x98e   :  { %v1130_v33 = vpop.permute.xlu0 %1129 }
 0x98f   :  { %v1132_v42 = vmul.f32 %v4885_v38, %v1130_v33 }
 0x991   :  { %1134 = vrot.lane.b32.xlu0 %v1132_v42, %s5155_s3 }
 0x992   :  { %v1030_v45 = vpop.permute.xlu1 %1029 }
 0x993   :  { %v1032_v46 = vmul.f32 %v4887_v43, %v1030_v45 }
 0x995   :  { %1034 = vrot.lane.b32.xlu1 %v1032_v46, %s5155_s3 }
 0xa03   :  { %v1135_v35 = vpop.permute.xlu0 %1134 }
 0xa04   :  { %v5502_v49 = vadd.f32 %v1135_v35, %v1127_v48 }
 0xa06   :  { %4888 = vtanh.f32 %v5502_v49 }
 0xa07   :  { %v1035_v37 = vpop.permute.xlu1 %1034 }
 0xa08   :  { %v5506_v52 = vadd.f32 %v1035_v37, %v1027_v51 }
 0xa0a   :  { %4890 = vtanh.f32 %v5506_v52 }
 0xa13   :  { %v4889_v53 = vpop.eup %4888 }
 0xa14   :  { %1140 = vrot.lane.b32.xlu0 %v4889_v53, %s5155_s3 }
 0xa17   :  { %v4891_v55 = vpop.eup %4890 }
 0xa18   :  { %1040 = vrot.lane.b32.xlu1 %v4891_v55, %s5155_s3 }
 0xa86   :  { %v1141_v56 = vpop.permute.xlu0 %1140 }
 0xa87   :  { %v5511_v57 = vmul.f32 %v4885_v38, %v1141_v56 }
 0xa89   :  { %1245 = vrot.lane.b32.xlu0 %v5511_v57, %s5156_s5 }
 0xa8a   :  { %v1041_v47 = vpop.permute.xlu1 %1040 }
 0xa8b   :  { %v1043_v58 = vmul.f32 %v4887_v43, %v1041_v47 }
 0xa8d   :  { %1145 = vrot.lane.b32.xlu1 %v1043_v58, %s5156_s5 }
 0xafb   :  { %v1246_v59 = vpop.permute.xlu0 %1245 }
 0xafc   :  { %4496 = vmatmul.mubr.msk.f32.vlgmr.msra.gmra.mxu1 %vm350_vm3, %v1246_v59 }
 0xafd   :  { %4510 = vmatpush3.msra.mxu1 %v5231_v4  ;;  %4517 = vmatprep.mubr.msk.f32.mxu1 %vm5154_vm2, %v5153_v6 }
 0xafe   :  { %4511 = vmatprep.subr.mxu1 %v5153_v6 }
 0xaff   :  { %v5521_v26 = vpop.permute.xlu1 %1145  ;;  %4512 = vmatpush3.msra.mxu1 %v5247_v8 }
 0xb00   :  { %4485 = vmatmul.mubr.msk.f32.vlgmr.msra.gmra.mxu0 %vm350_vm3, %v5521_v26  ;;  %4513 = vmatprep.subr.mxu1 %v5153_v6 }
 0xb01   :  { %4499 = vmatpush3.msra.mxu0 %v5268_v13  ;;  %4514 = vmatpush3.msra.mxu1 %v5256_v10 }
 0xb02   :  { %4500 = vmatprep.subr.mxu0 %v5153_v6  ;;  %4515 = vmatprep.subr.mxu1 %v5153_v6 }
 0xb03   :  { %4516 = vmatpush3.msra.mxu1 %v5274_v14  ;;  %4501 = vmatpush3.msra.mxu0 %v5283_v16 }
 0xb04   :  { %4502 = vmatprep.subr.mxu0 %v5153_v6  ;;  %4506 = vmatprep.mubr.msk.f32.mxu0 %vm5154_vm2, %v5153_v6 }
 0xb05   :  { %4503 = vmatpush3.msra.mxu0 %v5292_v17  ;;  %4531 = vmatprep.subr.mxu1 %v5153_v6 }
 0xb06   :  { %4504 = vmatprep.subr.mxu0 %v5153_v6 }
 0xb07   :  { %4505 = vmatpush3.msra.mxu0 %v5297_v18 }
 0xb08   :  { %4520 = vmatprep.subr.mxu0 %v5153_v6 }
 0xbbc   :  { %v1315_v60 = vpop.f32.mrf.mxu1 }
 0xbbd   :  { %v1319_v61 = vadd.f32 %v1315_v60, %v5339_v28 }
 0xbbe   :  { %v4497_v62 = vpop.f32.mrf.mxu1 }
 0xbbf   :  { %4892 = vtanh.f32 %v1319_v61  ;;  %v4067_v9 = vmul.f32 -1.442695, %v1319_v61 }
 0xbc0   :  { %v1215_v63 = vpop.f32.mrf.mxu0 }
 0xbc1   :  { %v1219_v1 = vadd.f32 %v1215_v63, %v5353_v44 }
 0xbc2   :  { %v4486_v2 = vpop.f32.mrf.mxu0 }
 0xbc3   :  { %4894 = vtanh.f32 %v1219_v1  ;;  %v4065_v11 = vmul.f32 -1.442695, %v1219_v1 }
 0xbc4   :  { %4896 = vpow2.f32 %v4067_v9 }
 0xbc5   :  { %4898 = vpow2.f32 %v4065_v11 }
 0xbcc   :  { %v4893_v3 = vpop.eup %4892 }
 0xbcd   :  { %1329 = vrot.lane.b32.xlu0 %v4893_v3, %s5155_s3 }
 0xbd0   :  { %v4895_v7 = vpop.eup %4894 }
 0xbd1   :  { %1229 = vrot.lane.b32.xlu1 %v4895_v7, %s5155_s3  ;;  %v4897_v12 = vpop.eup %4896 }
 0xbd2   :  { %v1323_v19 = vadd.f32 1.0, %v4897_v12  ;;  %v4899_v28 = vpop.eup %4898 }
 0xbd3   :  { %v1223_v20 = vadd.f32 1.0, %v4899_v28 }
 0xbd4   :  { %4900 = vrcp.f32 %v1323_v19 }
 0xbd5   :  { %4902 = vrcp.f32 %v1223_v20 }
 0xbe1   :  { %v4901_v22 = vpop.eup %4900 }
 0xbe2   :  { %v4903_v27 = vpop.eup %4902  ;;  %v1327_v34 = vmul.f32 %v4901_v22, %v5502_v49 }
 0xbe3   :  { %v1227_v38 = vmul.f32 %v4903_v27, %v5506_v52 }
 0xc3f   :  { %v1330_v44 = vpop.permute.xlu0 %1329 }
 0xc40   :  { %v1332_v25 = vmul.f32 %v4901_v22, %v1330_v44 }
 0xc42   :  { %1334 = vrot.lane.b32.xlu0 %v1332_v25, %s5155_s3 }
 0xc43   :  { %v1230_v29 = vpop.permute.xlu1 %1229 }
 0xc44   :  { %v1232_v30 = vmul.f32 %v4903_v27, %v1230_v29 }
 0xc46   :  { %1234 = vrot.lane.b32.xlu1 %v1232_v30, %s5155_s3 }
 0xcb4   :  { %v1335_v39 = vpop.permute.xlu0 %1334 }
 0xcb5   :  { %v5548_v36 = vadd.f32 %v1335_v39, %v1327_v34 }
 0xcb7   :  { %4904 = vtanh.f32 %v5548_v36 }
 0xcb8   :  { %v1235_v33 = vpop.permute.xlu1 %1234 }
 0xcb9   :  { %v5552_v42 = vadd.f32 %v1235_v33, %v1227_v38 }
 0xcbb   :  { %4906 = vtanh.f32 %v5552_v42 }
 0xcc4   :  { %v4905_v43 = vpop.eup %4904 }
 0xcc5   :  { %1340 = vrot.lane.b32.xlu0 %v4905_v43, %s5155_s3 }
 0xcc8   :  { %v4907_v45 = vpop.eup %4906 }
 0xcc9   :  { %1240 = vrot.lane.b32.xlu1 %v4907_v45, %s5155_s3 }
 0xd37   :  { %v1341_v46 = vpop.permute.xlu0 %1340 }
 0xd38   :  { %v5557_v48 = vmul.f32 %v4901_v22, %v1341_v46 }
 0xd3a   :  { %1445 = vrot.lane.b32.xlu0 %v5557_v48, %s5156_s5 }
 0xd3b   :  { %v1241_v35 = vpop.permute.xlu1 %1240 }
 0xd3c   :  { %v1243_v49 = vmul.f32 %v4903_v27, %v1241_v35 }
 0xd3e   :  { %1345 = vrot.lane.b32.xlu1 %v1243_v49, %s5156_s5 }
 0xdac   :  { %v1446_v51 = vpop.permute.xlu0 %1445 }
 0xdad   :  { %4518 = vmatmul.mubr.msk.f32.vlgmr.msra.gmra.mxu1 %vm350_vm3, %v1446_v51 }
 0xdae   :  { %4532 = vmatpush3.msra.mxu1 %v5231_v4  ;;  %4539 = vmatprep.mubr.msk.f32.mxu1 %vm5154_vm2, %v5153_v6 }
 0xdaf   :  { %4533 = vmatprep.subr.mxu1 %v5153_v6 }
 0xdb0   :  { %v5567_v37 = vpop.permute.xlu1 %1345  ;;  %4534 = vmatpush3.msra.mxu1 %v5247_v8 }
 0xdb1   :  { %4507 = vmatmul.mubr.msk.f32.vlgmr.msra.gmra.mxu0 %vm350_vm3, %v5567_v37  ;;  %4535 = vmatprep.subr.mxu1 %v5153_v6 }
 0xdb2   :  { %4521 = vmatpush3.msra.mxu0 %v5268_v13  ;;  %4536 = vmatpush3.msra.mxu1 %v5256_v10 }
 0xdb3   :  { %4522 = vmatprep.subr.mxu0 %v5153_v6  ;;  %4537 = vmatprep.subr.mxu1 %v5153_v6 }
 0xdb4   :  { %4538 = vmatpush3.msra.mxu1 %v5274_v14  ;;  %4523 = vmatpush3.msra.mxu0 %v5283_v16 }
 0xdb5   :  { %4524 = vmatprep.subr.mxu0 %v5153_v6  ;;  %4528 = vmatprep.mubr.msk.f32.mxu0 %vm5154_vm2, %v5153_v6 }
 0xdb6   :  { %4525 = vmatpush3.msra.mxu0 %v5292_v17  ;;  %4553 = vmatprep.subr.mxu1 %v5153_v6 }
 0xdb7   :  { %4526 = vmatprep.subr.mxu0 %v5153_v6 }
 0xdb8   :  { %4527 = vmatpush3.msra.mxu0 %v5297_v18 }
 0xdb9   :  { %4542 = vmatprep.subr.mxu0 %v5153_v6 }
 0xe6d   :  { %v1515_v52 = vpop.f32.mrf.mxu1 }
 0xe6e   :  { %v1519_v53 = vadd.f32 %v1515_v52, %v5341_v31 }
 0xe6f   :  { %v4519_v55 = vpop.f32.mrf.mxu1 }
 0xe70   :  { %4908 = vtanh.f32 %v1519_v53  ;;  %v4071_v61 = vmul.f32 -1.442695, %v1519_v53 }
 0xe71   :  { %v1415_v56 = vpop.f32.mrf.mxu0 }
 0xe72   :  { %v1419_v47 = vadd.f32 %v1415_v56, %v5351_v41 }
 0xe73   :  { %v4508_v58 = vpop.f32.mrf.mxu0 }
 0xe74   :  { %4910 = vtanh.f32 %v1419_v47  ;;  %v4069_v62 = vmul.f32 -1.442695, %v1419_v47 }
 0xe75   :  { %4912 = vpow2.f32 %v4071_v61 }
 0xe76   :  { %4914 = vpow2.f32 %v4069_v62 }
 0xe7d   :  { %v4909_v59 = vpop.eup %4908 }
 0xe7e   :  { %1529 = vrot.lane.b32.xlu0 %v4909_v59, %s5155_s3 }
 0xe81   :  { %v4911_v60 = vpop.eup %4910 }
 0xe82   :  { %1429 = vrot.lane.b32.xlu1 %v4911_v60, %s5155_s3  ;;  %v4913_v63 = vpop.eup %4912 }
 0xe83   :  { %v1523_v1 = vadd.f32 1.0, %v4913_v63  ;;  %v4915_v31 = vpop.eup %4914 }
 0xe84   :  { %v1423_v2 = vadd.f32 1.0, %v4915_v31 }
 0xe85   :  { %4916 = vrcp.f32 %v1523_v1 }
 0xe86   :  { %4918 = vrcp.f32 %v1423_v2 }
 0xe92   :  { %v4917_v3 = vpop.eup %4916 }
 0xe93   :  { %v4919_v9 = vpop.eup %4918  ;;  %v1527_v19 = vmul.f32 %v4917_v3, %v5548_v36 }
 0xe94   :  { %v1427_v22 = vmul.f32 %v4919_v9, %v5552_v42 }
 0xef0   :  { %v1530_v41 = vpop.permute.xlu0 %1529 }
 0xef1   :  { %v1532_v7 = vmul.f32 %v4917_v3, %v1530_v41 }
 0xef3   :  { %1534 = vrot.lane.b32.xlu0 %v1532_v7, %s5155_s3 }
 0xef4   :  { %v1430_v11 = vpop.permute.xlu1 %1429 }
 0xef5   :  { %v1432_v12 = vmul.f32 %v4919_v9, %v1430_v11 }
 0xef7   :  { %1434 = vrot.lane.b32.xlu1 %v1432_v12, %s5155_s3 }
 0xf65   :  { %v1535_v28 = vpop.permute.xlu0 %1534 }
 0xf66   :  { %v5594_v20 = vadd.f32 %v1535_v28, %v1527_v19 }
 0xf68   :  { %4920 = vtanh.f32 %v5594_v20 }
 0xf69   :  { %v1435_v44 = vpop.permute.xlu1 %1434 }
 0xf6a   :  { %v5598_v25 = vadd.f32 %v1435_v44, %v1427_v22 }
 0xf6c   :  { %4922 = vtanh.f32 %v5598_v25 }
 0xf75   :  { %v4921_v27 = vpop.eup %4920 }
 0xf76   :  { %1540 = vrot.lane.b32.xlu0 %v4921_v27, %s5155_s3 }
 0xf79   :  { %v4923_v29 = vpop.eup %4922 }
 0xf7a   :  { %1440 = vrot.lane.b32.xlu1 %v4923_v29, %s5155_s3 }
 0xfe8   :  { %v1541_v30 = vpop.permute.xlu0 %1540 }
 0xfe9   :  { %v5603_v34 = vmul.f32 %v4917_v3, %v1541_v30 }
 0xfeb   :  { %1645 = vrot.lane.b32.xlu0 %v5603_v34, %s5156_s5 }
 0xfec   :  { %v1441_v39 = vpop.permute.xlu1 %1440 }
 0xfed   :  { %v1443_v36 = vmul.f32 %v4919_v9, %v1441_v39 }
 0xfef   :  { %1545 = vrot.lane.b32.xlu1 %v1443_v36, %s5156_s5 }
0x105d   :  { %v1646_v38 = vpop.permute.xlu0 %1645 }
0x105e   :  { %4540 = vmatmul.mubr.msk.f32.vlgmr.msra.gmra.mxu1 %vm350_vm3, %v1646_v38 }
0x105f   :  { %4554 = vmatpush3.msra.mxu1 %v5231_v4  ;;  %4561 = vmatprep.mubr.msk.f32.mxu1 %vm5154_vm2, %v5153_v6 }
0x1060   :  { %4555 = vmatprep.subr.mxu1 %v5153_v6 }
0x1061   :  { %v5613_v33 = vpop.permute.xlu1 %1545  ;;  %4556 = vmatpush3.msra.mxu1 %v5247_v8 }
0x1062   :  { %4529 = vmatmul.mubr.msk.f32.vlgmr.msra.gmra.mxu0 %vm350_vm3, %v5613_v33  ;;  %4557 = vmatprep.subr.mxu1 %v5153_v6 }
0x1063   :  { %4543 = vmatpush3.msra.mxu0 %v5268_v13  ;;  %4558 = vmatpush3.msra.mxu1 %v5256_v10 }
0x1064   :  { %4544 = vmatprep.subr.mxu0 %v5153_v6  ;;  %4559 = vmatprep.subr.mxu1 %v5153_v6 }
0x1065   :  { %4560 = vmatpush3.msra.mxu1 %v5274_v14  ;;  %4545 = vmatpush3.msra.mxu0 %v5283_v16 }
0x1066   :  { %4546 = vmatprep.subr.mxu0 %v5153_v6  ;;  %4550 = vmatprep.mubr.msk.f32.mxu0 %vm5154_vm2, %v5153_v6 }
0x1067   :  { %4547 = vmatpush3.msra.mxu0 %v5292_v17 }
0x1068   :  { %4548 = vmatprep.subr.mxu0 %v5153_v6 }
0x1069   :  { %4549 = vmatpush3.msra.mxu0 %v5297_v18 }
0x111e   :  { %v1715_v4 = vpop.f32.mrf.mxu1 }
0x111f   :  { %v1719_v8 = vadd.f32 %v1715_v4, %v5330_v21 }
0x1120   :  { %v4541_v10 = vpop.f32.mrf.mxu1 }
0x1121   :  { %4924 = vtanh.f32 %v1719_v8  ;;  %v4075_v17 = vmul.f32 -1.442695, %v1719_v8 }
0x1122   :  { %v1615_v13 = vpop.f32.mrf.mxu0 }
0x1123   :  { %v1619_v14 = vadd.f32 %v1615_v13, %v5359_v54 }
0x1124   :  { %v4530_v16 = vpop.f32.mrf.mxu0 }
0x1125   :  { %4926 = vtanh.f32 %v1619_v14  ;;  %v4073_v45 = vmul.f32 -1.442695, %v1619_v14 }
0x1126   :  { %4928 = vpow2.f32 %v4075_v17 }
0x1127   :  { %4930 = vpow2.f32 %v4073_v45 }
0x112e   :  { %v4925_v42 = vpop.eup %4924 }
0x112f   :  { %1729 = vrot.lane.b32.xlu0 %v4925_v42, %s5155_s3 }
0x1132   :  { %v4927_v43 = vpop.eup %4926 }
0x1133   :  { %1629 = vrot.lane.b32.xlu1 %v4927_v43, %s5155_s3  ;;  %v4929_v18 = vpop.eup %4928 }
0x1134   :  { %v1723_v46 = vadd.f32 1.0, %v4929_v18  ;;  %v4931_v21 = vpop.eup %4930 }
0x1135   :  { %v1623_v35 = vadd.f32 1.0, %v4931_v21  ;;  %v4096_v21 = vld [vmem:[%s6136_s4 + $0x78] sm:$0xff] }
0x1136   :  { %4932 = vrcp.f32 %v1723_v46  ;;  %v1995_v46 = vld [vmem:[%s6136_s4 + $0x38] sm:$0xff]  ;;  %4592 = vmatprep.subr.mxu1 %v4096_v21 }
0x1137   :  { %4934 = vrcp.f32 %v1623_v35  ;;  %v1994_v35 = vld [vmem:[%s6136_s4 + $0x30] sm:$0xff]  ;;  %4564 = vmatprep.subr.mxu0 %v1995_v46 }
0x1143   :  { %v4933_v49 = vpop.eup %4932 }
0x1144   :  { %v4935_v52 = vpop.eup %4934  ;;  %v1727_v56 = vmul.f32 %v4933_v49, %v5594_v20 }
0x1145   :  { %v1627_v59 = vmul.f32 %v4935_v52, %v5598_v25 }
0x11a1   :  { %v1730_v54 = vpop.permute.xlu0 %1729 }
0x11a2   :  { %v1732_v51 = vmul.f32 %v4933_v49, %v1730_v54  ;;  %v1993_v54 = vld [vmem:[%s6136_s4 + $0x28] sm:$0xff] }
0x11a4   :  { %1734 = vrot.lane.b32.xlu0 %v1732_v51, %s5155_s3  ;;  %v4094_v51 = vld [vmem:[%s6136_s4 + $0x68] sm:$0xff] }
0x11a5   :  { %v1630_v53 = vpop.permute.xlu1 %1629 }
0x11a6   :  { %v1632_v55 = vmul.f32 %v4935_v52, %v1630_v53  ;;  %v4093_v53 = vld [vmem:[%s6136_s4 + $0x60] sm:$0xff] }
0x11a8   :  { %1634 = vrot.lane.b32.xlu1 %v1632_v55, %s5155_s3  ;;  %v1991_v55 = vld [vmem:[%s6136_s4 + $0x18] sm:$0xff] }
0x1216   :  { %v1735_v47 = vpop.permute.xlu0 %1734 }
0x1217   :  { %v1737_v58 = vadd.f32 %v1735_v47, %v1727_v56  ;;  %v4092_v56 = vld [vmem:[%s6136_s4 + $0x58] sm:$0xff]  ;;  %v1990_v47 = vld [vmem:[%s6136_s4 + $0x10] sm:$0xff] }
0x1219   :  { %4936 = vtanh.f32 %v1737_v58 }
0x121a   :  { %v1635_v60 = vpop.permute.xlu1 %1634 }
0x121b   :  { %v1637_v61 = vadd.f32 %v1635_v60, %v1627_v59  ;;  %v4090_v59 = vld [vmem:[%s6136_s4 + $0x48] sm:$0xff]  ;;  %v4089_v60 = vld [vmem:[%s6136_s4 + $0x40] sm:$0xff] }
0x121d   :  { %4938 = vtanh.f32 %v1637_v61 }
0x1226   :  { %v4937_v62 = vpop.eup %4936 }
0x1227   :  { %1740 = vrot.lane.b32.xlu0 %v4937_v62, %s5155_s3 }
0x122a   :  { %v4939_v63 = vpop.eup %4938 }
0x122b   :  { %1640 = vrot.lane.b32.xlu1 %v4939_v63, %s5155_s3 }
0x1299   :  { %v1741_v1 = vpop.permute.xlu0 %1740 }
0x129a   :  { %v1743_v31 = vmul.f32 %v4933_v49, %v1741_v1  ;;  %v4095_v49 = vld [vmem:[%s6136_s4 + $0x70] sm:$0xff] }
0x129c   :  { %1845 = vrot.lane.b32.xlu0 %v1743_v31, %s5156_s5 }
0x129d   :  { %v1641_v2 = vpop.permute.xlu1 %1640 }
0x129e   :  { %v1643_v3 = vmul.f32 %v4935_v52, %v1641_v2  ;;  %v1992_v52 = vld [vmem:[%s6136_s4 + $0x20] sm:$0xff] }
0x12a0   :  { %1745 = vrot.lane.b32.xlu1 %v1643_v3, %s5156_s5 }
0x130e   :  { %v1846_v41 = vpop.permute.xlu0 %1845 }
0x130f   :  { %4562 = vmatmul.mubr.msk.f32.vlgmr.msra.gmra.mxu1 %vm350_vm3, %v1846_v41 }
0x1310   :  { %4593 = vmatpush3.msra.mxu1 %v4096_v21 }
0x1311   :  { %4594 = vmatprep.subr.mxu1 %v4095_v49 }
0x1312   :  { %v5644_v7 = vpop.permute.xlu1 %1745  ;;  %4595 = vmatpush3.msra.mxu1 %v4095_v49 }
0x1313   :  { %4551 = vmatmul.mubr.msk.f32.vlgmr.msra.gmra.mxu0 %vm350_vm3, %v5644_v7  ;;  %4596 = vmatprep.subr.mxu1 %v4094_v51 }
0x1314   :  { %4565 = vmatpush3.msra.mxu0 %v1995_v46  ;;  %4597 = vmatpush3.msra.mxu1 %v4094_v51 }
0x1315   :  { %4566 = vmatprep.subr.mxu0 %v1994_v35  ;;  %4598 = vmatprep.subr.mxu1 %v4093_v53 }
0x1316   :  { %4567 = vmatpush3.msra.mxu0 %v1994_v35  ;;  %4599 = vmatpush3.msra.mxu1 %v4093_v53 }
0x1317   :  { %4568 = vmatprep.subr.mxu0 %v1993_v54  ;;  %4600 = vmatprep.subr.mxu1 %v4092_v56 }
0x1318   :  { %4569 = vmatpush3.msra.mxu0 %v1993_v54  ;;  %4601 = vmatpush3.msra.mxu1 %v4092_v56 }
0x1319   :  { %4570 = vmatprep.subr.mxu0 %v1992_v52 }
0x131a   :  { %4571 = vmatpush3.msra.mxu0 %v1992_v52 }
0x131b   :  { %4572 = vmatprep.subr.mxu0 %v1991_v55 }
0x131c   :  { %4573 = vmatpush3.msra.mxu0 %v1991_v55 }
0x131d   :  { %4574 = vmatprep.subr.mxu0 %v1990_v47 }
0x131e   :  { %4575 = vmatpush3.msra.mxu0 %v1990_v47 }
0x13cf   :  { %v1915_v9 = vpop.f32.mrf.mxu1 }
0x13d0   :  { %v1919_v11 = vadd.f32 %v1915_v9, %v5335_v24  ;;  %v5733_v9 = vld [vmem:[#allocation4 + $0x18] sm:$0xff] }
0x13d1   :  { %v4563_v12 = vpop.f32.mrf.mxu1 }
0x13d2   :  { %4940 = vtanh.f32 %v1919_v11  ;;  %v4079_v25 = vmul.f32 -1.442695, %v1919_v11 }
0x13d3   :  { %v1815_v19 = vpop.f32.mrf.mxu0 }
0x13d4   :  { %v1819_v28 = vadd.f32 %v1815_v19, %v5357_v50 }
0x13d5   :  { %v4552_v20 = vpop.f32.mrf.mxu0 }
0x13d6   :  { %4942 = vtanh.f32 %v1819_v28  ;;  %v4077_v27 = vmul.f32 -1.442695, %v1819_v28  ;;  %v5767_v28 = vld [vmem:[#allocation4 + $0x28] sm:$0xff] }
0x13d7   :  { %4944 = vpow2.f32 %v4079_v25 }
0x13d8   :  { %4946 = vpow2.f32 %v4077_v27 }
0x13df   :  { %v4941_v22 = vpop.eup %4940 }
0x13e0   :  { %1929 = vrot.lane.b32.xlu0 %v4941_v22, %s5155_s3  ;;  %v5777_v22 = vld [vmem:[#allocation4] sm:$0xff] }
0x13e3   :  { %v4943_v44 = vpop.eup %4942 }
0x13e4   :  { %1829 = vrot.lane.b32.xlu1 %v4943_v44, %s5155_s3  ;;  %v4945_v29 = vpop.eup %4944  ;;  %v5779_v44 = vld [vmem:[#allocation4 + $0x20] sm:$0xff] }
0x13e5   :  { %v1923_v30 = vadd.f32 1.0, %v4945_v29  ;;  %v4947_v24 = vpop.eup %4946  ;;  %v4080_v29 = vld [vmem:[%s6138_s6] ss:$0 sm:$0xff] }
0x13e6   :  { %v1823_v39 = vadd.f32 1.0, %v4947_v24 }
0x13e7   :  { %4948 = vrcp.f32 %v1923_v30  ;;  %v4098_v30 = vld [vmem:[%s6138_s6 + $0x1] ss:$0 sm:$0xff] }
0x13e8   :  { %4950 = vrcp.f32 %v1823_v39 }
0x13f4   :  { %v5652_v36 = vpop.eup %4948 }
0x13f5   :  { %v5656_v4 = vpop.eup %4950  ;;  %v1927_v13 = vmul.f32 %v5652_v36, %v1737_v58  ;;  %v1989_v58 = vld [vmem:[%s6136_s4 + $0x8] sm:$0xff] }
0x13f6   :  { %v1827_v42 = vmul.f32 %v5656_v4, %v1637_v61  ;;  %4576 = vmatprep.subr.mxu0 %v1989_v58 }
0x13f7   :  { %4577 = vmatpush3.msra.mxu0 %v1989_v58 }
0x1452   :  { %v1930_v50 = vpop.permute.xlu0 %1929 }
0x1453   :  { %v1932_v38 = vmul.f32 %v5652_v36, %v1930_v50 }
0x1455   :  { %1934 = vrot.lane.b32.xlu0 %v1932_v38, %s5155_s3 }
0x1456   :  { %v1830_v8 = vpop.permute.xlu1 %1829 }
0x1457   :  { %v1832_v10 = vmul.f32 %v5656_v4, %v1830_v8 }
0x1459   :  { %1834 = vrot.lane.b32.xlu1 %v1832_v10, %s5155_s3 }
0x14c7   :  { %v1935_v14 = vpop.permute.xlu0 %1934 }
0x14c8   :  { %v1937_v16 = vadd.f32 %v1935_v14, %v1927_v13 }
0x14ca   :  { %4952 = vtanh.f32 %v1937_v16 }
0x14cb   :  { %v1835_v43 = vpop.permute.xlu1 %1834 }
0x14cc   :  { %v1837_v17 = vadd.f32 %v1835_v43, %v1827_v42 }
0x14ce   :  { %4954 = vtanh.f32 %v1837_v17 }
0x14d7   :  { %v4953_v45 = vpop.eup %4952 }
0x14d8   :  { %1940 = vrot.lane.b32.xlu0 %v4953_v45, %s5155_s3 }
0x14db   :  { %v4955_v18 = vpop.eup %4954 }
0x14dc   :  { %1840 = vrot.lane.b32.xlu1 %v4955_v18, %s5155_s3 }
0x14e0   :  { %1951 = vrot.lane.b32.xlu1 %v1743_v31, %s5157_s11 }
0x14e4   :  { %1961 = vrot.lane.b32.xlu1 %v5557_v48, %s5157_s11  ;;  %v4091_v48 = vld [vmem:[%s6136_s4 + $0x50] sm:$0xff] }
0x14e5   :  { %4602 = vmatprep.subr.mxu1 %v4091_v48 }
0x14e6   :  { %4603 = vmatpush3.msra.mxu1 %v4091_v48 }
0x14e7   :  { %4604 = vmatprep.subr.mxu1 %v4090_v59 }
0x14e8   :  { %1971 = vrot.lane.b32.xlu1 %v5465_v0, %s5157_s11  ;;  %4605 = vmatpush3.msra.mxu1 %v4090_v59  ;;  %v1988_v0 = vld [vmem:[%s6136_s4] sm:$0xff] }
0x14e9   :  { %4578 = vmatprep.subr.mxu0 %v1988_v0  ;;  %4606 = vmatprep.subr.mxu1 %v4089_v60 }
0x14ea   :  { %4579 = vmatpush3.msra.mxu0 %v1988_v0  ;;  %4607 = vmatpush3.msra.mxu1 %v4089_v60 }
0x14eb   :  { %4620 = vmatprep.subr.mxu0 %v5153_v6  ;;  %4631 = vmatprep.subr.mxu1 %v5153_v6 }
0x154a   :  { %v1941_v61 = vpop.permute.xlu0 %1940 }
0x154b   :  { %v1943_v62 = vmul.f32 %v5652_v36, %v1941_v61 }
0x154d   :  { %1946 = vrot.lane.b32.xlu0 %v1943_v62, %s5157_s11 }
0x154e   :  { %v1841_v63 = vpop.permute.xlu1 %1840 }
0x154f   :  { %v1843_v1 = vmul.f32 %v5656_v4, %v1841_v63 }
0x1551   :  { %1956 = vrot.lane.b32.xlu0 %v5603_v34, %s5157_s11  ;;  %1981 = vrot.lane.b32.xlu1 %v1843_v1, %s5156_s5  ;;  %v5735_v34 = vld [vmem:[#allocation4 + $0x38] sm:$0xff] }
0x1552   :  { %v1952_v31 = vpop.permute.xlu1 %1951 }
0x1555   :  { %1966 = vrot.lane.b32.xlu0 %v5511_v57, %s5157_s11  ;;  %v1954_v57 = vsel %vm350_vm3, %v5429_v23, %v1952_v31  ;;  %v5751_v23 = vld [vmem:[#allocation4 + $0x30] sm:$0xff] }
0x1556   :  { %v1962_v3 = vpop.permute.xlu1 %1961 }
0x1557   :  { %v1964_v11 = vsel %vm350_vm3, %v5521_v26, %v1962_v3  ;;  %v5764_v26 = vld [vmem:[#allocation4 + $0x8] sm:$0xff] }
0x1559   :  { %1976 = vrot.lane.b32.xlu0 %v5419_v15, %s5157_s11  ;;  %v5748_v15 = vld [vmem:[#allocation4 + $0x10] sm:$0xff] }
0x155a   :  { %v1972_v12 = vpop.permute.xlu1 %1971 }
0x155b   :  { %v1974_v20 = vsel %vm350_vm3, %v5613_v33, %v1972_v12 }
0x155d   :  { %1984 = vrot.lane.b32.xlu0 %v5373_v32, %s5157_s11 }
0x15bf   :  { %v1947_v2 = vpop.permute.xlu0 %1946 }
0x15c0   :  { %v1949_v41 = vsel %vm350_vm3, %v5383_v40, %v1947_v2 }
0x15c1   :  { %4580 = vmatprep.mubr.msk.f32.mxu0 %vm2003_vm4, %v1949_v41  ;;  %4608 = vmatprep.mubr.msk.f32.mxu1 %vm2003_vm4, %v1949_v41 }
0x15c2   :  { %4581 = vmatmul.mubr.msk.f32.vlgmr.msra.gmra.mxu0 %vm2003_vm4, %v1954_v57  ;;  %4609 = vmatmul.mubr.msk.f32.vlgmr.msra.gmra.mxu1 %vm2003_vm4, %v1954_v57 }
0x15c3   :  { %v1957_v32 = vpop.permute.xlu0 %1956  ;;  %4621 = vmatpush3.msra.mxu0 %v5733_v9  ;;  %4632 = vmatpush3.msra.mxu1 %v5735_v34  ;;  %v1982_v25 = vpop.permute.xlu1 %1981 }
0x15c4   :  { %v1959_v40 = vsel %vm350_vm3, %v5475_v5, %v1957_v32  ;;  %4622 = vmatprep.subr.mxu0 %v5153_v6  ;;  %4633 = vmatprep.subr.mxu1 %v5153_v6 }
0x15c5   :  { %4583 = vmatprep.mubr.msk.f32.mxu0 %vm2003_vm4, %v1959_v40  ;;  %4611 = vmatprep.mubr.msk.f32.mxu1 %vm2003_vm4, %v1959_v40 }
0x15c6   :  { %4584 = vmatmul.mubr.msk.f32.gmra.mxu0 %vm2003_vm4, %v1964_v11  ;;  %4612 = vmatmul.mubr.msk.f32.gmra.mxu1 %vm2003_vm4, %v1964_v11 }
0x15c7   :  { %v1967_v5 = vpop.permute.xlu0 %1966  ;;  %4623 = vmatpush3.msra.mxu0 %v5748_v15  ;;  %4634 = vmatpush3.msra.mxu1 %v5751_v23 }
0x15c8   :  { %v1969_v19 = vsel %vm350_vm3, %v5567_v37, %v1967_v5  ;;  %4624 = vmatprep.subr.mxu0 %v5153_v6  ;;  %4635 = vmatprep.subr.mxu1 %v5153_v6 }
0x15c9   :  { %4586 = vmatprep.mubr.msk.f32.mxu0 %vm2003_vm4, %v1969_v19  ;;  %4614 = vmatprep.mubr.msk.f32.mxu1 %vm2003_vm4, %v1969_v19 }
0x15ca   :  { %4587 = vmatmul.mubr.msk.f32.gmra.mxu0 %vm2003_vm4, %v1974_v20  ;;  %4615 = vmatmul.mubr.msk.f32.gmra.mxu1 %vm2003_vm4, %v1974_v20 }
0x15cb   :  { %v1977_v37 = vpop.permute.xlu0 %1976  ;;  %4625 = vmatpush3.msra.mxu0 %v5764_v26  ;;  %4636 = vmatpush3.msra.mxu1 %v5767_v28 }
0x15cc   :  { %v1979_v33 = vsel %vm350_vm3, %v5644_v7, %v1977_v37  ;;  %4626 = vmatprep.subr.mxu0 %v5153_v6  ;;  %4637 = vmatprep.subr.mxu1 %v5153_v6 }
0x15cd   :  { %4589 = vmatprep.mubr.msk.f32.mxu0 %vm2003_vm4, %v1979_v33  ;;  %4617 = vmatprep.mubr.msk.f32.mxu1 %vm2003_vm4, %v1979_v33 }
0x15ce   :  { %4627 = vmatpush3.msra.mxu0 %v5777_v22  ;;  %4638 = vmatpush3.msra.mxu1 %v5779_v44 }
0x15cf   :  { %v1985_v27 = vpop.permute.xlu0 %1984  ;;  %4642 = vmatprep.subr.mxu0 %v5153_v6  ;;  %4653 = vmatprep.subr.mxu1 %v5153_v6 }
0x15d0   :  { %v1987_v7 = vsel %vm350_vm3, %v1982_v25, %v1985_v27 }
0x15d1   :  { %4590 = vmatmul.mubr.msk.f32.gmra.mxu0 %vm2003_vm4, %v1987_v7  ;;  %4618 = vmatmul.mubr.msk.f32.gmra.mxu1 %vm2003_vm4, %v1987_v7 }
0x15d2   :  { %4628 = vmatprep.mubr.msk.f32.mxu0 %vm5154_vm2, %v5153_v6  ;;  %4639 = vmatprep.mubr.msk.f32.mxu1 %vm5154_vm2, %v5153_v6 }
0x15d5   :  { %4629 = vmatmul.mubr.f32.vlgmr.msra.gmra.mxu0 %v5153_v6  ;;  %4640 = vmatmul.mubr.f32.vlgmr.msra.gmra.mxu1 %v5153_v6 }
0x15d6   :  { %4643 = vmatpush3.msra.mxu0 %v5733_v9  ;;  %4654 = vmatpush3.msra.mxu1 %v5735_v34 }
0x15d7   :  { %4644 = vmatprep.subr.mxu0 %v5153_v6  ;;  %4655 = vmatprep.subr.mxu1 %v5153_v6 }
0x15d8   :  { %4645 = vmatpush3.msra.mxu0 %v5748_v15  ;;  %4656 = vmatpush3.msra.mxu1 %v5751_v23 }
0x15d9   :  { %4646 = vmatprep.subr.mxu0 %v5153_v6  ;;  %4657 = vmatprep.subr.mxu1 %v5153_v6 }
0x15da   :  { %4647 = vmatpush3.msra.mxu0 %v5764_v26  ;;  %4658 = vmatpush3.msra.mxu1 %v5767_v28 }
0x15db   :  { %4648 = vmatprep.subr.mxu0 %v5153_v6  ;;  %4659 = vmatprep.subr.mxu1 %v5153_v6 }
0x15dc   :  { %4660 = vmatpush3.msra.mxu1 %v5779_v44  ;;  %4661 = vmatprep.mubr.msk.f32.mxu1 %vm5154_vm2, %v5153_v6 }
0x15dd   :  { %4649 = vmatpush3.msra.mxu0 %v5777_v22  ;;  %4650 = vmatprep.mubr.msk.f32.mxu0 %vm5154_vm2, %v5153_v6 }
0x15de   :  { %4664 = vmatprep.subr.mxu0 %v5153_v6  ;;  %4675 = vmatprep.subr.mxu1 %v5153_v6 }
0x1682   :  { %v4582_v24 = vpop.f32.mrf.mxu0  ;;  %v4610_v39 = vpop.f32.mrf.mxu1 }
0x1683   :  { %v5826_v36 = vadd.f32 %v4582_v24, %v4080_v29  ;;  %v5828_v50 = vadd.f32 %v4610_v39, %v4098_v30 }
0x1684   :  { %v2094_v38 = vpop.f32.mrf.mxu0  ;;  %v2220_v4 = vpop.f32.mrf.mxu1 }
0x1685   :  { %v5830_v8 = vadd.f32 %v4098_v30, %v2220_v4  ;;  %v2095_v58 = vadd.f32 %v4080_v29, %v2094_v38 }
0x1686   :  { %v4585_v10 = vpop.f32.mrf.mxu0  ;;  %v4613_v13 = vpop.f32.mrf.mxu1 }
0x1687   :  { %v5832_v14 = vadd.f32 %v4585_v10, %v4080_v29  ;;  %v5834_v16 = vadd.f32 %v4613_v13, %v4098_v30 }
0x1688   :  { %v2104_v42 = vpop.f32.mrf.mxu0  ;;  %v2230_v43 = vpop.f32.mrf.mxu1 }
0x1689   :  { %v5836_v17 = vadd.f32 %v4080_v29, %v2104_v42  ;;  %v5838_v45 = vadd.f32 %v4098_v30, %v2230_v43 }
0x168a   :  { %v4588_v18 = vpop.f32.mrf.mxu0  ;;  %v4616_v46 = vpop.f32.mrf.mxu1 }
0x168b   :  { %v5840_v21 = vadd.f32 %v4588_v18, %v4080_v29  ;;  %v5842_v35 = vadd.f32 %v4616_v46, %v4098_v30 }
0x168c   :  { %v2114_v49 = vpop.f32.mrf.mxu0  ;;  %v2240_v54 = vpop.f32.mrf.mxu1 }
0x168d   :  { %v5844_v51 = vadd.f32 %v4080_v29, %v2114_v49  ;;  %v5846_v52 = vadd.f32 %v4098_v30, %v2240_v54 }
0x1691   :  { %v4591_v53 = vpop.f32.mrf.mxu0  ;;  %v4619_v55 = vpop.f32.mrf.mxu1 }
0x1692   :  { %v5848_v56 = vadd.f32 %v4591_v53, %v4080_v29  ;;  %v2256_v59 = vadd.f32 %v4619_v55, %v4098_v30 }
0x1693   :  { %v2124_v47 = vpop.f32.mrf.mxu0  ;;  %v2250_v48 = vpop.f32.mrf.mxu1 }
0x1694   :  { %v5850_v0 = vadd.f32 %v4080_v29, %v2124_v47  ;;  %v5852_v60 = vadd.f32 %v4098_v30, %v2250_v48 }
0x1695   :  { %v2330_v61 = vpop.f32.mrf.mxu0  ;;  %v2425_v62 = vpop.f32.mrf.mxu1 }
0x1696   :  { %v2334_v63 = vadd.f32 %v2330_v61, %v2095_v58  ;;  %v2429_v1 = vadd.f32 %v2425_v62, %v2256_v59 }
0x1697   :  { %v4630_v31 = vpop.f32.mrf.mxu0  ;;  %v4641_v2 = vpop.f32.mrf.mxu1 }
0x1698   :  { %4956 = vtanh.f32 %v2334_v63  ;;  %v4107_v57 = vmul.f32 -1.442695, %v2334_v63  ;;  %v4108_v32 = vmul.f32 -1.442695, %v2429_v1 }
0x1699   :  { %4958 = vtanh.f32 %v2429_v1 }
0x169a   :  { %4960 = vpow2.f32 %v4107_v57 }
0x169b   :  { %4962 = vpow2.f32 %v4108_v32 }
0x16a5   :  { %v4957_v3 = vpop.eup %4956 }
0x16a6   :  { %v4959_v41 = vpop.eup %4958  ;;  %2344 = vrot.lane.b32.xlu1 %v4957_v3, %s5155_s3 }
0x16a7   :  { %2439 = vrot.lane.b32.xlu0 %v4959_v41, %s5155_s3  ;;  %v4961_v40 = vpop.eup %4960 }
0x16a8   :  { %v4963_v11 = vpop.eup %4962  ;;  %v2338_v12 = vadd.f32 1.0, %v4961_v40 }
0x16a9   :  { %v2433_v5 = vadd.f32 1.0, %v4963_v11 }
0x16aa   :  { %4964 = vrcp.f32 %v2338_v12 }
0x16ab   :  { %4966 = vrcp.f32 %v2433_v5 }
0x16b7   :  { %v4965_v19 = vpop.eup %4964 }
0x16b8   :  { %v4967_v37 = vpop.eup %4966  ;;  %v2342_v7 = vmul.f32 0.0, %v4965_v19 }
0x16b9   :  { %v2437_v29 = vmul.f32 0.0, %v4967_v37 }
0x1718   :  { %v2345_v20 = vpop.permute.xlu1 %2344 }
0x1719   :  { %v2440_v33 = vpop.permute.xlu0 %2439  ;;  %v2347_v25 = vmul.f32 %v4965_v19, %v2345_v20 }
0x171a   :  { %v2442_v27 = vmul.f32 %v4967_v37, %v2440_v33 }
0x171b   :  { %2349 = vrot.lane.b32.xlu1 %v2347_v25, %s5155_s3 }
0x171c   :  { %2444 = vrot.lane.b32.xlu0 %v2442_v27, %s5155_s3 }
0x178d   :  { %v2350_v30 = vpop.permute.xlu1 %2349 }
0x178e   :  { %v2445_v24 = vpop.permute.xlu0 %2444  ;;  %v5858_v39 = vadd.f32 %v2350_v30, %v2342_v7 }
0x178f   :  { %v5860_v38 = vadd.f32 %v2445_v24, %v2437_v29 }
0x1790   :  { %4968 = vtanh.f32 %v5858_v39 }
0x1791   :  { %4970 = vtanh.f32 %v5860_v38 }
0x179d   :  { %v4969_v4 = vpop.eup %4968 }
0x179e   :  { %v4971_v10 = vpop.eup %4970  ;;  %2355 = vrot.lane.b32.xlu1 %v4969_v4, %s5155_s3 }
0x179f   :  { %2450 = vrot.lane.b32.xlu0 %v4971_v10, %s5155_s3 }
0x1810   :  { %v2356_v13 = vpop.permute.xlu1 %2355 }
0x1811   :  { %v2451_v42 = vpop.permute.xlu0 %2450  ;;  %v2358_v43 = vmul.f32 %v4965_v19, %v2356_v13 }
0x1812   :  { %v2453_v18 = vmul.f32 %v4967_v37, %v2451_v42 }
0x1813   :  { %2455 = vrot.lane.b32.xlu1 %v2358_v43, %s5156_s5 }
0x1814   :  { %2555 = vrot.lane.b32.xlu0 %v2453_v18, %s5156_s5 }
0x1885   :  { %v2456_v46 = vpop.permute.xlu1 %2455 }
0x1886   :  { %v2556_v49 = vpop.permute.xlu0 %2555  ;;  %4651 = vmatmul.mubr.msk.f32.vlgmr.msra.gmra.mxu0 %vm350_vm3, %v2456_v46 }
0x1887   :  { %4662 = vmatmul.mubr.msk.f32.vlgmr.msra.gmra.mxu1 %vm350_vm3, %v2556_v49  ;;  %4665 = vmatpush3.msra.mxu0 %v5733_v9 }
0x1888   :  { %4676 = vmatpush3.msra.mxu1 %v5735_v34  ;;  %4666 = vmatprep.subr.mxu0 %v5153_v6 }
0x1889   :  { %4677 = vmatprep.subr.mxu1 %v5153_v6  ;;  %4667 = vmatpush3.msra.mxu0 %v5748_v15 }
0x188a   :  { %4678 = vmatpush3.msra.mxu1 %v5751_v23  ;;  %4668 = vmatprep.subr.mxu0 %v5153_v6 }
0x188b   :  { %4679 = vmatprep.subr.mxu1 %v5153_v6  ;;  %4669 = vmatpush3.msra.mxu0 %v5764_v26 }
0x188c   :  { %4680 = vmatpush3.msra.mxu1 %v5767_v28  ;;  %4670 = vmatprep.subr.mxu0 %v5153_v6 }
0x188d   :  { %4681 = vmatprep.subr.mxu1 %v5153_v6  ;;  %4683 = vmatprep.mubr.msk.f32.mxu1 %vm5154_vm2, %v5153_v6 }
0x188e   :  { %4682 = vmatpush3.msra.mxu1 %v5779_v44  ;;  %4671 = vmatpush3.msra.mxu0 %v5777_v22 }
0x188f   :  { %4672 = vmatprep.mubr.msk.f32.mxu0 %vm5154_vm2, %v5153_v6  ;;  %4686 = vmatprep.subr.mxu0 %v5153_v6 }
0x1890   :  { %4697 = vmatprep.subr.mxu1 %v5153_v6 }
0x1946   :  { %v2525_v54 = vpop.f32.mrf.mxu0 }
0x1947   :  { %v2529_v53 = vadd.f32 %v2525_v54, %v5826_v36  ;;  %v2625_v55 = vpop.f32.mrf.mxu1 }
0x1948   :  { %v2629_v47 = vadd.f32 %v2625_v55, %v5852_v60  ;;  %v4652_v48 = vpop.f32.mrf.mxu0 }
0x1949   :  { %4972 = vtanh.f32 %v2529_v53  ;;  %v4663_v58 = vpop.f32.mrf.mxu1  ;;  %v4110_v62 = vmul.f32 -1.442695, %v2529_v53 }
0x194a   :  { %4974 = vtanh.f32 %v2629_v47  ;;  %v4112_v63 = vmul.f32 -1.442695, %v2629_v47 }
0x194b   :  { %4976 = vpow2.f32 %v4110_v62 }
0x194c   :  { %4978 = vpow2.f32 %v4112_v63 }
0x1956   :  { %v4973_v59 = vpop.eup %4972 }
0x1957   :  { %v4975_v61 = vpop.eup %4974  ;;  %2539 = vrot.lane.b32.xlu1 %v4973_v59, %s5155_s3 }
0x1958   :  { %2639 = vrot.lane.b32.xlu0 %v4975_v61, %s5155_s3  ;;  %v4977_v1 = vpop.eup %4976 }
0x1959   :  { %v4979_v31 = vpop.eup %4978  ;;  %v2533_v36 = vadd.f32 1.0, %v4977_v1 }
0x195a   :  { %v2633_v2 = vadd.f32 1.0, %v4979_v31 }
0x195b   :  { %4980 = vrcp.f32 %v2533_v36 }
0x195c   :  { %4982 = vrcp.f32 %v2633_v2 }
0x1968   :  { %v4981_v60 = vpop.eup %4980 }
0x1969   :  { %v4983_v41 = vpop.eup %4982  ;;  %v2537_v11 = vmul.f32 %v4981_v60, %v5858_v39 }
0x196a   :  { %v2637_v12 = vmul.f32 %v4983_v41, %v5860_v38 }
0x19c9   :  { %v2540_v3 = vpop.permute.xlu1 %2539 }
0x19ca   :  { %v2640_v57 = vpop.permute.xlu0 %2639  ;;  %v2542_v32 = vmul.f32 %v4981_v60, %v2540_v3 }
0x19cb   :  { %v2642_v40 = vmul.f32 %v4983_v41, %v2640_v57 }
0x19cc   :  { %2544 = vrot.lane.b32.xlu1 %v2542_v32, %s5155_s3 }
0x19cd   :  { %2644 = vrot.lane.b32.xlu0 %v2642_v40, %s5155_s3 }
0x1a3e   :  { %v2545_v5 = vpop.permute.xlu1 %2544 }
0x1a3f   :  { %v2645_v19 = vpop.permute.xlu0 %2644  ;;  %v5898_v20 = vadd.f32 %v2545_v5, %v2537_v11 }
0x1a40   :  { %v5900_v37 = vadd.f32 %v2645_v19, %v2637_v12 }
0x1a41   :  { %4984 = vtanh.f32 %v5898_v20 }
0x1a42   :  { %4986 = vtanh.f32 %v5900_v37 }
0x1a4e   :  { %v4985_v33 = vpop.eup %4984 }
0x1a4f   :  { %v4987_v25 = vpop.eup %4986  ;;  %2550 = vrot.lane.b32.xlu1 %v4985_v33, %s5155_s3 }
0x1a50   :  { %2650 = vrot.lane.b32.xlu0 %v4987_v25, %s5155_s3 }
0x1ac1   :  { %v2551_v27 = vpop.permute.xlu1 %2550 }
0x1ac2   :  { %v2651_v7 = vpop.permute.xlu0 %2650  ;;  %v2553_v29 = vmul.f32 %v4981_v60, %v2551_v27 }
0x1ac3   :  { %v2653_v30 = vmul.f32 %v4983_v41, %v2651_v7 }
0x1ac4   :  { %2655 = vrot.lane.b32.xlu1 %v2553_v29, %s5156_s5 }
0x1ac5   :  { %2755 = vrot.lane.b32.xlu0 %v2653_v30, %s5156_s5 }
0x1b36   :  { %v2656_v24 = vpop.permute.xlu1 %2655 }
0x1b37   :  { %v2756_v39 = vpop.permute.xlu0 %2755  ;;  %4673 = vmatmul.mubr.msk.f32.vlgmr.msra.gmra.mxu0 %vm350_vm3, %v2656_v24 }
0x1b38   :  { %4684 = vmatmul.mubr.msk.f32.vlgmr.msra.gmra.mxu1 %vm350_vm3, %v2756_v39  ;;  %4687 = vmatpush3.msra.mxu0 %v5733_v9 }
0x1b39   :  { %4698 = vmatpush3.msra.mxu1 %v5735_v34  ;;  %4688 = vmatprep.subr.mxu0 %v5153_v6 }
0x1b3a   :  { %4699 = vmatprep.subr.mxu1 %v5153_v6  ;;  %4689 = vmatpush3.msra.mxu0 %v5748_v15 }
0x1b3b   :  { %4700 = vmatpush3.msra.mxu1 %v5751_v23  ;;  %4690 = vmatprep.subr.mxu0 %v5153_v6 }
0x1b3c   :  { %4701 = vmatprep.subr.mxu1 %v5153_v6  ;;  %4691 = vmatpush3.msra.mxu0 %v5764_v26 }
0x1b3d   :  { %4702 = vmatpush3.msra.mxu1 %v5767_v28  ;;  %4692 = vmatprep.subr.mxu0 %v5153_v6 }
0x1b3e   :  { %4703 = vmatprep.subr.mxu1 %v5153_v6  ;;  %4705 = vmatprep.mubr.msk.f32.mxu1 %vm5154_vm2, %v5153_v6 }
0x1b3f   :  { %4704 = vmatpush3.msra.mxu1 %v5779_v44  ;;  %4693 = vmatpush3.msra.mxu0 %v5777_v22 }
0x1b40   :  { %4694 = vmatprep.mubr.msk.f32.mxu0 %vm5154_vm2, %v5153_v6  ;;  %4708 = vmatprep.subr.mxu0 %v5153_v6 }
0x1b41   :  { %4719 = vmatprep.subr.mxu1 %v5153_v6 }
0x1bf7   :  { %v2725_v38 = vpop.f32.mrf.mxu0 }
0x1bf8   :  { %v2729_v4 = vadd.f32 %v2725_v38, %v5836_v17  ;;  %v2825_v10 = vpop.f32.mrf.mxu1 }
0x1bf9   :  { %v2829_v13 = vadd.f32 %v2825_v10, %v5842_v35  ;;  %v4674_v42 = vpop.f32.mrf.mxu0 }
0x1bfa   :  { %4988 = vtanh.f32 %v2729_v4  ;;  %v4685_v43 = vpop.f32.mrf.mxu1  ;;  %v4114_v49 = vmul.f32 -1.442695, %v2729_v4 }
0x1bfb   :  { %4990 = vtanh.f32 %v2829_v13  ;;  %v4116_v54 = vmul.f32 -1.442695, %v2829_v13 }
0x1bfc   :  { %4992 = vpow2.f32 %v4114_v49 }
0x1bfd   :  { %4994 = vpow2.f32 %v4116_v54 }
0x1c07   :  { %v4989_v18 = vpop.eup %4988 }
0x1c08   :  { %v4991_v46 = vpop.eup %4990  ;;  %2739 = vrot.lane.b32.xlu1 %v4989_v18, %s5155_s3 }
0x1c09   :  { %2839 = vrot.lane.b32.xlu0 %v4991_v46, %s5155_s3  ;;  %v4993_v53 = vpop.eup %4992 }
0x1c0a   :  { %v4995_v55 = vpop.eup %4994  ;;  %v2733_v17 = vadd.f32 1.0, %v4993_v53 }
0x1c0b   :  { %v2833_v47 = vadd.f32 1.0, %v4995_v55 }
0x1c0c   :  { %4996 = vrcp.f32 %v2733_v17 }
0x1c0d   :  { %4998 = vrcp.f32 %v2833_v47 }
0x1c19   :  { %v4997_v35 = vpop.eup %4996 }
0x1c1a   :  { %v4999_v58 = vpop.eup %4998  ;;  %v2737_v63 = vmul.f32 %v4997_v35, %v5898_v20 }
0x1c1b   :  { %v2837_v1 = vmul.f32 %v4999_v58, %v5900_v37 }
0x1c7a   :  { %v2740_v48 = vpop.permute.xlu1 %2739 }
0x1c7b   :  { %v2840_v59 = vpop.permute.xlu0 %2839  ;;  %v2742_v61 = vmul.f32 %v4997_v35, %v2740_v48 }
0x1c7c   :  { %v2842_v62 = vmul.f32 %v4999_v58, %v2840_v59 }
0x1c7d   :  { %2744 = vrot.lane.b32.xlu1 %v2742_v61, %s5155_s3 }
0x1c7e   :  { %2844 = vrot.lane.b32.xlu0 %v2842_v62, %s5155_s3 }
0x1cef   :  { %v2745_v31 = vpop.permute.xlu1 %2744 }
0x1cf0   :  { %v2845_v36 = vpop.permute.xlu0 %2844  ;;  %v5938_v2 = vadd.f32 %v2745_v31, %v2737_v63 }
0x1cf1   :  { %v5940_v60 = vadd.f32 %v2845_v36, %v2837_v1 }
0x1cf2   :  { %5000 = vtanh.f32 %v5938_v2 }
0x1cf3   :  { %5002 = vtanh.f32 %v5940_v60 }
0x1cff   :  { %v5001_v3 = vpop.eup %5000 }
0x1d00   :  { %v5003_v41 = vpop.eup %5002  ;;  %2750 = vrot.lane.b32.xlu1 %v5001_v3, %s5155_s3 }
0x1d01   :  { %2850 = vrot.lane.b32.xlu0 %v5003_v41, %s5155_s3 }
0x1d72   :  { %v2751_v57 = vpop.permute.xlu1 %2750 }
0x1d73   :  { %v2851_v32 = vpop.permute.xlu0 %2850  ;;  %v2753_v40 = vmul.f32 %v4997_v35, %v2751_v57 }
0x1d74   :  { %v2853_v11 = vmul.f32 %v4999_v58, %v2851_v32 }
0x1d75   :  { %2855 = vrot.lane.b32.xlu1 %v2753_v40, %s5156_s5 }
0x1d76   :  { %2955 = vrot.lane.b32.xlu0 %v2853_v11, %s5156_s5 }
0x1de7   :  { %v2856_v12 = vpop.permute.xlu1 %2855 }
0x1de8   :  { %v2956_v5 = vpop.permute.xlu0 %2955  ;;  %4695 = vmatmul.mubr.msk.f32.vlgmr.msra.gmra.mxu0 %vm350_vm3, %v2856_v12 }
0x1de9   :  { %4706 = vmatmul.mubr.msk.f32.vlgmr.msra.gmra.mxu1 %vm350_vm3, %v2956_v5  ;;  %4709 = vmatpush3.msra.mxu0 %v5733_v9 }
0x1dea   :  { %4720 = vmatpush3.msra.mxu1 %v5735_v34  ;;  %4710 = vmatprep.subr.mxu0 %v5153_v6 }
0x1deb   :  { %4721 = vmatprep.subr.mxu1 %v5153_v6  ;;  %4711 = vmatpush3.msra.mxu0 %v5748_v15 }
0x1dec   :  { %4722 = vmatpush3.msra.mxu1 %v5751_v23  ;;  %4712 = vmatprep.subr.mxu0 %v5153_v6 }
0x1ded   :  { %4723 = vmatprep.subr.mxu1 %v5153_v6  ;;  %4713 = vmatpush3.msra.mxu0 %v5764_v26 }
0x1dee   :  { %4724 = vmatpush3.msra.mxu1 %v5767_v28  ;;  %4714 = vmatprep.subr.mxu0 %v5153_v6 }
0x1def   :  { %4725 = vmatprep.subr.mxu1 %v5153_v6  ;;  %4727 = vmatprep.mubr.msk.f32.mxu1 %vm5154_vm2, %v5153_v6 }
0x1df0   :  { %4726 = vmatpush3.msra.mxu1 %v5779_v44  ;;  %4715 = vmatpush3.msra.mxu0 %v5777_v22 }
0x1df1   :  { %4716 = vmatprep.mubr.msk.f32.mxu0 %vm5154_vm2, %v5153_v6  ;;  %4730 = vmatprep.subr.mxu0 %v5153_v6 }
0x1df2   :  { %4741 = vmatprep.subr.mxu1 %v5153_v6 }
0x1ea8   :  { %v2925_v19 = vpop.f32.mrf.mxu0 }
0x1ea9   :  { %v2929_v20 = vadd.f32 %v2925_v19, %v5832_v14  ;;  %v3025_v37 = vpop.f32.mrf.mxu1 }
0x1eaa   :  { %v3029_v33 = vadd.f32 %v3025_v37, %v5846_v52  ;;  %v4696_v25 = vpop.f32.mrf.mxu0 }
0x1eab   :  { %5004 = vtanh.f32 %v2929_v20  ;;  %v4707_v27 = vpop.f32.mrf.mxu1  ;;  %v4118_v30 = vmul.f32 -1.442695, %v2929_v20 }
0x1eac   :  { %5006 = vtanh.f32 %v3029_v33  ;;  %v4120_v24 = vmul.f32 -1.442695, %v3029_v33 }
0x1ead   :  { %5008 = vpow2.f32 %v4118_v30 }
0x1eae   :  { %5010 = vpow2.f32 %v4120_v24 }
0x1eb8   :  { %v5005_v7 = vpop.eup %5004 }
0x1eb9   :  { %v5007_v29 = vpop.eup %5006  ;;  %2939 = vrot.lane.b32.xlu1 %v5005_v7, %s5155_s3 }
0x1eba   :  { %3039 = vrot.lane.b32.xlu0 %v5007_v29, %s5155_s3  ;;  %v5009_v39 = vpop.eup %5008 }
0x1ebb   :  { %v5011_v38 = vpop.eup %5010  ;;  %v2933_v14 = vadd.f32 1.0, %v5009_v39 }
0x1ebc   :  { %v3033_v4 = vadd.f32 1.0, %v5011_v38 }
0x1ebd   :  { %5012 = vrcp.f32 %v2933_v14 }
0x1ebe   :  { %5014 = vrcp.f32 %v3033_v4 }
0x1eca   :  { %v5013_v52 = vpop.eup %5012 }
0x1ecb   :  { %v5015_v13 = vpop.eup %5014  ;;  %v2937_v46 = vmul.f32 %v5013_v52, %v5938_v2 }
0x1ecc   :  { %v3037_v49 = vmul.f32 %v5015_v13, %v5940_v60 }
0x1f2b   :  { %v2940_v10 = vpop.permute.xlu1 %2939 }
0x1f2c   :  { %v3040_v42 = vpop.permute.xlu0 %3039  ;;  %v2942_v43 = vmul.f32 %v5013_v52, %v2940_v10 }
0x1f2d   :  { %v3042_v18 = vmul.f32 %v5015_v13, %v3040_v42 }
0x1f2e   :  { %2944 = vrot.lane.b32.xlu1 %v2942_v43, %s5155_s3 }
0x1f2f   :  { %3044 = vrot.lane.b32.xlu0 %v3042_v18, %s5155_s3 }
0x1fa0   :  { %v2945_v54 = vpop.permute.xlu1 %2944 }
0x1fa1   :  { %v3045_v53 = vpop.permute.xlu0 %3044  ;;  %v5978_v55 = vadd.f32 %v2945_v54, %v2937_v46 }
0x1fa2   :  { %v5980_v17 = vadd.f32 %v3045_v53, %v3037_v49 }
0x1fa3   :  { %5016 = vtanh.f32 %v5978_v55 }
0x1fa4   :  { %5018 = vtanh.f32 %v5980_v17 }
0x1fb0   :  { %v5017_v47 = vpop.eup %5016 }
0x1fb1   :  { %v5019_v35 = vpop.eup %5018  ;;  %2950 = vrot.lane.b32.xlu1 %v5017_v47, %s5155_s3 }
0x1fb2   :  { %3050 = vrot.lane.b32.xlu0 %v5019_v35, %s5155_s3 }
0x2023   :  { %v2951_v48 = vpop.permute.xlu1 %2950 }
0x2024   :  { %v3051_v58 = vpop.permute.xlu0 %3050  ;;  %v2953_v59 = vmul.f32 %v5013_v52, %v2951_v48 }
0x2025   :  { %v3053_v61 = vmul.f32 %v5015_v13, %v3051_v58 }
0x2026   :  { %3055 = vrot.lane.b32.xlu1 %v2953_v59, %s5156_s5 }
0x2027   :  { %3155 = vrot.lane.b32.xlu0 %v3053_v61, %s5156_s5 }
0x2098   :  { %v3056_v62 = vpop.permute.xlu1 %3055 }
0x2099   :  { %v3156_v63 = vpop.permute.xlu0 %3155  ;;  %4717 = vmatmul.mubr.msk.f32.vlgmr.msra.gmra.mxu0 %vm350_vm3, %v3056_v62 }
0x209a   :  { %4728 = vmatmul.mubr.msk.f32.vlgmr.msra.gmra.mxu1 %vm350_vm3, %v3156_v63  ;;  %4731 = vmatpush3.msra.mxu0 %v5733_v9 }
0x209b   :  { %4742 = vmatpush3.msra.mxu1 %v5735_v34  ;;  %4732 = vmatprep.subr.mxu0 %v5153_v6 }
0x209c   :  { %4743 = vmatprep.subr.mxu1 %v5153_v6  ;;  %4733 = vmatpush3.msra.mxu0 %v5748_v15 }
0x209d   :  { %4744 = vmatpush3.msra.mxu1 %v5751_v23  ;;  %4734 = vmatprep.subr.mxu0 %v5153_v6 }
0x209e   :  { %4745 = vmatprep.subr.mxu1 %v5153_v6  ;;  %4735 = vmatpush3.msra.mxu0 %v5764_v26 }
0x209f   :  { %4746 = vmatpush3.msra.mxu1 %v5767_v28  ;;  %4736 = vmatprep.subr.mxu0 %v5153_v6 }
0x20a0   :  { %4747 = vmatprep.subr.mxu1 %v5153_v6  ;;  %4749 = vmatprep.mubr.msk.f32.mxu1 %vm5154_vm2, %v5153_v6 }
0x20a1   :  { %4748 = vmatpush3.msra.mxu1 %v5779_v44  ;;  %4737 = vmatpush3.msra.mxu0 %v5777_v22 }
0x20a2   :  { %4738 = vmatprep.mubr.msk.f32.mxu0 %vm5154_vm2, %v5153_v6  ;;  %4752 = vmatprep.subr.mxu0 %v5153_v6 }
0x20a3   :  { %4763 = vmatprep.subr.mxu1 %v5153_v6 }
0x2159   :  { %v3125_v1 = vpop.f32.mrf.mxu0 }
0x215a   :  { %v3129_v31 = vadd.f32 %v3125_v1, %v5844_v51  ;;  %v3225_v36 = vpop.f32.mrf.mxu1 }
0x215b   :  { %v3229_v2 = vadd.f32 %v3225_v36, %v5834_v16  ;;  %v4718_v60 = vpop.f32.mrf.mxu0 }
0x215c   :  { %5020 = vtanh.f32 %v3129_v31  ;;  %v4729_v3 = vpop.f32.mrf.mxu1  ;;  %v4122_v32 = vmul.f32 -1.442695, %v3129_v31 }
0x215d   :  { %5022 = vtanh.f32 %v3229_v2  ;;  %v4124_v40 = vmul.f32 -1.442695, %v3229_v2 }
0x215e   :  { %5024 = vpow2.f32 %v4122_v32 }
0x215f   :  { %5026 = vpow2.f32 %v4124_v40 }
0x2169   :  { %v5021_v41 = vpop.eup %5020 }
0x216a   :  { %v5023_v57 = vpop.eup %5022  ;;  %3139 = vrot.lane.b32.xlu1 %v5021_v41, %s5155_s3 }
0x216b   :  { %3239 = vrot.lane.b32.xlu0 %v5023_v57, %s5155_s3  ;;  %v5025_v11 = vpop.eup %5024 }
0x216c   :  { %v5027_v12 = vpop.eup %5026  ;;  %v3133_v51 = vadd.f32 1.0, %v5025_v11 }
0x216d   :  { %v3233_v5 = vadd.f32 1.0, %v5027_v12 }
0x216e   :  { %5028 = vrcp.f32 %v3133_v51 }
0x216f   :  { %5030 = vrcp.f32 %v3233_v5 }
0x217b   :  { %v5029_v16 = vpop.eup %5028 }
0x217c   :  { %v5031_v20 = vpop.eup %5030  ;;  %v3137_v27 = vmul.f32 %v5029_v16, %v5978_v55 }
0x217d   :  { %v3237_v7 = vmul.f32 %v5031_v20, %v5980_v17 }
0x21dc   :  { %v3140_v19 = vpop.permute.xlu1 %3139 }
0x21dd   :  { %v3240_v37 = vpop.permute.xlu0 %3239  ;;  %v3142_v33 = vmul.f32 %v5029_v16, %v3140_v19 }
0x21de   :  { %v3242_v25 = vmul.f32 %v5031_v20, %v3240_v37 }
0x21df   :  { %3144 = vrot.lane.b32.xlu1 %v3142_v33, %s5155_s3 }
0x21e0   :  { %3244 = vrot.lane.b32.xlu0 %v3242_v25, %s5155_s3 }
0x2251   :  { %v3145_v29 = vpop.permute.xlu1 %3144 }
0x2252   :  { %v3245_v30 = vpop.permute.xlu0 %3244  ;;  %v6018_v24 = vadd.f32 %v3145_v29, %v3137_v27 }
0x2253   :  { %v6020_v39 = vadd.f32 %v3245_v30, %v3237_v7 }
0x2254   :  { %5032 = vtanh.f32 %v6018_v24 }
0x2255   :  { %5034 = vtanh.f32 %v6020_v39 }
0x2261   :  { %v5033_v38 = vpop.eup %5032 }
0x2262   :  { %v5035_v14 = vpop.eup %5034  ;;  %3150 = vrot.lane.b32.xlu1 %v5033_v38, %s5155_s3 }
0x2263   :  { %3250 = vrot.lane.b32.xlu0 %v5035_v14, %s5155_s3 }
0x22d4   :  { %v3151_v4 = vpop.permute.xlu1 %3150 }
0x22d5   :  { %v3251_v52 = vpop.permute.xlu0 %3250  ;;  %v3153_v10 = vmul.f32 %v5029_v16, %v3151_v4 }
0x22d6   :  { %v3253_v13 = vmul.f32 %v5031_v20, %v3251_v52 }
0x22d7   :  { %3255 = vrot.lane.b32.xlu1 %v3153_v10, %s5156_s5 }
0x22d8   :  { %3355 = vrot.lane.b32.xlu0 %v3253_v13, %s5156_s5 }
0x2349   :  { %v3256_v42 = vpop.permute.xlu1 %3255 }
0x234a   :  { %v3356_v43 = vpop.permute.xlu0 %3355  ;;  %4739 = vmatmul.mubr.msk.f32.vlgmr.msra.gmra.mxu0 %vm350_vm3, %v3256_v42 }
0x234b   :  { %4750 = vmatmul.mubr.msk.f32.vlgmr.msra.gmra.mxu1 %vm350_vm3, %v3356_v43  ;;  %4753 = vmatpush3.msra.mxu0 %v5733_v9 }
0x234c   :  { %4764 = vmatpush3.msra.mxu1 %v5735_v34  ;;  %4754 = vmatprep.subr.mxu0 %v5153_v6 }
0x234d   :  { %4765 = vmatprep.subr.mxu1 %v5153_v6  ;;  %4755 = vmatpush3.msra.mxu0 %v5748_v15 }
0x234e   :  { %4766 = vmatpush3.msra.mxu1 %v5751_v23  ;;  %4756 = vmatprep.subr.mxu0 %v5153_v6 }
0x234f   :  { %4767 = vmatprep.subr.mxu1 %v5153_v6  ;;  %4757 = vmatpush3.msra.mxu0 %v5764_v26 }
0x2350   :  { %4768 = vmatpush3.msra.mxu1 %v5767_v28  ;;  %4758 = vmatprep.subr.mxu0 %v5153_v6 }
0x2351   :  { %4769 = vmatprep.subr.mxu1 %v5153_v6  ;;  %4771 = vmatprep.mubr.msk.f32.mxu1 %vm5154_vm2, %v5153_v6 }
0x2352   :  { %4770 = vmatpush3.msra.mxu1 %v5779_v44  ;;  %4759 = vmatpush3.msra.mxu0 %v5777_v22 }
0x2353   :  { %4760 = vmatprep.mubr.msk.f32.mxu0 %vm5154_vm2, %v5153_v6  ;;  %4774 = vmatprep.subr.mxu0 %v5153_v6 }
0x2354   :  { %4785 = vmatprep.subr.mxu1 %v5153_v6 }
0x240a   :  { %v3325_v18 = vpop.f32.mrf.mxu0 }
0x240b   :  { %v3329_v46 = vadd.f32 %v3325_v18, %v5840_v21  ;;  %v3425_v49 = vpop.f32.mrf.mxu1 }
0x240c   :  { %v3429_v54 = vadd.f32 %v3425_v49, %v5838_v45  ;;  %v4740_v53 = vpop.f32.mrf.mxu0 }
0x240d   :  { %5036 = vtanh.f32 %v3329_v46  ;;  %v4751_v55 = vpop.f32.mrf.mxu1  ;;  %v4126_v35 = vmul.f32 -1.442695, %v3329_v46 }
0x240e   :  { %5038 = vtanh.f32 %v3429_v54  ;;  %v4128_v48 = vmul.f32 -1.442695, %v3429_v54 }
0x240f   :  { %5040 = vpow2.f32 %v4126_v35 }
0x2410   :  { %5042 = vpow2.f32 %v4128_v48 }
0x241a   :  { %v5037_v17 = vpop.eup %5036 }
0x241b   :  { %v5039_v47 = vpop.eup %5038  ;;  %3339 = vrot.lane.b32.xlu1 %v5037_v17, %s5155_s3 }
0x241c   :  { %3439 = vrot.lane.b32.xlu0 %v5039_v47, %s5155_s3  ;;  %v5041_v58 = vpop.eup %5040 }
0x241d   :  { %v5043_v59 = vpop.eup %5042  ;;  %v3333_v21 = vadd.f32 1.0, %v5041_v58 }
0x241e   :  { %v3433_v61 = vadd.f32 1.0, %v5043_v59 }
0x241f   :  { %5044 = vrcp.f32 %v3333_v21 }
0x2420   :  { %5046 = vrcp.f32 %v3433_v61 }
0x242c   :  { %v5045_v45 = vpop.eup %5044 }
0x242d   :  { %v5047_v63 = vpop.eup %5046  ;;  %v3337_v2 = vmul.f32 %v5045_v45, %v6018_v24 }
0x242e   :  { %v3437_v60 = vmul.f32 %v5047_v63, %v6020_v39 }
0x248d   :  { %v3340_v62 = vpop.permute.xlu1 %3339 }
0x248e   :  { %v3440_v1 = vpop.permute.xlu0 %3439  ;;  %v3342_v31 = vmul.f32 %v5045_v45, %v3340_v62 }
0x248f   :  { %v3442_v36 = vmul.f32 %v5047_v63, %v3440_v1 }
0x2490   :  { %3344 = vrot.lane.b32.xlu1 %v3342_v31, %s5155_s3 }
0x2491   :  { %3444 = vrot.lane.b32.xlu0 %v3442_v36, %s5155_s3 }
0x2502   :  { %v3345_v3 = vpop.permute.xlu1 %3344 }
0x2503   :  { %v3445_v41 = vpop.permute.xlu0 %3444  ;;  %v6058_v57 = vadd.f32 %v3345_v3, %v3337_v2 }
0x2504   :  { %v6060_v32 = vadd.f32 %v3445_v41, %v3437_v60 }
0x2505   :  { %5048 = vtanh.f32 %v6058_v57 }
0x2506   :  { %5050 = vtanh.f32 %v6060_v32 }
0x2512   :  { %v5049_v40 = vpop.eup %5048 }
0x2513   :  { %v5051_v11 = vpop.eup %5050  ;;  %3350 = vrot.lane.b32.xlu1 %v5049_v40, %s5155_s3 }
0x2514   :  { %3450 = vrot.lane.b32.xlu0 %v5051_v11, %s5155_s3 }
0x2585   :  { %v3351_v12 = vpop.permute.xlu1 %3350 }
0x2586   :  { %v3451_v51 = vpop.permute.xlu0 %3450  ;;  %v3353_v5 = vmul.f32 %v5045_v45, %v3351_v12 }
0x2587   :  { %v3453_v16 = vmul.f32 %v5047_v63, %v3451_v51 }
0x2588   :  { %3455 = vrot.lane.b32.xlu1 %v3353_v5, %s5156_s5 }
0x2589   :  { %3555 = vrot.lane.b32.xlu0 %v3453_v16, %s5156_s5  ;;  %v3858_v16 = vld [vmem:[#allocation6 + $0x18] sm:$0xff] }
0x25fa   :  { %v3456_v19 = vpop.permute.xlu1 %3455 }
0x25fb   :  { %v3556_v20 = vpop.permute.xlu0 %3555  ;;  %4761 = vmatmul.mubr.msk.f32.vlgmr.msra.gmra.mxu0 %vm350_vm3, %v3456_v19  ;;  %v3944_v19 = vld [vmem:[#allocation6 + $0x38] sm:$0xff] }
0x25fc   :  { %4772 = vmatmul.mubr.msk.f32.vlgmr.msra.gmra.mxu1 %vm350_vm3, %v3556_v20  ;;  %4775 = vmatpush3.msra.mxu0 %v5733_v9  ;;  %v3857_v20 = vld [vmem:[#allocation6 + $0x10] sm:$0xff] }
0x25fd   :  { %4786 = vmatpush3.msra.mxu1 %v5735_v34  ;;  %4776 = vmatprep.subr.mxu0 %v5153_v6 }
0x25fe   :  { %4787 = vmatprep.subr.mxu1 %v5153_v6  ;;  %4777 = vmatpush3.msra.mxu0 %v5748_v15 }
0x25ff   :  { %4788 = vmatpush3.msra.mxu1 %v5751_v23  ;;  %4778 = vmatprep.subr.mxu0 %v5153_v6 }
0x2600   :  { %4789 = vmatprep.subr.mxu1 %v5153_v6  ;;  %4779 = vmatpush3.msra.mxu0 %v5764_v26 }
0x2601   :  { %4790 = vmatpush3.msra.mxu1 %v5767_v28  ;;  %4780 = vmatprep.subr.mxu0 %v5153_v6 }
0x2602   :  { %4791 = vmatprep.subr.mxu1 %v5153_v6  ;;  %4793 = vmatprep.mubr.msk.f32.mxu1 %vm5154_vm2, %v5153_v6 }
0x2603   :  { %4792 = vmatpush3.msra.mxu1 %v5779_v44  ;;  %4781 = vmatpush3.msra.mxu0 %v5777_v22 }
0x2604   :  { %4782 = vmatprep.mubr.msk.f32.mxu0 %vm5154_vm2, %v5153_v6  ;;  %4796 = vmatprep.subr.mxu0 %v5153_v6 }
0x2605   :  { %4807 = vmatprep.subr.mxu1 %v5153_v6 }
0x26bb   :  { %v3525_v9 = vpop.f32.mrf.mxu0 }
0x26bc   :  { %v3529_v34 = vadd.f32 %v3525_v9, %v5850_v0  ;;  %v3625_v15 = vpop.f32.mrf.mxu1  ;;  %v3943_v9 = vld [vmem:[#allocation6 + $0x30] sm:$0xff] }
0x26bd   :  { %v3629_v23 = vadd.f32 %v3625_v15, %v5828_v50  ;;  %v4762_v26 = vpop.f32.mrf.mxu0  ;;  %v3942_v15 = vld [vmem:[#allocation6 + $0x28] sm:$0xff] }
0x26be   :  { %5052 = vtanh.f32 %v3529_v34  ;;  %v4773_v28 = vpop.f32.mrf.mxu1  ;;  %v4130_v22 = vmul.f32 -1.442695, %v3529_v34  ;;  %v3856_v34 = vld [vmem:[#allocation6 + $0x8] sm:$0xff] }
0x26bf   :  { %5054 = vtanh.f32 %v3629_v23  ;;  %v4132_v33 = vmul.f32 -1.442695, %v3629_v23  ;;  %v3941_v23 = vld [vmem:[#allocation6 + $0x20] sm:$0xff] }
0x26c0   :  { %5056 = vpow2.f32 %v4130_v22 }
0x26c1   :  { %5058 = vpow2.f32 %v4132_v33 }
0x26cb   :  { %v5053_v44 = vpop.eup %5052 }
0x26cc   :  { %v5055_v37 = vpop.eup %5054  ;;  %3539 = vrot.lane.b32.xlu1 %v5053_v44, %s5155_s3  ;;  %v3855_v44 = vld [vmem:[#allocation6] sm:$0xff] }
0x26cd   :  { %3639 = vrot.lane.b32.xlu0 %v5055_v37, %s5155_s3  ;;  %v5057_v25 = vpop.eup %5056 }
0x26ce   :  { %v5059_v27 = vpop.eup %5058  ;;  %v3533_v0 = vadd.f32 1.0, %v5057_v25 }
0x26cf   :  { %v3633_v7 = vadd.f32 1.0, %v5059_v27 }
0x26d0   :  { %5060 = vrcp.f32 %v3533_v0 }
0x26d1   :  { %5062 = vrcp.f32 %v3633_v7 }
0x26dd   :  { %v5061_v50 = vpop.eup %5060 }
0x26de   :  { %v5063_v30 = vpop.eup %5062  ;;  %v3537_v14 = vmul.f32 %v5061_v50, %v6058_v57 }
0x26df   :  { %v3637_v4 = vmul.f32 %v5063_v30, %v6060_v32 }
0x273e   :  { %v3540_v29 = vpop.permute.xlu1 %3539 }
0x273f   :  { %v3640_v24 = vpop.permute.xlu0 %3639  ;;  %v3542_v39 = vmul.f32 %v5061_v50, %v3540_v29 }
0x2740   :  { %v3642_v38 = vmul.f32 %v5063_v30, %v3640_v24 }
0x2741   :  { %3544 = vrot.lane.b32.xlu1 %v3542_v39, %s5155_s3 }
0x2742   :  { %3644 = vrot.lane.b32.xlu0 %v3642_v38, %s5155_s3 }
0x27b3   :  { %v3545_v52 = vpop.permute.xlu1 %3544 }
0x27b4   :  { %v3645_v10 = vpop.permute.xlu0 %3644  ;;  %v3547_v13 = vadd.f32 %v3545_v52, %v3537_v14 }
0x27b5   :  { %v3647_v42 = vadd.f32 %v3645_v10, %v3637_v4 }
0x27b6   :  { %5064 = vtanh.f32 %v3547_v13 }
0x27b7   :  { %5066 = vtanh.f32 %v3647_v42 }
0x27c3   :  { %v5065_v43 = vpop.eup %5064 }
0x27c4   :  { %v5067_v18 = vpop.eup %5066  ;;  %3550 = vrot.lane.b32.xlu1 %v5065_v43, %s5155_s3 }
0x27c5   :  { %3650 = vrot.lane.b32.xlu0 %v5067_v18, %s5155_s3 }
0x2836   :  { %v3551_v46 = vpop.permute.xlu1 %3550 }
0x2837   :  { %v3651_v49 = vpop.permute.xlu0 %3650  ;;  %v3553_v54 = vmul.f32 %v5061_v50, %v3551_v46 }
0x2838   :  { %v3653_v53 = vmul.f32 %v5063_v30, %v3651_v49 }
0x2839   :  { %3655 = vrot.lane.b32.xlu1 %v3553_v54, %s5156_s5 }
0x283a   :  { %3755 = vrot.lane.b32.xlu0 %v3653_v53, %s5156_s5 }
0x28ab   :  { %v3656_v55 = vpop.permute.xlu1 %3655 }
0x28ac   :  { %v3756_v17 = vpop.permute.xlu0 %3755  ;;  %4783 = vmatmul.mubr.msk.f32.vlgmr.msra.gmra.mxu0 %vm350_vm3, %v3656_v55 }
0x28ad   :  { %4794 = vmatmul.mubr.msk.f32.vlgmr.msra.gmra.mxu1 %vm350_vm3, %v3756_v17  ;;  %4804 = vmatprep.mubr.msk.f32.mxu0 %vm5154_vm2, %v5153_v6 }
0x28ae   :  { %4815 = vmatprep.mubr.msk.f32.mxu1 %vm5154_vm2, %v5153_v6  ;;  %4797 = vmatpush3.msra.mxu0 %v3858_v16 }
0x28af   :  { %4808 = vmatpush3.msra.mxu1 %v3944_v19  ;;  %4798 = vmatprep.subr.mxu0 %v5153_v6 }
0x28b0   :  { %4809 = vmatprep.subr.mxu1 %v5153_v6  ;;  %4799 = vmatpush3.msra.mxu0 %v3857_v20 }
0x28b1   :  { %4810 = vmatpush3.msra.mxu1 %v3943_v9  ;;  %4800 = vmatprep.subr.mxu0 %v5153_v6 }
0x28b2   :  { %4811 = vmatprep.subr.mxu1 %v5153_v6  ;;  %4801 = vmatpush3.msra.mxu0 %v3856_v34 }
0x28b3   :  { %4812 = vmatpush3.msra.mxu1 %v3942_v15  ;;  %4802 = vmatprep.subr.mxu0 %v5153_v6 }
0x28b4   :  { %4813 = vmatprep.subr.mxu1 %v5153_v6  ;;  %4803 = vmatpush3.msra.mxu0 %v3855_v44  ;;  %v4138_v6 = vld [vmem:[%s6140_s8] ss:$0 sm:$0xff] }
0x28b5   :  { %4814 = vmatpush3.msra.mxu1 %v3941_v23 }
0x296c   :  { %v3725_v47 = vpop.f32.mrf.mxu0 }
0x296d   :  { %v3729_v35 = vadd.f32 %v3725_v47, %v5848_v56  ;;  %v3825_v48 = vpop.f32.mrf.mxu1 }
0x296e   :  { %v3829_v58 = vadd.f32 %v3825_v48, %v5830_v8  ;;  %v4784_v59 = vpop.f32.mrf.mxu0 }
0x296f   :  { %5068 = vtanh.f32 %v3729_v35  ;;  %v4795_v21 = vpop.f32.mrf.mxu1  ;;  %v4134_v62 = vmul.f32 -1.442695, %v3729_v35 }
0x2970   :  { %5070 = vtanh.f32 %v3829_v58  ;;  %v4136_v63 = vmul.f32 -1.442695, %v3829_v58 }
0x2971   :  { %5072 = vpow2.f32 %v4134_v62 }
0x2972   :  { %5074 = vpow2.f32 %v4136_v63 }
0x297c   :  { %v5069_v61 = vpop.eup %5068 }
0x297d   :  { %v5071_v45 = vpop.eup %5070  ;;  %3739 = vrot.lane.b32.xlu1 %v5069_v61, %s5155_s3 }
0x297e   :  { %3839 = vrot.lane.b32.xlu0 %v5071_v45, %s5155_s3  ;;  %v5073_v1 = vpop.eup %5072 }
0x297f   :  { %v5075_v31 = vpop.eup %5074  ;;  %v3733_v56 = vadd.f32 1.0, %v5073_v1 }
0x2980   :  { %v3833_v36 = vadd.f32 1.0, %v5075_v31 }
0x2981   :  { %5076 = vrcp.f32 %v3733_v56 }
0x2982   :  { %5078 = vrcp.f32 %v3833_v36 }
0x298e   :  { %v5077_v8 = vpop.eup %5076 }
0x298f   :  { %v5079_v60 = vpop.eup %5078  ;;  %v3737_v32 = vmul.f32 %v5077_v8, %v3547_v13 }
0x2990   :  { %v3837_v40 = vmul.f32 %v5079_v60, %v3647_v42 }
0x29ef   :  { %v3740_v2 = vpop.permute.xlu1 %3739 }
0x29f0   :  { %v3840_v3 = vpop.permute.xlu0 %3839  ;;  %v3742_v41 = vmul.f32 %v5077_v8, %v3740_v2 }
0x29f1   :  { %v3842_v57 = vmul.f32 %v5079_v60, %v3840_v3 }
0x29f2   :  { %3744 = vrot.lane.b32.xlu1 %v3742_v41, %s5155_s3 }
0x29f3   :  { %3844 = vrot.lane.b32.xlu0 %v3842_v57, %s5155_s3 }
0x2a64   :  { %v3745_v11 = vpop.permute.xlu1 %3744 }
0x2a65   :  { %v3845_v12 = vpop.permute.xlu0 %3844  ;;  %v3747_v51 = vadd.f32 %v3745_v11, %v3737_v32 }
0x2a66   :  { %v3847_v5 = vadd.f32 %v3845_v12, %v3837_v40 }
0x2a67   :  { %5080 = vtanh.f32 %v3747_v51 }
0x2a68   :  { %5082 = vtanh.f32 %v3847_v5 }
0x2a74   :  { %v5081_v26 = vpop.eup %5080 }
0x2a75   :  { %v5083_v28 = vpop.eup %5082  ;;  %3750 = vrot.lane.b32.xlu1 %v5081_v26, %s5155_s3 }
0x2a76   :  { %3850 = vrot.lane.b32.xlu0 %v5083_v28, %s5155_s3 }
0x2ae7   :  { %v3751_v37 = vpop.permute.xlu1 %3750 }
0x2ae8   :  { %v3851_v22 = vpop.permute.xlu0 %3850  ;;  %v3753_v33 = vmul.f32 %v5077_v8, %v3751_v37 }
0x2ae9   :  { %v3853_v25 = vmul.f32 %v5079_v60, %v3851_v22 }
0x2aea   :  { %3860 = vrot.lane.b32.xlu1 %v3753_v33, %s5156_s5 }
0x2aeb   :  { %3946 = vrot.lane.b32.xlu0 %v3853_v25, %s5156_s5 }
0x2b5c   :  { %v3861_v27 = vpop.permute.xlu1 %3860 }
0x2b5d   :  { %v3947_v0 = vpop.permute.xlu0 %3946  ;;  %4805 = vmatmul.mubr.msk.f32.vlgmr.msra.gmra.mxu0 %vm350_vm3, %v3861_v27 }
0x2b5e   :  { %4816 = vmatmul.mubr.msk.f32.vlgmr.msra.gmra.mxu1 %vm350_vm3, %v3947_v0 }
0x2c1d   :  { %v3930_v7 = vpop.f32.mrf.mxu0 }
0x2c1e   :  { %v3940_v50 = vadd.f32 %v4138_v6, %v3930_v7  ;;  %v4016_v29 = vpop.f32.mrf.mxu1 }
0x2c1f   :  { %v4806_v30 = vpop.f32.mrf.mxu0 }
0x2c20   :  { %v4020_v24 = vadd.f32 %v4016_v29, %v3940_v50  ;;  %v4817_v39 = vpop.f32.mrf.mxu1 }
0x2c22   :  { %4021 = vst [vmem:[%s6141_s9] sm:$0xff] %v4020_v24 }
0x2c23   :  { %4026 = vsyncpa [#allocation3], 1 }
0x2c24   :  { %4027 = vsyncpa [#allocation5], 1 }

</bundles_post_ra>
